<compile_context>
chip_gen: v7x
topology: tpu7x:2x2x1
jax: 0.10.0
libtpu: 0.0.40
codegen_flags: <defaults>
</compile_context>

<pallas_src>
import functools
import numpy as np
import jax
import jax.numpy as jnp
from jax.experimental import pallas as pl
from jax.experimental.pallas import tpu as pltpu


# ----------------------------------------------------------------------------
# Pallas batched-matmul kernel with fused bias/activation epilogue
# ----------------------------------------------------------------------------
_LANE = 128
_VMEM_TILE_BUDGET = 26 * 1024 * 1024   # double-buffered tile bytes (fits v7x)
_VMEM_LIMIT = 48 * 1024 * 1024


def _rup(x, m):
    return ((x + m - 1) // m) * m


def _divisor_tile(dim, unit, cap):
    """Largest multiple of `unit` that divides `dim` and is <= cap (>= unit)."""
    best = unit
    t = unit
    cap = min(cap, dim)
    while t <= cap:
        if dim % t == 0:
            best = t
        t += unit
    return best


@functools.lru_cache(maxsize=None)
def _plan(G, M, K, N, out_bytes):
    """Pick padded dims + tiles under a VMEM budget shared by all generations."""
    ku = 16 if K < _LANE else _LANE
    nu = 16 if N < _LANE else _LANE
    Kp, Np = _rup(K, ku), _rup(N, nu)

    # K tile: cover full K when it fits, else a large 128-multiple divisor.
    tk = Kp if Kp <= 4096 else _divisor_tile(Kp, _LANE, 4096)
    if Kp > 4096 and tk < 2048:
        tk = 4096
        Kp = _rup(K, tk)
    # N tile: cover full N when it fits (weights streamed exactly once).
    tn = Np if Np <= 2048 else _divisor_tile(Np, _LANE, 2048)
    if Np > 2048 and tn < 1024:
        tn = 2048
        Np = _rup(N, tn)
    # M tile: prefer a divisor of rup(M,16), else pad M to a 512 multiple.
    Mp = _rup(M, 16)
    tm = _divisor_tile(Mp, 16, 512)
    if tm < 256 and Mp > 512:
        tm = 512
        Mp = _rup(M, tm)

    def fp(tm_, tk_, tn_):
        return (2 * tm_ * tk_ * 2 + 2 * tk_ * tn_ * 2 + 2 * tn_ * 4
                + 2 * tm_ * tn_ * out_bytes + tm_ * tn_ * 4)

    # Shrink the heaviest tile until the double-buffered footprint fits.
    while fp(tm, tk, tn) > _VMEM_TILE_BUDGET:
        opts = []
        if tk > ku:
            opts.append((2 * tm * tk * 2 + 2 * tk * tn * 2, 'k'))
        if tn > nu:
            opts.append((2 * tk * tn * 2 + (2 * out_bytes + 4) * tm * tn, 'n'))
        if tm > 16:
            opts.append((2 * tm * tk * 2 + (2 * out_bytes + 4) * tm * tn, 'm'))
        if not opts:
            break
        _, which = max(opts)
        if which == 'k':
            tk = _divisor_tile(Kp, ku, max(ku, tk // 2))
        elif which == 'n':
            tn = _divisor_tile(Np, nu, max(nu, tn // 2))
        else:
            tm = _divisor_tile(Mp, 16, max(16, tm // 2))

    # Grow tm cheaply (fewer grid steps) for small-K/small-N GEMMs.
    while (tm < min(Mp, 2048) and Mp % (tm * 2) == 0
           and fp(tm * 2, tk, tn) <= _VMEM_TILE_BUDGET // 2):
        tm *= 2

    # v7x megacore: make sure some parallel grid axis has extent >= 2 when the
    # split is free (A is tiny when the M grid collapses to 1).
    if G * (Mp // tm) * (Np // tn) < 2 and tn >= 256:
        tn = _divisor_tile(Np, nu, tn // 2)

    return Mp, Kp, Np, tm, tk, tn


@functools.lru_cache(maxsize=None)
def _make_bmm_kernel(act):
    def kernel(a_ref, b_ref, bias_ref, o_ref, acc_ref):
        @pl.when(pl.program_id(3) == 0)
        def _():
            acc_ref[...] = jnp.zeros_like(acc_ref)

        acc_ref[...] += jnp.dot(a_ref[0], b_ref[0],
                                preferred_element_type=jnp.float32)

        @pl.when(pl.program_id(3) == pl.num_programs(3) - 1)
        def _():
            y = acc_ref[...] + bias_ref[...]
            if act == "leaky_relu":
                y = jnp.where(y > 0, y, 0.2 * y)
            elif act == "relu":
                y = jnp.maximum(y, 0.0)
            elif act == "gelu":
                y = jax.nn.gelu(y, approximate=True)
            elif act == "tanh":
                y = jnp.tanh(y)
            o_ref[0] = y.astype(o_ref.dtype)
    return kernel


def _bmm(a, b, bias=None, *, act=None, out_dtype=jnp.bfloat16):
    """(G, M, K) @ (G, K, N) -> (G, M, N), bf16 MXU operands, f32 accumulator,
    fused bias + activation epilogue, output in `out_dtype`."""
    G, M, K = a.shape
    _, _, N = b.shape
    out_bytes = jnp.dtype(out_dtype).itemsize
    Mp, Kp, Np, tm, tk, tn = _plan(G, M, K, N, out_bytes)

    a = a.astype(jnp.bfloat16)
    b = b.astype(jnp.bfloat16)
    if (Mp, Kp) != (M, K):
        a = jnp.pad(a, ((0, 0), (0, Mp - M), (0, Kp - K)))
    if (Kp, Np) != (K, N):
        b = jnp.pad(b, ((0, 0), (0, Kp - K), (0, Np - N)))
    if bias is None:
        bias_p = jnp.zeros((1, Np), jnp.float32)
    else:
        bias_p = bias.astype(jnp.float32).reshape(1, N)
        if Np != N:
            bias_p = jnp.pad(bias_p, ((0, 0), (0, Np - N)))

    flops = 2 * G * Mp * Np * Kp
    bytes_accessed = 2 * G * (Mp * Kp + Kp * Np) + out_bytes * G * Mp * Np
    out = pl.pallas_call(
        _make_bmm_kernel(act),
        out_shape=jax.ShapeDtypeStruct((G, Mp, Np), out_dtype),
        grid_spec=pltpu.PrefetchScalarGridSpec(
            num_scalar_prefetch=0,
            grid=(G, Mp // tm, Np // tn, Kp // tk),
            in_specs=[
                pl.BlockSpec((1, tm, tk), lambda g, i, j, k: (g, i, k)),
                pl.BlockSpec((1, tk, tn), lambda g, i, j, k: (g, k, j)),
                pl.BlockSpec((1, tn), lambda g, i, j, k: (0, j)),
            ],
            out_specs=pl.BlockSpec((1, tm, tn), lambda g, i, j, k: (g, i, j)),
            scratch_shapes=[pltpu.VMEM((tm, tn), jnp.float32)],
        ),
        compiler_params=pltpu.CompilerParams(
            dimension_semantics=("parallel", "parallel", "parallel",
                                 "arbitrary"),
            vmem_limit_bytes=_VMEM_LIMIT),
        cost_estimate=pl.CostEstimate(flops=flops, transcendentals=0,
                                      bytes_accessed=bytes_accessed),
    )(a, b, bias_p)
    if (Mp, Np) != (M, N):
        out = out[:, :M, :N]
    return out


def linear(x, w, b=None, act=None, out_dtype=jnp.bfloat16):
    return _bmm(x[None], w[None], b, act=act, out_dtype=out_dtype)[0]


# ----------------------------------------------------------------------------
# Conv / conv-transpose via im2col GEMM (GEMM runs in the Pallas kernel)
# ----------------------------------------------------------------------------
def conv2d(x, wmat, bias, kh, kw, stride, padding, act=None,
           out_dtype=jnp.bfloat16):
    """x: (B, C, H, W) NCHW; wmat: (C*kh*kw, O) bf16 (PyTorch weight,
    reshaped (O, C*kh*kw).T at init)."""
    B, C, H, W = x.shape
    O = wmat.shape[1]
    x = x.astype(jnp.bfloat16)
    if padding:
        x = jnp.pad(x, ((0, 0), (0, 0), (padding, padding), (padding, padding)))
    Hp, Wp = H + 2 * padding, W + 2 * padding
    Ho = (Hp - kh) // stride + 1
    Wo = (Wp - kw) // stride + 1
    if kh == 1 and kw == 1 and stride == 1:
        patches = x.transpose(0, 2, 3, 1).reshape(B * Ho * Wo, C)
    else:
        cols = []
        for i in range(kh):
            for j in range(kw):
                cols.append(x[:, :,
                              i:i + stride * (Ho - 1) + 1:stride,
                              j:j + stride * (Wo - 1) + 1:stride])
        patches = jnp.stack(cols, axis=2)                # (B, C, kh*kw, Ho, Wo)
        patches = patches.transpose(0, 3, 4, 1, 2).reshape(B * Ho * Wo,
                                                           C * kh * kw)
    # TODO(synk): im2col + NCHW<->NHWC transposes still materialize in HBM; a
    # direct-conv Pallas kernel with Element-indexed windows would remove them.
    y = _bmm(patches[None], wmat[None], bias, act=act, out_dtype=out_dtype)[0]
    return y.reshape(B, Ho, Wo, O).transpose(0, 3, 1, 2)


def conv_transpose2d(x, wmat):
    """PyTorch ConvTranspose2d(Cin, Cout, 4, 2, 1, bias=False) via the
    sub-pixel (output-parity) decomposition: one 2x2-tap GEMM per layer.
    wmat: (Cin*4, 4*Cout) bf16 precomputed at init."""
    B, C, H, W = x.shape
    Co = wmat.shape[1] // 4
    x = x.astype(jnp.bfloat16)
    xp = jnp.pad(x, ((0, 0), (0, 0), (1, 1), (1, 1)))
    cols = [xp[:, :, dh:dh + H + 1, dw:dw + W + 1]
            for dh in range(2) for dw in range(2)]
    patches = jnp.stack(cols, axis=2)                    # (B, C, 4, H+1, W+1)
    patches = patches.transpose(0, 3, 4, 1, 2).reshape(B * (H + 1) * (W + 1),
                                                       C * 4)
    g = _bmm(patches[None], wmat[None], None)[0]
    g = g.reshape(B, H + 1, W + 1, 2, 2, Co)
    # interleave parities: y[:, 2i+a, 2j+b, :] = g[:, i+a, j+b, a, b, :]
    g4 = jnp.stack([jnp.stack([g[:, a:a + H, bb:bb + W, a, bb, :]
                               for bb in range(2)], axis=3)
                    for a in range(2)], axis=2)          # (B, H, 2, W, 2, Co)
    y = g4.reshape(B, 2 * H, 2 * W, Co)
    return y.transpose(0, 3, 1, 2)


def _convT_mat(w):
    """w: (Cin, Co, 4, 4) numpy -> (Cin*4, 4*Co) parity GEMM matrix (bf16)."""
    Cin, Co = w.shape[0], w.shape[1]
    taps = []
    for dh in range(2):
        for dw in range(2):
            pars = []
            for a in range(2):
                for bb in range(2):
                    pars.append(w[:, :, 3 - 2 * dh - a, 3 - 2 * dw - bb])
            taps.append(np.stack(pars, axis=1))          # (Cin, 4par, Co)
    wm = np.stack(taps, axis=1).reshape(Cin * 4, 4 * Co)
    return jnp.asarray(wm, jnp.bfloat16)


def _final_mat(w):
    """Upsample(2,nearest)+ZeroPad2d((1,0,1,0))+Conv2d(Cin,1,4,pad=1) folded
    into a 3x3 stride-1 conv on the un-upsampled map producing the 4 output
    parities.  w: (1, Cin, 4, 4) numpy -> (Cin*9, 4) bf16."""
    Cin = w.shape[1]
    S = {0: ([0, 1], [2, 3], []), 1: ([0], [1, 2], [3])}
    wm = np.zeros((Cin * 9, 4), np.float32)
    for a in range(2):
        for b in range(2):
            col = a * 2 + b
            for dr in range(3):
                for dc in range(3):
                    acc = np.zeros((Cin,), np.float32)
                    for dy in S[a][dr]:
                        for dx in S[b][dc]:
                            acc += w[0, :, dy, dx]
                    wm[np.arange(Cin) * 9 + dr * 3 + dc, col] = acc
    return jnp.asarray(wm, jnp.bfloat16)


# ----------------------------------------------------------------------------
# Elementwise / norm glue (stats in f32, activations carried in bf16)
# ----------------------------------------------------------------------------
def instance_norm(x, eps=1e-5):
    xf = x.astype(jnp.float32)
    mean = xf.mean(axis=(2, 3), keepdims=True)
    var = xf.var(axis=(2, 3), keepdims=True)
    return ((xf - mean) * jax.lax.rsqrt(var + eps)).astype(jnp.bfloat16)


def layer_norm(x, g, b, eps=1e-5):
    m = x.mean(axis=-1, keepdims=True)
    v = ((x - m) ** 2).mean(axis=-1, keepdims=True)
    return (x - m) * jax.lax.rsqrt(v + eps) * g + b


def pixel_shuffle(x, r=2):
    B, C, H, W = x.shape
    x = x.reshape(B, C // (r * r), r, r, H, W)
    x = x.transpose(0, 1, 4, 2, 5, 3)
    return x.reshape(B, C // (r * r), H * r, W * r)


def up_sampling(x, H, W):
    B, N, C = x.shape
    x = x.transpose(0, 2, 1).reshape(B, C, H, W)
    x = pixel_shuffle(x, 2)
    B, C2, H2, W2 = x.shape
    return x.reshape(B, C2, H2 * W2).transpose(0, 2, 1)


# ----------------------------------------------------------------------------
# Transformer encoder pieces (pre-LN ViT block, eval mode)
# ----------------------------------------------------------------------------
def attention(x, blk, heads):
    B, N, D = x.shape
    hd = D // heads
    qkv = linear(x.reshape(B * N, D), blk['qkv_w'], blk['qkv_b'])
    qkv = qkv.reshape(B, N, 3, heads, hd).transpose(2, 0, 3, 1, 4)
    q = qkv[0].reshape(B * heads, N, hd) * (hd ** -0.5)   # pre-scaled q
    k = qkv[1].reshape(B * heads, N, hd)
    v = qkv[2].reshape(B * heads, N, hd)
    scores = _bmm(q, k.transpose(0, 2, 1), out_dtype=jnp.float32)
    attn = jax.nn.softmax(scores, axis=-1)
    out = _bmm(attn, v)
    out = out.reshape(B, heads, N, hd).transpose(0, 2, 1, 3).reshape(B * N, D)
    out = linear(out, blk['proj_w'], blk['proj_b'], out_dtype=jnp.float32)
    return out.reshape(B, N, D)


def mlp_block(x, blk):
    B, N, D = x.shape
    h = linear(x.reshape(B * N, D), blk['fc1_w'], blk['fc1_b'], act="gelu")
    h = linear(h, blk['fc2_w'], blk['fc2_b'], out_dtype=jnp.float32)
    return h.reshape(B, N, D)


# ----------------------------------------------------------------------------
# Shape-cached jitted layer functions (reused across both V4 sub-models)
# ----------------------------------------------------------------------------
@functools.partial(jax.jit, static_argnames=("normalize",))
def unet_down(x, wmat, *, normalize):
    if normalize:
        y = conv2d(x, wmat, None, 4, 4, stride=2, padding=1)
        return jax.nn.leaky_relu(instance_norm(y), negative_slope=0.2)
    # no norm -> LeakyReLU fused into the GEMM epilogue
    return conv2d(x, wmat, None, 4, 4, stride=2, padding=1, act="leaky_relu")


@jax.jit
def unet_up(x, skip, wmat):
    y = conv_transpose2d(x, wmat)
    y = jax.nn.relu(instance_norm(y))
    return jnp.concatenate([y, skip.astype(jnp.bfloat16)], axis=1)


@functools.partial(jax.jit, static_argnames=("heads",))
def encoder_block(x, blk, *, heads):
    x = x + attention(layer_norm(x, blk['ln1_g'], blk['ln1_b']), blk, heads)
    x = x + mlp_block(layer_norm(x, blk['ln2_g'], blk['ln2_b']), blk)
    return x


def transformer_encoder(x, blocks, heads):
    for blk in blocks:
        x = encoder_block(x, blk, heads=heads)
    return x


@jax.jit
def bottleneck(t3, w1, b1, w2, b2, pos):
    B = t3.shape[0]
    z = t3.reshape(B, -1)                                  # (B, 3072)
    z = linear(z, w1, b1)                                  # (B, 1024)
    z = linear(z, w2, b2, out_dtype=jnp.float32)           # (B, 64*dim)
    return z.reshape(B, pos.shape[1], pos.shape[2]) + pos


@functools.partial(jax.jit, static_argnames=("H", "W"))
def token_upsample(z, pos, *, H, W):
    return up_sampling(z, H, W) + pos


@functools.partial(jax.jit, static_argnames=("H", "W"))
def tokens_to_image(z, wmat, b, *, H, W):
    B, N, C = z.shape
    img = z.transpose(0, 2, 1).reshape(B, C, H, W)
    return conv2d(img, wmat, b, 1, 1, stride=1, padding=0)


@jax.jit
def out_merge(z, tmp_input, wmat, b):
    trans_out = conv2d(z, wmat, b, 3, 3, stride=1, padding=1,
                       out_dtype=jnp.float32)
    return (trans_out + tmp_input) / 2


@jax.jit
def final_block(u7, wmat, bias4):
    # Upsample(2) -> ZeroPad2d((1,0,1,0)) -> Conv2d(128,1,4,pad=1) -> Tanh,
    # refactored as one 3x3 stride-1 parity conv on u7 (tanh fused in kernel).
    B, C, H, W = u7.shape
    xp = jnp.pad(u7.astype(jnp.bfloat16), ((0, 0), (0, 0), (1, 1), (1, 1)))
    cols = [xp[:, :, i:i + H, j:j + W] for i in range(3) for j in range(3)]
    patches = jnp.stack(cols, axis=2).transpose(0, 3, 4, 1, 2)
    patches = patches.reshape(B * H * W, C * 9)
    y = _bmm(patches[None], wmat[None], bias4, act="tanh",
             out_dtype=jnp.float32)[0]                    # (B*H*W, 4 parities)
    y = y.reshape(B, H, W, 2, 2).transpose(0, 1, 3, 2, 4)
    return y.reshape(B, 1, 2 * H, 2 * W)


# ----------------------------------------------------------------------------
# Parameter init (deterministic synthetic weights, pre-cast / pre-reshaped)
# ----------------------------------------------------------------------------
def init_v4(seed, dim=1024, initial_size=8, heads=4, mlp_ratio=4,
            depth1=5, depth2=4, depth3=2):
    rng = np.random.default_rng(seed)

    def nrm(shape, scale):
        return rng.standard_normal(shape, dtype=np.float32) * scale

    def conv_mat(o, c, k):
        w = nrm((o, c, k, k), 1.0 / np.sqrt(c * k * k))
        return jnp.asarray(w.reshape(o, -1).T, jnp.bfloat16)

    def convT_mat(ci, co, k=4):
        return _convT_mat(nrm((ci, co, k, k), 1.0 / np.sqrt(ci * k * k)))

    def lin(i, o):
        return (jnp.asarray(nrm((i, o), 1.0 / np.sqrt(i)), jnp.bfloat16),
                jnp.asarray(nrm((o,), 0.01), jnp.float32))

    def enc(depth, d):
        blocks = []
        hidden = d * mlp_ratio
        for _ in range(depth):
            qkv_w, qkv_b = lin(d, 3 * d)
            proj_w, proj_b = lin(d, d)
            fc1_w, fc1_b = lin(d, hidden)
            fc2_w, fc2_b = lin(hidden, d)
            blocks.append(dict(
                ln1_g=jnp.ones((d,), jnp.float32),
                ln1_b=jnp.zeros((d,), jnp.float32),
                ln2_g=jnp.ones((d,), jnp.float32),
                ln2_b=jnp.zeros((d,), jnp.float32),
                qkv_w=qkv_w, qkv_b=qkv_b, proj_w=proj_w, proj_b=proj_b,
                fc1_w=fc1_w, fc1_b=fc1_b, fc2_w=fc2_w, fc2_b=fc2_b))
        return blocks

    P = dict(dim=dim, initial_size=initial_size, heads=heads)
    # transformer branch
    P['td1'] = conv_mat(16, 1, 4)
    P['td2'] = conv_mat(16, 16, 4)
    P['td3'] = conv_mat(3, 16, 4)
    P['linear1_w'], P['linear1_b'] = lin(3072, 1024)
    P['mlp_w'], P['mlp_b'] = lin(1024, initial_size ** 2 * dim)
    P['pos1'] = jnp.asarray(0.02 * nrm((1, initial_size ** 2, dim), 1.0))
    P['pos2'] = jnp.asarray(0.02 * nrm((1, (initial_size * 2) ** 2, dim // 4), 1.0))
    P['pos3'] = jnp.asarray(0.02 * nrm((1, (initial_size * 4) ** 2, dim // 16), 1.0))
    P['enc1'] = enc(depth1, dim)
    P['enc2'] = enc(depth2, dim // 4)
    P['enc3'] = enc(depth3, dim // 16)
    P['lin_w'] = conv_mat(3, dim // 16, 1)
    P['lin_b'] = jnp.zeros((3,), jnp.float32)
    P['tu1'] = convT_mat(3, 16)
    P['tu2'] = convT_mat(32, 16)
    P['tu3'] = convT_mat(32, 1)
    P['out_w'] = conv_mat(1, 2, 3)
    P['out_b'] = jnp.zeros((1,), jnp.float32)
    # main U-Net
    P['d1'] = conv_mat(64, 1, 4)
    P['d2'] = conv_mat(128, 64, 4)
    P['d3'] = conv_mat(256, 128, 4)
    P['d4'] = conv_mat(512, 256, 4)
    P['d5'] = conv_mat(512, 512, 4)
    P['d6'] = conv_mat(512, 512, 4)
    P['d7'] = conv_mat(512, 512, 4)
    P['d8'] = conv_mat(512, 512, 4)
    P['u1'] = convT_mat(512, 512)
    P['u2'] = convT_mat(1024, 512)
    P['u3'] = convT_mat(1024, 512)
    P['u4'] = convT_mat(1024, 512)
    P['u5'] = convT_mat(1024, 256)
    P['u6'] = convT_mat(512, 128)
    P['u7'] = convT_mat(256, 64)
    P['final_w'] = _final_mat(nrm((1, 128, 4, 4), 1.0 / np.sqrt(128 * 16)))
    P['final_b'] = jnp.zeros((4,), jnp.float32)
    return P


# ----------------------------------------------------------------------------
# Forward pass of TransGeneratorUNetV4 / TransGeneratorUNet_ABAB
# ----------------------------------------------------------------------------
def apply_v4(P, x):
    initial_size, heads = P['initial_size'], P['heads']
    tmp_input = x

    # transformer branch encoder
    t1 = unet_down(x, P['td1'], normalize=True)        # (B, 16, 128, 128)
    t2 = unet_down(t1, P['td2'], normalize=True)       # (B, 16, 64, 64)
    t3 = unet_down(t2, P['td3'], normalize=True)       # (B, 3, 32, 32)

    z = bottleneck(t3, P['linear1_w'], P['linear1_b'],
                   P['mlp_w'], P['mlp_b'], P['pos1'])   # (B, 64, 1024)
    H = W = initial_size
    z = transformer_encoder(z, P['enc1'], heads)
    z = token_upsample(z, P['pos2'], H=H, W=W); H, W = H * 2, W * 2
    z = transformer_encoder(z, P['enc2'], heads)
    z = token_upsample(z, P['pos3'], H=H, W=W); H, W = H * 2, W * 2
    z = transformer_encoder(z, P['enc3'], heads)

    z = tokens_to_image(z, P['lin_w'], P['lin_b'], H=H, W=W)   # (B, 3, 32, 32)

    z = unet_up(z, t2, P['tu1'])             # (B, 32, 64, 64)
    z = unet_up(z, t1, P['tu2'])             # (B, 32, 128, 128)
    z = unet_up(z, tmp_input, P['tu3'])      # (B, 2, 256, 256)
    new_in = out_merge(z, tmp_input, P['out_w'], P['out_b'])

    # main U-Net
    d1 = unet_down(new_in, P['d1'], normalize=False)
    d2 = unet_down(d1, P['d2'], normalize=True)
    d3 = unet_down(d2, P['d3'], normalize=True)
    d4 = unet_down(d3, P['d4'], normalize=True)
    d5 = unet_down(d4, P['d5'], normalize=True)
    d6 = unet_down(d5, P['d6'], normalize=True)
    d7 = unet_down(d6, P['d7'], normalize=True)
    d8 = unet_down(d7, P['d8'], normalize=False)

    u1 = unet_up(d8, d7, P['u1'])
    u2 = unet_up(u1, d6, P['u2'])
    u3 = unet_up(u2, d5, P['u3'])
    u4 = unet_up(u3, d4, P['u4'])
    u5 = unet_up(u4, d3, P['u5'])
    u6 = unet_up(u5, d2, P['u6'])
    u7 = unet_up(u6, d1, P['u7'])

    return final_block(u7, P['final_w'], P['final_b'])


def apply_abab(p1, p2, x):
    original_input = x
    out = apply_v4(p1, x)
    out = apply_v4(p2, (out + original_input) / 2)
    return out


# ----------------------------------------------------------------------------
# main
# ----------------------------------------------------------------------------
if __name__ == "__main__":
    key = jax.random.PRNGKey(0)
    # Input shape is forced by the architecture: the hard-coded 3*32*32 flatten
    # after three stride-2 convs and the 8 stride-2 downsamples of the main
    # U-Net imply a 256x256, 1-channel input.  Batch kept minimal (1).
    x = jax.random.normal(key, (1, 1, 256, 256), jnp.float32)

    params1 = init_v4(1, dim=1024, initial_size=8, heads=4, mlp_ratio=4,
                      depth1=5, depth2=4, depth3=2)
    params2 = init_v4(2, dim=1024, initial_size=8, heads=4, mlp_ratio=4,
                      depth1=5, depth2=4, depth3=2)

    out = apply_abab(params1, params2, x)
    out = jax.block_until_ready(out)
    assert out.shape == (1, 1, 256, 256), out.shape
    assert bool(jnp.all(jnp.isfinite(out)))
    print("KERNEL_OK")
</pallas_src>

<mosaic_0001>
module attributes {stable_mosaic.version = 11 : i64} {
  func.func @kernel(%arg0: i32, %arg1: i32, %arg2: i32, %arg3: i32, %arg4: memref<1x2048x16xbf16, #tpu.memory_space<vmem>>, %arg5: memref<1x16x16xbf16, #tpu.memory_space<vmem>>, %arg6: memref<1x16xf32, #tpu.memory_space<vmem>>, %arg7: memref<1x2048x16xbf16, #tpu.memory_space<vmem>>, %arg8: memref<2048x16xf32, #tpu.memory_space<vmem>>) attributes {dimension_semantics = [#tpu.dimension_semantics<parallel>, #tpu.dimension_semantics<parallel>, #tpu.dimension_semantics<parallel>, #tpu.dimension_semantics<arbitrary>], iteration_bounds = array<i64: 1, 8, 1, 1>, scalar_prefetch = 0 : i64, scratch_operands = 1 : i64, tpu.core_type = #tpu.core_type<tc>, window_params = [{transform_indices = @transform_0, window_bounds = array<i64: 1, 2048, 16>}, {transform_indices = @transform_1, window_bounds = array<i64: 1, 16, 16>}, {transform_indices = @transform_2, window_bounds = array<i64: 1, 16>}, {transform_indices = @transform_3, window_bounds = array<i64: 1, 2048, 16>}]} {
    %c0_i32 = arith.constant 0 : i32
    %0 = arith.cmpi eq, %arg3, %c0_i32 : i32
    %1 = arith.extui %0 : i1 to i32
    %c0_i32_0 = arith.constant 0 : i32
    %2 = arith.cmpi ne, %1, %c0_i32_0 : i32
    scf.if %2 {
      %cst_12 = arith.constant 0.000000e+00 : f32
      %14 = vector.broadcast %cst_12 : f32 to vector<2048x16xf32>
      %c0_13 = arith.constant 0 : index
      %c0_14 = arith.constant 0 : index
      %15 = vector.load %arg8[%c0_13, %c0_14] : memref<2048x16xf32, #tpu.memory_space<vmem>>, vector<2048x16xf32>
      tpu.vector_store %arg8[%c0_13, %c0_14], %14 {strides = array<i32>} : memref<2048x16xf32, #tpu.memory_space<vmem>>, vector<2048x16xf32>,
    } else {
    }
    %c0 = arith.constant 0 : index
    %c0_1 = arith.constant 0 : index
    %3 = vector.load %arg8[%c0, %c0_1] : memref<2048x16xf32, #tpu.memory_space<vmem>>, vector<2048x16xf32>
    %c0_2 = arith.constant 0 : index
    %c0_3 = arith.constant 0 : index
    %c0_4 = arith.constant 0 : index
    %4 = vector.load %arg4[%c0_2, %c0_3, %c0_4] : memref<1x2048x16xbf16, #tpu.memory_space<vmem>>, vector<1x2048x16xbf16>
    %5 = vector.shape_cast %4 : vector<1x2048x16xbf16> to vector<2048x16xbf16>
    %c0_5 = arith.constant 0 : index
    %c0_6 = arith.constant 0 : index
    %c0_7 = arith.constant 0 : index
    %6 = vector.load %arg5[%c0_5, %c0_6, %c0_7] : memref<1x16x16xbf16, #tpu.memory_space<vmem>>, vector<1x16x16xbf16>
    %7 = vector.shape_cast %6 : vector<1x16x16xbf16> to vector<16x16xbf16>
    %cst = arith.constant dense<0.000000e+00> : vector<2048x16xf32>
    %8 = tpu.matmul %5, %7, %cst {dimension_numbers = #tpu.dot_dimension_numbers<[1], [0], [0], [1], [0, 0, 1, 1], [], []>} : vector<2048x16xbf16>, vector<16x16xbf16>, vector<2048x16xf32> -> vector<2048x16xf32>
    %9 = arith.addf %3, %8 : vector<2048x16xf32>
    %c0_8 = arith.constant 0 : index
    %c0_9 = arith.constant 0 : index
    %10 = vector.load %arg8[%c0_8, %c0_9] : memref<2048x16xf32, #tpu.memory_space<vmem>>, vector<2048x16xf32>
    tpu.vector_store %arg8[%c0_8, %c0_9], %9 {strides = array<i32>} : memref<2048x16xf32, #tpu.memory_space<vmem>>, vector<2048x16xf32>,
    %c0_i32_10 = arith.constant 0 : i32
    %11 = arith.cmpi eq, %arg3, %c0_i32_10 : i32
    %12 = arith.extui %11 : i1 to i32
    %c0_i32_11 = arith.constant 0 : i32
    %13 = arith.cmpi ne, %12, %c0_i32_11 : i32
    scf.if %13 {
      %c0_12 = arith.constant 0 : index
      %c0_13 = arith.constant 0 : index
      %14 = vector.load %arg8[%c0_12, %c0_13] : memref<2048x16xf32, #tpu.memory_space<vmem>>, vector<2048x16xf32>
      %c0_14 = arith.constant 0 : index
      %c0_15 = arith.constant 0 : index
      %15 = vector.load %arg6[%c0_14, %c0_15] : memref<1x16xf32, #tpu.memory_space<vmem>>, vector<1x16xf32>
      %16 = vector.broadcast %15 : vector<1x16xf32> to vector<2048x16xf32>
      %17 = arith.addf %14, %16 : vector<2048x16xf32>
      %18 = arith.truncf %17 : vector<2048x16xf32> to vector<2048x16xbf16>
      %c0_16 = arith.constant 0 : index
      %c0_17 = arith.constant 0 : index
      %c0_18 = arith.constant 0 : index
      %19 = vector.load %arg7[%c0_16, %c0_17, %c0_18] : memref<1x2048x16xbf16, #tpu.memory_space<vmem>>, vector<1x2048x16xbf16>
      %20 = vector.shape_cast %19 : vector<1x2048x16xbf16> to vector<2048x16xbf16>
      %21 = vector.shape_cast %18 : vector<2048x16xbf16> to vector<1x2048x16xbf16>
      tpu.vector_store %arg7[%c0_16, %c0_17, %c0_18], %21 {strides = array<i32>} : memref<1x2048x16xbf16, #tpu.memory_space<vmem>>, vector<1x2048x16xbf16>,
    } else {
    }
    return
  }
  func.func @transform_0(%arg0: i32, %arg1: i32, %arg2: i32, %arg3: i32) -> (i32, i32, i32) {
    %c0_i32 = arith.constant 0 : i32
    return %arg0, %arg1, %arg3 : i32, i32, i32
  }
  func.func @transform_1(%arg0: i32, %arg1: i32, %arg2: i32, %arg3: i32) -> (i32, i32, i32) {
    %c0_i32 = arith.constant 0 : i32
    return %arg0, %arg3, %arg2 : i32, i32, i32
  }
  func.func @transform_2(%arg0: i32, %arg1: i32, %arg2: i32, %arg3: i32) -> (i32, i32) {
    %c0_i32 = arith.constant 0 : i32
    %c0_i32_0 = arith.constant 0 : i32
    return %c0_i32, %arg2 : i32, i32
  }
  func.func @transform_3(%arg0: i32, %arg1: i32, %arg2: i32, %arg3: i32) -> (i32, i32, i32) {
    %c0_i32 = arith.constant 0 : i32
    return %arg0, %arg1, %arg2 : i32, i32, i32
  }
}

</mosaic_0001>

<bundles_post_ra>
// kernel: unet_down.1
= control target key start
LH: loop header
LB: loop body
LE: loop exit
PB: predicated region body
PF: predicated region fallthrough
CT: control target
= control target key end

     0   :  { %s6999_s12 = smov 0   ;;  %s7001_s13 = smov 0   ;;  %s8867_s0 = inlined_call_operand.vmem [shape: bf16[1,16384,16], index: 0, kind: input, shape index: {}]   ;;  %s8868_s1 = inlined_call_operand.vmem [shape: bf16[1,16,16], index: 1, kind: input, shape index: {}]   ;;  %s8869_s2 = inlined_call_operand.vmem [shape: f32[1,16], index: 2, kind: input, shape index: {}]   ;;  %s8870_s3 = inlined_call_operand.vmem [shape: bf16[1,16384,16], index: 3, kind: output, shape index: {}]  }
   0x1   :  { %s7003_s14 = smov 0  }
   0x2 LB: > { %s35_s15 = sadd.s32 1, %s6972_s13  ;;  %p5631_p0 = scmp.ge.s32.totalorder %s6976_s14, 1  ;;  %s6976_s14 = sphi %s7003_s14, %s13_s14   ;;  %s6972_s13 = sphi %s7001_s13, %s8872_s13   ;;  %s6968_s12 = sphi %s6999_s12, %s8871_s12  }
   0x3   : > { %p37_p1 = scmp.ge.s32.totalorder %s35_s15, 8  ;;  %p209_p2 = scmp.lt.s32.totalorder %s6976_s14, 9 }
   0x5   : > { %s8874_s15 = smov (%p37_p1, %s35_s15), 0  ;;  %p210_p3 = pnand %p5631_p0, %p209_p2 }
   0x6   : > { %v6822_v0 = vld [vmem:[%s8868_s1] sm:$0xff] (!%p210_p3)   ;;  %s5632_s18 = sshll.u32 (!%p210_p3), %s6968_s12, 8  ;;  %vm309_vm0 = vcmask (!%p210_p3), 130048   ;;  %v6978_v46 = vmov (!%p210_p3), 0.0   ;;  %vm5226_vm1 = vcmask (!%p210_p3), 125952  }
   0x7   : > { %213 = sbr.rel (%p210_p3) target bundleno = 523 (0x20b), region = 32  ;;  %p265_p4 = scmp.lt.s32.totalorder (!%p210_p3), %s5632_s18, 2047  ;;  %6537 = vmatprep.subr.bf16.mxu0 (!%p210_p3), %v6822_v0  ;;  %6795 = vmatprep.subr.bf16.mxu1 (!%p210_p3), %v6822_v0  ;;  %312 = vst.msk [vmem:[#allocation2 + $0x10] sm:$0xff] (!%p210_p3), %vm309_vm0, %v6978_v46  ;;  %310 = vst.msk [vmem:[#allocation2] sm:$0xff] (!%p210_p3), %vm309_vm0, %v6978_v46 }
   0x8   : > { %6538 = vmatpush3.bf16.msra.mxu0 (!%p210_p3), %v6822_v0  ;;  %6796 = vmatpush3.bf16.msra.mxu1 (!%p210_p3), %v6822_v0  ;;  %311 = vst.msk [vmem:[#allocation2 + $0x8] sm:$0xff] (!%p210_p3), %vm309_vm0, %v6978_v46  ;;  %313 = vst.msk [vmem:[#allocation2 + $0x18] sm:$0xff] (!%p210_p3), %vm309_vm0, %v6978_v46 }
   0x9   : > { %314 = vst.msk [vmem:[#allocation2 + $0x20] sm:$0xff] (!%p210_p3), %vm309_vm0, %v6978_v46  ;;  %315 = vst.msk [vmem:[#allocation2 + $0x28] sm:$0xff] (!%p210_p3), %vm309_vm0, %v6978_v46 }
   0xa   : > { %316 = vst.msk [vmem:[#allocation2 + $0x30] sm:$0xff] (!%p210_p3), %vm309_vm0, %v6978_v46  ;;  %317 = vst.msk [vmem:[#allocation2 + $0x38] sm:$0xff] (!%p210_p3), %vm309_vm0, %v6978_v46 }
   0xb   : > { %318 = vst.msk [vmem:[#allocation2 + $0x40] sm:$0xff] (!%p210_p3), %vm309_vm0, %v6978_v46  ;;  %319 = vst.msk [vmem:[#allocation2 + $0x48] sm:$0xff] (!%p210_p3), %vm309_vm0, %v6978_v46 }
   0xc   : > { %320 = vst.msk [vmem:[#allocation2 + $0x50] sm:$0xff] (!%p210_p3), %vm309_vm0, %v6978_v46  ;;  %321 = vst.msk [vmem:[#allocation2 + $0x58] sm:$0xff] (!%p210_p3), %vm309_vm0, %v6978_v46 }
   0xd   : > { %322 = vst.msk [vmem:[#allocation2 + $0x60] sm:$0xff] (!%p210_p3), %vm309_vm0, %v6978_v46  ;;  %323 = vst.msk [vmem:[#allocation2 + $0x68] sm:$0xff] (!%p210_p3), %vm309_vm0, %v6978_v46 }
   0xe   : > { %s8876_s18 = smov (!%p265_p4, %s5632_s18), 2047  ;;  %324 = vst.msk [vmem:[#allocation2 + $0x70] sm:$0xff] %vm309_vm0, %v6978_v46  ;;  %325 = vst.msk [vmem:[#allocation2 + $0x78] sm:$0xff] %vm309_vm0, %v6978_v46 }
   0xf   : > { %s5633_s19 = sshll.u32 %s8876_s18, 2  ;;  %326 = vst.msk [vmem:[#allocation2 + $0x80] sm:$0xff] %vm309_vm0, %v6978_v46  ;;  %327 = vst.msk [vmem:[#allocation2 + $0x88] sm:$0xff] %vm309_vm0, %v6978_v46 }
  0x10   : > { %s7028_s22 = scalar_lea.vmem %s8867_s0, %s5633_s19  ;;  %328 = vst.msk [vmem:[#allocation2 + $0x90] sm:$0xff] %vm309_vm0, %v6978_v46  ;;  %329 = vst.msk [vmem:[#allocation2 + $0x98] sm:$0xff] %vm309_vm0, %v6978_v46  ;;  %s7803_s27 = scalar_lea.vmem %s8870_s3, %s5633_s19 }
  0x11   : > { %v6823_v1 = vld [vmem:[%s7028_s22] sm:$0xff]   ;;  %v6825_v3 = vld [vmem:[%s7028_s22 + $0x8] sm:$0xff]   ;;  %v6827_v5 = vld [vmem:[%s7028_s22 + $0x10] sm:$0xff]   ;;  %330 = vst.msk [vmem:[#allocation2 + $0xa0] sm:$0xff] %vm309_vm0, %v6978_v46 }
  0x12   : > { %v6824_v2 = vld [vmem:[%s7028_s22 + $0x200] sm:$0xff]   ;;  %6539 = vmatprep.mubr.msk.bf16.mxu0 %vm309_vm0, %v6823_v1  ;;  %v6826_v4 = vld [vmem:[%s7028_s22 + $0x208] sm:$0xff]   ;;  %v6828_v6 = vld [vmem:[%s7028_s22 + $0x210] sm:$0xff]   ;;  %331 = vst.msk [vmem:[#allocation2 + $0xa8] sm:$0xff] %vm309_vm0, %v6978_v46 }
  0x13   : > { %6667 = vmatprep.mubr.msk.bf16.mxu1 %vm309_vm0, %v6824_v2  ;;  %6540 = vmatmul.mubr.msk.bf16.vlgmr.msra.gmra.mrb[0].mxu0 %vm309_vm0, %v6825_v3  ;;  %v6829_v7 = vld [vmem:[%s7028_s22 + $0x18] sm:$0xff]   ;;  %v6831_v9 = vld [vmem:[%s7028_s22 + $0x20] sm:$0xff]   ;;  %v6833_v11 = vld [vmem:[%s7028_s22 + $0x28] sm:$0xff]   ;;  %332 = vst.msk [vmem:[#allocation2 + $0xb0] sm:$0xff] %vm309_vm0, %v6978_v46 }
  0x14   : > { %6668 = vmatmul.mubr.msk.bf16.vlgmr.msra.gmra.mrb[0].mxu1 %vm309_vm0, %v6826_v4  ;;  %6543 = vmatprep.mubr.msk.bf16.mxu0 %vm309_vm0, %v6827_v5  ;;  %v6830_v8 = vld [vmem:[%s7028_s22 + $0x218] sm:$0xff]   ;;  %v6832_v10 = vld [vmem:[%s7028_s22 + $0x220] sm:$0xff]   ;;  %v6834_v12 = vld [vmem:[%s7028_s22 + $0x228] sm:$0xff]   ;;  %333 = vst.msk [vmem:[#allocation2 + $0xb8] sm:$0xff] %vm309_vm0, %v6978_v46 }
  0x15   : > { %6671 = vmatprep.mubr.msk.bf16.mxu1 %vm309_vm0, %v6828_v6  ;;  %v6835_v13 = vld [vmem:[%s7028_s22 + $0x30] sm:$0xff]   ;;  %v6837_v15 = vld [vmem:[%s7028_s22 + $0x38] sm:$0xff]   ;;  %v6839_v17 = vld [vmem:[%s7028_s22 + $0x40] sm:$0xff]   ;;  %334 = vst.msk [vmem:[#allocation2 + $0xc0] sm:$0xff] %vm309_vm0, %v6978_v46 }
  0x16   : > { %v6836_v14 = vld [vmem:[%s7028_s22 + $0x230] sm:$0xff]   ;;  %v6838_v16 = vld [vmem:[%s7028_s22 + $0x238] sm:$0xff]   ;;  %v6840_v18 = vld [vmem:[%s7028_s22 + $0x240] sm:$0xff]   ;;  %335 = vst.msk [vmem:[#allocation2 + $0xc8] sm:$0xff] %vm309_vm0, %v6978_v46 }
  0x17   : > { %v6841_v19 = vld [vmem:[%s7028_s22 + $0x48] sm:$0xff]   ;;  %v6843_v21 = vld [vmem:[%s7028_s22 + $0x50] sm:$0xff]   ;;  %v6845_v23 = vld [vmem:[%s7028_s22 + $0x58] sm:$0xff]   ;;  %336 = vst.msk [vmem:[#allocation2 + $0xd0] sm:$0xff] %vm309_vm0, %v6978_v46 }
  0x18   : > { %v6842_v20 = vld [vmem:[%s7028_s22 + $0x248] sm:$0xff]   ;;  %v6844_v22 = vld [vmem:[%s7028_s22 + $0x250] sm:$0xff]   ;;  %v6846_v24 = vld [vmem:[%s7028_s22 + $0x258] sm:$0xff]   ;;  %337 = vst.msk [vmem:[#allocation2 + $0xd8] sm:$0xff] %vm309_vm0, %v6978_v46 }
  0x19   : > { %v6847_v25 = vld [vmem:[%s7028_s22 + $0x60] sm:$0xff]   ;;  %v6849_v27 = vld [vmem:[%s7028_s22 + $0x68] sm:$0xff]   ;;  %v6851_v29 = vld [vmem:[%s7028_s22 + $0x70] sm:$0xff]   ;;  %338 = vst.msk [vmem:[#allocation2 + $0xe0] sm:$0xff] %vm309_vm0, %v6978_v46 }
  0x1a   : > { %v6848_v26 = vld [vmem:[%s7028_s22 + $0x260] sm:$0xff]   ;;  %v6850_v28 = vld [vmem:[%s7028_s22 + $0x268] sm:$0xff]   ;;  %v6852_v30 = vld [vmem:[%s7028_s22 + $0x270] sm:$0xff]   ;;  %339 = vst.msk [vmem:[#allocation2 + $0xe8] sm:$0xff] %vm309_vm0, %v6978_v46 }
  0x1b   : > { %6544 = vmatmul.mubr.msk.bf16.gmra.mrb[4].mxu0 %vm309_vm0, %v6829_v7  ;;  %v6853_v31 = vld [vmem:[%s7028_s22 + $0x78] sm:$0xff]   ;;  %v6855_v33 = vld [vmem:[%s7028_s22 + $0x80] sm:$0xff]   ;;  %v6857_v35 = vld [vmem:[%s7028_s22 + $0x88] sm:$0xff]   ;;  %340 = vst.msk [vmem:[#allocation2 + $0xf0] sm:$0xff] %vm309_vm0, %v6978_v46 }
  0x1c   : > { %6672 = vmatmul.mubr.msk.bf16.gmra.mrb[4].mxu1 %vm309_vm0, %v6830_v8  ;;  %6547 = vmatprep.mubr.msk.bf16.mxu0 %vm309_vm0, %v6831_v9  ;;  %v6854_v32 = vld [vmem:[%s7028_s22 + $0x278] sm:$0xff]   ;;  %v6856_v34 = vld [vmem:[%s7028_s22 + $0x280] sm:$0xff]   ;;  %v6858_v36 = vld [vmem:[%s7028_s22 + $0x288] sm:$0xff]   ;;  %341 = vst.msk [vmem:[#allocation2 + $0xf8] sm:$0xff] %vm309_vm0, %v6978_v46 }
  0x1d   : > { %6675 = vmatprep.mubr.msk.bf16.mxu1 %vm309_vm0, %v6832_v10  ;;  %v6859_v37 = vld [vmem:[%s7028_s22 + $0x90] sm:$0xff]   ;;  %v6861_v39 = vld [vmem:[%s7028_s22 + $0x98] sm:$0xff]   ;;  %v6863_v41 = vld [vmem:[%s7028_s22 + $0xa0] sm:$0xff]   ;;  %342 = vst.msk [vmem:[#allocation2 + $0x100] sm:$0xff] %vm309_vm0, %v6978_v46 }
  0x1e   : > { %v6860_v38 = vld [vmem:[%s7028_s22 + $0x290] sm:$0xff]   ;;  %v6862_v40 = vld [vmem:[%s7028_s22 + $0x298] sm:$0xff]   ;;  %v6864_v42 = vld [vmem:[%s7028_s22 + $0x2a0] sm:$0xff]   ;;  %343 = vst.msk [vmem:[#allocation2 + $0x108] sm:$0xff] %vm309_vm0, %v6978_v46 }
  0x1f   : > { %v7115_v43 = vld [vmem:[%s7028_s22 + $0xa8] sm:$0xff]   ;;  %v7121_v45 = vld [vmem:[%s7028_s22 + $0xb0] sm:$0xff]   ;;  %344 = vst.msk [vmem:[#allocation2 + $0x110] sm:$0xff] %vm309_vm0, %v6978_v46  ;;  %345 = vst.msk [vmem:[#allocation2 + $0x118] sm:$0xff] %vm309_vm0, %v6978_v46 }
  0x20   : > { %v7118_v44 = vld [vmem:[%s7028_s22 + $0x2a8] sm:$0xff]   ;;  %346 = vst.msk [vmem:[#allocation2 + $0x120] sm:$0xff] %vm309_vm0, %v6978_v46  ;;  %347 = vst.msk [vmem:[#allocation2 + $0x128] sm:$0xff] %vm309_vm0, %v6978_v46  ;;  %v6868_v47 = vld [vmem:[%s7028_s22 + $0x2b0] sm:$0xff]  }
  0x21   : > { %348 = vst.msk [vmem:[#allocation2 + $0x130] sm:$0xff] %vm309_vm0, %v6978_v46  ;;  %349 = vst.msk [vmem:[#allocation2 + $0x138] sm:$0xff] %vm309_vm0, %v6978_v46  ;;  %v6869_v48 = vld [vmem:[%s7028_s22 + $0xb8] sm:$0xff]   ;;  %v6871_v50 = vld [vmem:[%s7028_s22 + $0xc0] sm:$0xff]  }
  0x22   : > { %350 = vst.msk [vmem:[#allocation2 + $0x140] sm:$0xff] %vm309_vm0, %v6978_v46  ;;  %351 = vst.msk [vmem:[#allocation2 + $0x148] sm:$0xff] %vm309_vm0, %v6978_v46  ;;  %v6870_v49 = vld [vmem:[%s7028_s22 + $0x2b8] sm:$0xff]   ;;  %v6872_v51 = vld [vmem:[%s7028_s22 + $0x2c0] sm:$0xff]  }
  0x23   : > { %6548 = vmatmul.mubr.msk.bf16.gmra.mrb[8].mxu0 %vm309_vm0, %v6833_v11  ;;  %352 = vst.msk [vmem:[#allocation2 + $0x150] sm:$0xff] %vm309_vm0, %v6978_v46  ;;  %353 = vst.msk [vmem:[#allocation2 + $0x158] sm:$0xff] %vm309_vm0, %v6978_v46  ;;  %v6873_v52 = vld [vmem:[%s7028_s22 + $0xc8] sm:$0xff]   ;;  %v6875_v54 = vld [vmem:[%s7028_s22 + $0xd0] sm:$0xff]  }
  0x24   : > { %6676 = vmatmul.mubr.msk.bf16.gmra.mrb[8].mxu1 %vm309_vm0, %v6834_v12  ;;  %6551 = vmatprep.mubr.msk.bf16.mxu0 %vm309_vm0, %v6835_v13  ;;  %354 = vst.msk [vmem:[#allocation2 + $0x160] sm:$0xff] %vm309_vm0, %v6978_v46  ;;  %355 = vst.msk [vmem:[#allocation2 + $0x168] sm:$0xff] %vm309_vm0, %v6978_v46  ;;  %v6874_v53 = vld [vmem:[%s7028_s22 + $0x2c8] sm:$0xff]   ;;  %v6876_v55 = vld [vmem:[%s7028_s22 + $0x2d0] sm:$0xff]  }
  0x25   : > { %6679 = vmatprep.mubr.msk.bf16.mxu1 %vm309_vm0, %v6836_v14  ;;  %356 = vst.msk [vmem:[#allocation2 + $0x170] sm:$0xff] %vm309_vm0, %v6978_v46  ;;  %357 = vst.msk [vmem:[#allocation2 + $0x178] sm:$0xff] %vm309_vm0, %v6978_v46  ;;  %v6877_v56 = vld [vmem:[%s7028_s22 + $0xd8] sm:$0xff]   ;;  %v6879_v58 = vld [vmem:[%s7028_s22 + $0xe0] sm:$0xff]  }
  0x26   : > { %358 = vst.msk [vmem:[#allocation2 + $0x180] sm:$0xff] %vm309_vm0, %v6978_v46  ;;  %359 = vst.msk [vmem:[#allocation2 + $0x188] sm:$0xff] %vm309_vm0, %v6978_v46  ;;  %v6878_v57 = vld [vmem:[%s7028_s22 + $0x2d8] sm:$0xff]   ;;  %v6880_v59 = vld [vmem:[%s7028_s22 + $0x2e0] sm:$0xff]  }
  0x27   : > { %360 = vst.msk [vmem:[#allocation2 + $0x190] sm:$0xff] %vm309_vm0, %v6978_v46  ;;  %361 = vst.msk [vmem:[#allocation2 + $0x198] sm:$0xff] %vm309_vm0, %v6978_v46  ;;  %v6881_v60 = vld [vmem:[%s7028_s22 + $0xe8] sm:$0xff]   ;;  %v6883_v62 = vld [vmem:[%s7028_s22 + $0xf0] sm:$0xff]  }
  0x28   : > { %362 = vst.msk [vmem:[#allocation2 + $0x1a0] sm:$0xff] %vm309_vm0, %v6978_v46  ;;  %363 = vst.msk [vmem:[#allocation2 + $0x1a8] sm:$0xff] %vm309_vm0, %v6978_v46  ;;  %v6882_v61 = vld [vmem:[%s7028_s22 + $0x2e8] sm:$0xff]   ;;  %v6884_v63 = vld [vmem:[%s7028_s22 + $0x2f0] sm:$0xff]  }
  0x29   : > { %364 = vst.msk [vmem:[#allocation2 + $0x1b0] sm:$0xff] %vm309_vm0, %v6978_v46  ;;  %365 = vst.msk [vmem:[#allocation2 + $0x1b8] sm:$0xff] %vm309_vm0, %v6978_v46  ;;  %v6885_v0 = vld [vmem:[%s7028_s22 + $0xf8] sm:$0xff]   ;;  %v6887_v2 = vld [vmem:[%s7028_s22 + $0x100] sm:$0xff]  }
  0x2a   : > { %366 = vst.msk [vmem:[#allocation2 + $0x1c0] sm:$0xff] %vm309_vm0, %v6978_v46  ;;  %367 = vst.msk [vmem:[#allocation2 + $0x1c8] sm:$0xff] %vm309_vm0, %v6978_v46  ;;  %v6886_v1 = vld [vmem:[%s7028_s22 + $0x2f8] sm:$0xff]   ;;  %v6888_v3 = vld [vmem:[%s7028_s22 + $0x300] sm:$0xff]  }
  0x2b   : > { %6552 = vmatmul.mubr.msk.bf16.gmra.mrb[12].mxu0 %vm309_vm0, %v6837_v15  ;;  %368 = vst.msk [vmem:[#allocation2 + $0x1d0] sm:$0xff] %vm309_vm0, %v6978_v46  ;;  %369 = vst.msk [vmem:[#allocation2 + $0x1d8] sm:$0xff] %vm309_vm0, %v6978_v46  ;;  %v6889_v4 = vld [vmem:[%s7028_s22 + $0x108] sm:$0xff]   ;;  %v6891_v6 = vld [vmem:[%s7028_s22 + $0x110] sm:$0xff]  }
  0x2c   : > { %6680 = vmatmul.mubr.msk.bf16.gmra.mrb[12].mxu1 %vm309_vm0, %v6838_v16  ;;  %6555 = vmatprep.mubr.msk.bf16.mxu0 %vm309_vm0, %v6839_v17  ;;  %370 = vst.msk [vmem:[#allocation2 + $0x1e0] sm:$0xff] %vm309_vm0, %v6978_v46  ;;  %371 = vst.msk [vmem:[#allocation2 + $0x1e8] sm:$0xff] %vm309_vm0, %v6978_v46  ;;  %v6890_v5 = vld [vmem:[%s7028_s22 + $0x308] sm:$0xff]   ;;  %v6892_v7 = vld [vmem:[%s7028_s22 + $0x310] sm:$0xff]  }
  0x2d   : > { %6683 = vmatprep.mubr.msk.bf16.mxu1 %vm309_vm0, %v6840_v18  ;;  %372 = vst.msk [vmem:[#allocation2 + $0x1f0] sm:$0xff] %vm309_vm0, %v6978_v46  ;;  %373 = vst.msk [vmem:[#allocation2 + $0x1f8] sm:$0xff] %vm309_vm0, %v6978_v46  ;;  %v6893_v8 = vld [vmem:[%s7028_s22 + $0x118] sm:$0xff]   ;;  %v6895_v10 = vld [vmem:[%s7028_s22 + $0x120] sm:$0xff]  }
  0x2e   : > { %374 = vst.msk [vmem:[#allocation2 + $0x200] sm:$0xff] %vm309_vm0, %v6978_v46  ;;  %375 = vst.msk [vmem:[#allocation2 + $0x208] sm:$0xff] %vm309_vm0, %v6978_v46  ;;  %v6894_v9 = vld [vmem:[%s7028_s22 + $0x318] sm:$0xff]   ;;  %v6896_v11 = vld [vmem:[%s7028_s22 + $0x320] sm:$0xff]  }
  0x2f   : > { %376 = vst.msk [vmem:[#allocation2 + $0x210] sm:$0xff] %vm309_vm0, %v6978_v46  ;;  %377 = vst.msk [vmem:[#allocation2 + $0x218] sm:$0xff] %vm309_vm0, %v6978_v46  ;;  %v6897_v12 = vld [vmem:[%s7028_s22 + $0x128] sm:$0xff]   ;;  %v6899_v14 = vld [vmem:[%s7028_s22 + $0x130] sm:$0xff]  }
  0x30   : > { %378 = vst.msk [vmem:[#allocation2 + $0x220] sm:$0xff] %vm309_vm0, %v6978_v46  ;;  %379 = vst.msk [vmem:[#allocation2 + $0x228] sm:$0xff] %vm309_vm0, %v6978_v46  ;;  %v6898_v13 = vld [vmem:[%s7028_s22 + $0x328] sm:$0xff]   ;;  %v6900_v15 = vld [vmem:[%s7028_s22 + $0x330] sm:$0xff]  }
  0x31   : > { %380 = vst.msk [vmem:[#allocation2 + $0x230] sm:$0xff] %vm309_vm0, %v6978_v46  ;;  %381 = vst.msk [vmem:[#allocation2 + $0x238] sm:$0xff] %vm309_vm0, %v6978_v46  ;;  %v6901_v16 = vld [vmem:[%s7028_s22 + $0x138] sm:$0xff]   ;;  %v6903_v18 = vld [vmem:[%s7028_s22 + $0x140] sm:$0xff]  }
  0x32   : > { %382 = vst.msk [vmem:[#allocation2 + $0x240] sm:$0xff] %vm309_vm0, %v6978_v46  ;;  %383 = vst.msk [vmem:[#allocation2 + $0x248] sm:$0xff] %vm309_vm0, %v6978_v46  ;;  %v6902_v17 = vld [vmem:[%s7028_s22 + $0x338] sm:$0xff]  }
  0x33   : > { %6556 = vmatmul.mubr.msk.bf16.gmra.mrb[16].mxu0 %vm309_vm0, %v6841_v19  ;;  %384 = vst.msk [vmem:[#allocation2 + $0x250] sm:$0xff] %vm309_vm0, %v6978_v46  ;;  %385 = vst.msk [vmem:[#allocation2 + $0x258] sm:$0xff] %vm309_vm0, %v6978_v46  ;;  %v6904_v19 = vld [vmem:[%s7028_s22 + $0x340] sm:$0xff]  }
  0x34   : > { %6684 = vmatmul.mubr.msk.bf16.gmra.mrb[16].mxu1 %vm309_vm0, %v6842_v20  ;;  %6559 = vmatprep.mubr.msk.bf16.mxu0 %vm309_vm0, %v6843_v21  ;;  %386 = vst.msk [vmem:[#allocation2 + $0x260] sm:$0xff] %vm309_vm0, %v6978_v46  ;;  %387 = vst.msk [vmem:[#allocation2 + $0x268] sm:$0xff] %vm309_vm0, %v6978_v46  ;;  %v6905_v20 = vld [vmem:[%s7028_s22 + $0x148] sm:$0xff]  }
  0x35   : > { %6687 = vmatprep.mubr.msk.bf16.mxu1 %vm309_vm0, %v6844_v22  ;;  %388 = vst.msk [vmem:[#allocation2 + $0x270] sm:$0xff] %vm309_vm0, %v6978_v46  ;;  %389 = vst.msk [vmem:[#allocation2 + $0x278] sm:$0xff] %vm309_vm0, %v6978_v46  ;;  %v6906_v21 = vld [vmem:[%s7028_s22 + $0x348] sm:$0xff]   ;;  %v6907_v22 = vld [vmem:[%s7028_s22 + $0x150] sm:$0xff]  }
  0x36   : > { %390 = vst.msk [vmem:[#allocation2 + $0x280] sm:$0xff] %vm309_vm0, %v6978_v46  ;;  %391 = vst.msk [vmem:[#allocation2 + $0x288] sm:$0xff] %vm309_vm0, %v6978_v46 }
  0x37   : > { %392 = vst.msk [vmem:[#allocation2 + $0x290] sm:$0xff] %vm309_vm0, %v6978_v46  ;;  %393 = vst.msk [vmem:[#allocation2 + $0x298] sm:$0xff] %vm309_vm0, %v6978_v46 }
  0x38   : > { %394 = vst.msk [vmem:[#allocation2 + $0x2a0] sm:$0xff] %vm309_vm0, %v6978_v46  ;;  %395 = vst.msk [vmem:[#allocation2 + $0x2a8] sm:$0xff] %vm309_vm0, %v6978_v46 }
  0x39   : > { %396 = vst.msk [vmem:[#allocation2 + $0x2b0] sm:$0xff] %vm309_vm0, %v6978_v46  ;;  %397 = vst.msk [vmem:[#allocation2 + $0x2b8] sm:$0xff] %vm309_vm0, %v6978_v46 }
  0x3a   : > { %398 = vst.msk [vmem:[#allocation2 + $0x2c0] sm:$0xff] %vm309_vm0, %v6978_v46  ;;  %399 = vst.msk [vmem:[#allocation2 + $0x2c8] sm:$0xff] %vm309_vm0, %v6978_v46 }
  0x3b   : > { %6560 = vmatmul.mubr.msk.bf16.gmra.mrb[20].mxu0 %vm309_vm0, %v6845_v23  ;;  %400 = vst.msk [vmem:[#allocation2 + $0x2d0] sm:$0xff] %vm309_vm0, %v6978_v46  ;;  %401 = vst.msk [vmem:[#allocation2 + $0x2d8] sm:$0xff] %vm309_vm0, %v6978_v46  ;;  %v6908_v23 = vld [vmem:[%s7028_s22 + $0x350] sm:$0xff]  }
  0x3c   : > { %6688 = vmatmul.mubr.msk.bf16.gmra.mrb[20].mxu1 %vm309_vm0, %v6846_v24  ;;  %6563 = vmatprep.mubr.msk.bf16.mxu0 %vm309_vm0, %v6847_v25  ;;  %402 = vst.msk [vmem:[#allocation2 + $0x2e0] sm:$0xff] %vm309_vm0, %v6978_v46  ;;  %403 = vst.msk [vmem:[#allocation2 + $0x2e8] sm:$0xff] %vm309_vm0, %v6978_v46  ;;  %v6909_v24 = vld [vmem:[%s7028_s22 + $0x158] sm:$0xff]  }
  0x3d   : > { %6691 = vmatprep.mubr.msk.bf16.mxu1 %vm309_vm0, %v6848_v26  ;;  %404 = vst.msk [vmem:[#allocation2 + $0x2f0] sm:$0xff] %vm309_vm0, %v6978_v46  ;;  %405 = vst.msk [vmem:[#allocation2 + $0x2f8] sm:$0xff] %vm309_vm0, %v6978_v46  ;;  %v6910_v25 = vld [vmem:[%s7028_s22 + $0x358] sm:$0xff]   ;;  %v6911_v26 = vld [vmem:[%s7028_s22 + $0x160] sm:$0xff]  }
  0x3e   : > { %406 = vst.msk [vmem:[#allocation2 + $0x300] sm:$0xff] %vm309_vm0, %v6978_v46  ;;  %407 = vst.msk [vmem:[#allocation2 + $0x308] sm:$0xff] %vm309_vm0, %v6978_v46 }
  0x3f   : > { %408 = vst.msk [vmem:[#allocation2 + $0x310] sm:$0xff] %vm309_vm0, %v6978_v46  ;;  %409 = vst.msk [vmem:[#allocation2 + $0x318] sm:$0xff] %vm309_vm0, %v6978_v46 }
  0x40   : > { %410 = vst.msk [vmem:[#allocation2 + $0x320] sm:$0xff] %vm309_vm0, %v6978_v46  ;;  %411 = vst.msk [vmem:[#allocation2 + $0x328] sm:$0xff] %vm309_vm0, %v6978_v46 }
  0x41   : > { %412 = vst.msk [vmem:[#allocation2 + $0x330] sm:$0xff] %vm309_vm0, %v6978_v46  ;;  %413 = vst.msk [vmem:[#allocation2 + $0x338] sm:$0xff] %vm309_vm0, %v6978_v46 }
  0x42   : > { %414 = vst.msk [vmem:[#allocation2 + $0x340] sm:$0xff] %vm309_vm0, %v6978_v46  ;;  %415 = vst.msk [vmem:[#allocation2 + $0x348] sm:$0xff] %vm309_vm0, %v6978_v46 }
  0x43   : > { %6564 = vmatmul.mubr.msk.bf16.gmra.mrb[24].mxu0 %vm309_vm0, %v6849_v27  ;;  %416 = vst.msk [vmem:[#allocation2 + $0x350] sm:$0xff] %vm309_vm0, %v6978_v46  ;;  %417 = vst.msk [vmem:[#allocation2 + $0x358] sm:$0xff] %vm309_vm0, %v6978_v46  ;;  %v6912_v27 = vld [vmem:[%s7028_s22 + $0x360] sm:$0xff]  }
  0x44   : > { %6692 = vmatmul.mubr.msk.bf16.gmra.mrb[24].mxu1 %vm309_vm0, %v6850_v28  ;;  %6567 = vmatprep.mubr.msk.bf16.mxu0 %vm309_vm0, %v6851_v29  ;;  %418 = vst.msk [vmem:[#allocation2 + $0x360] sm:$0xff] %vm309_vm0, %v6978_v46  ;;  %419 = vst.msk [vmem:[#allocation2 + $0x368] sm:$0xff] %vm309_vm0, %v6978_v46  ;;  %v6913_v28 = vld [vmem:[%s7028_s22 + $0x168] sm:$0xff]  }
  0x45   : > { %6695 = vmatprep.mubr.msk.bf16.mxu1 %vm309_vm0, %v6852_v30  ;;  %420 = vst.msk [vmem:[#allocation2 + $0x370] sm:$0xff] %vm309_vm0, %v6978_v46  ;;  %421 = vst.msk [vmem:[#allocation2 + $0x378] sm:$0xff] %vm309_vm0, %v6978_v46  ;;  %v6914_v29 = vld [vmem:[%s7028_s22 + $0x368] sm:$0xff]   ;;  %v6915_v30 = vld [vmem:[%s7028_s22 + $0x170] sm:$0xff]  }
  0x46   : > { %422 = vst.msk [vmem:[#allocation2 + $0x380] sm:$0xff] %vm309_vm0, %v6978_v46  ;;  %423 = vst.msk [vmem:[#allocation2 + $0x388] sm:$0xff] %vm309_vm0, %v6978_v46 }
  0x47   : > { %424 = vst.msk [vmem:[#allocation2 + $0x390] sm:$0xff] %vm309_vm0, %v6978_v46  ;;  %425 = vst.msk [vmem:[#allocation2 + $0x398] sm:$0xff] %vm309_vm0, %v6978_v46 }
  0x48   : > { %426 = vst.msk [vmem:[#allocation2 + $0x3a0] sm:$0xff] %vm309_vm0, %v6978_v46  ;;  %427 = vst.msk [vmem:[#allocation2 + $0x3a8] sm:$0xff] %vm309_vm0, %v6978_v46 }
  0x49   : > { %428 = vst.msk [vmem:[#allocation2 + $0x3b0] sm:$0xff] %vm309_vm0, %v6978_v46  ;;  %429 = vst.msk [vmem:[#allocation2 + $0x3b8] sm:$0xff] %vm309_vm0, %v6978_v46 }
  0x4a   : > { %430 = vst.msk [vmem:[#allocation2 + $0x3c0] sm:$0xff] %vm309_vm0, %v6978_v46  ;;  %431 = vst.msk [vmem:[#allocation2 + $0x3c8] sm:$0xff] %vm309_vm0, %v6978_v46 }
  0x4b   : > { %6568 = vmatmul.mubr.msk.bf16.gmra.mrb[28].mxu0 %vm309_vm0, %v6853_v31  ;;  %432 = vst.msk [vmem:[#allocation2 + $0x3d0] sm:$0xff] %vm309_vm0, %v6978_v46  ;;  %433 = vst.msk [vmem:[#allocation2 + $0x3d8] sm:$0xff] %vm309_vm0, %v6978_v46  ;;  %v6916_v31 = vld [vmem:[%s7028_s22 + $0x370] sm:$0xff]  }
  0x4c   : > { %6696 = vmatmul.mubr.msk.bf16.gmra.mrb[28].mxu1 %vm309_vm0, %v6854_v32  ;;  %6571 = vmatprep.mubr.msk.bf16.mxu0 %vm309_vm0, %v6855_v33  ;;  %434 = vst.msk [vmem:[#allocation2 + $0x3e0] sm:$0xff] %vm309_vm0, %v6978_v46  ;;  %435 = vst.msk [vmem:[#allocation2 + $0x3e8] sm:$0xff] %vm309_vm0, %v6978_v46  ;;  %v6917_v32 = vld [vmem:[%s7028_s22 + $0x178] sm:$0xff]  }
  0x4d   : > { %6699 = vmatprep.mubr.msk.bf16.mxu1 %vm309_vm0, %v6856_v34  ;;  %436 = vst.msk [vmem:[#allocation2 + $0x3f0] sm:$0xff] %vm309_vm0, %v6978_v46  ;;  %437 = vst.msk [vmem:[#allocation2 + $0x3f8] sm:$0xff] %vm309_vm0, %v6978_v46  ;;  %v6918_v33 = vld [vmem:[%s7028_s22 + $0x378] sm:$0xff]   ;;  %v6919_v34 = vld [vmem:[%s7028_s22 + $0x180] sm:$0xff]  }
  0x4e   : > { %438 = vst.msk [vmem:[#allocation2 + $0x400] sm:$0xff] %vm309_vm0, %v6978_v46  ;;  %439 = vst.msk [vmem:[#allocation2 + $0x408] sm:$0xff] %vm309_vm0, %v6978_v46 }
  0x4f   : > { %440 = vst.msk [vmem:[#allocation2 + $0x410] sm:$0xff] %vm309_vm0, %v6978_v46  ;;  %441 = vst.msk [vmem:[#allocation2 + $0x418] sm:$0xff] %vm309_vm0, %v6978_v46 }
  0x50   : > { %442 = vst.msk [vmem:[#allocation2 + $0x420] sm:$0xff] %vm309_vm0, %v6978_v46  ;;  %443 = vst.msk [vmem:[#allocation2 + $0x428] sm:$0xff] %vm309_vm0, %v6978_v46 }
  0x51   : > { %444 = vst.msk [vmem:[#allocation2 + $0x430] sm:$0xff] %vm309_vm0, %v6978_v46  ;;  %445 = vst.msk [vmem:[#allocation2 + $0x438] sm:$0xff] %vm309_vm0, %v6978_v46 }
  0x52   : > { %446 = vst.msk [vmem:[#allocation2 + $0x440] sm:$0xff] %vm309_vm0, %v6978_v46  ;;  %447 = vst.msk [vmem:[#allocation2 + $0x448] sm:$0xff] %vm309_vm0, %v6978_v46 }
  0x53   : > { %6572 = vmatmul.mubr.msk.bf16.gmra.mrb[32].mxu0 %vm309_vm0, %v6857_v35  ;;  %448 = vst.msk [vmem:[#allocation2 + $0x450] sm:$0xff] %vm309_vm0, %v6978_v46  ;;  %449 = vst.msk [vmem:[#allocation2 + $0x458] sm:$0xff] %vm309_vm0, %v6978_v46  ;;  %v6920_v35 = vld [vmem:[%s7028_s22 + $0x380] sm:$0xff]  }
  0x54   : > { %6700 = vmatmul.mubr.msk.bf16.gmra.mrb[32].mxu1 %vm309_vm0, %v6858_v36  ;;  %6575 = vmatprep.mubr.msk.bf16.mxu0 %vm309_vm0, %v6859_v37  ;;  %450 = vst.msk [vmem:[#allocation2 + $0x460] sm:$0xff] %vm309_vm0, %v6978_v46  ;;  %451 = vst.msk [vmem:[#allocation2 + $0x468] sm:$0xff] %vm309_vm0, %v6978_v46  ;;  %v6921_v36 = vld [vmem:[%s7028_s22 + $0x188] sm:$0xff]  }
  0x55   : > { %6703 = vmatprep.mubr.msk.bf16.mxu1 %vm309_vm0, %v6860_v38  ;;  %452 = vst.msk [vmem:[#allocation2 + $0x470] sm:$0xff] %vm309_vm0, %v6978_v46  ;;  %453 = vst.msk [vmem:[#allocation2 + $0x478] sm:$0xff] %vm309_vm0, %v6978_v46  ;;  %v6922_v37 = vld [vmem:[%s7028_s22 + $0x388] sm:$0xff]   ;;  %v6923_v38 = vld [vmem:[%s7028_s22 + $0x190] sm:$0xff]  }
  0x56   : > { %454 = vst.msk [vmem:[#allocation2 + $0x480] sm:$0xff] %vm309_vm0, %v6978_v46  ;;  %455 = vst.msk [vmem:[#allocation2 + $0x488] sm:$0xff] %vm309_vm0, %v6978_v46 }
  0x57   : > { %456 = vst.msk [vmem:[#allocation2 + $0x490] sm:$0xff] %vm309_vm0, %v6978_v46  ;;  %457 = vst.msk [vmem:[#allocation2 + $0x498] sm:$0xff] %vm309_vm0, %v6978_v46 }
  0x58   : > { %458 = vst.msk [vmem:[#allocation2 + $0x4a0] sm:$0xff] %vm309_vm0, %v6978_v46  ;;  %459 = vst.msk [vmem:[#allocation2 + $0x4a8] sm:$0xff] %vm309_vm0, %v6978_v46 }
  0x59   : > { %460 = vst.msk [vmem:[#allocation2 + $0x4b0] sm:$0xff] %vm309_vm0, %v6978_v46  ;;  %461 = vst.msk [vmem:[#allocation2 + $0x4b8] sm:$0xff] %vm309_vm0, %v6978_v46 }
  0x5a   : > { %462 = vst.msk [vmem:[#allocation2 + $0x4c0] sm:$0xff] %vm309_vm0, %v6978_v46  ;;  %463 = vst.msk [vmem:[#allocation2 + $0x4c8] sm:$0xff] %vm309_vm0, %v6978_v46 }
  0x5b   : > { %6576 = vmatmul.mubr.msk.bf16.gmra.mrb[36].mxu0 %vm309_vm0, %v6861_v39  ;;  %464 = vst.msk [vmem:[#allocation2 + $0x4d0] sm:$0xff] %vm309_vm0, %v6978_v46  ;;  %465 = vst.msk [vmem:[#allocation2 + $0x4d8] sm:$0xff] %vm309_vm0, %v6978_v46  ;;  %v6924_v39 = vld [vmem:[%s7028_s22 + $0x390] sm:$0xff]  }
  0x5c   : > { %6704 = vmatmul.mubr.msk.bf16.gmra.mrb[36].mxu1 %vm309_vm0, %v6862_v40  ;;  %6579 = vmatprep.mubr.msk.bf16.mxu0 %vm309_vm0, %v6863_v41  ;;  %466 = vst.msk [vmem:[#allocation2 + $0x4e0] sm:$0xff] %vm309_vm0, %v6978_v46  ;;  %467 = vst.msk [vmem:[#allocation2 + $0x4e8] sm:$0xff] %vm309_vm0, %v6978_v46  ;;  %v6925_v40 = vld [vmem:[%s7028_s22 + $0x198] sm:$0xff]  }
  0x5d   : > { %6707 = vmatprep.mubr.msk.bf16.mxu1 %vm309_vm0, %v6864_v42  ;;  %468 = vst.msk [vmem:[#allocation2 + $0x4f0] sm:$0xff] %vm309_vm0, %v6978_v46  ;;  %469 = vst.msk [vmem:[#allocation2 + $0x4f8] sm:$0xff] %vm309_vm0, %v6978_v46  ;;  %v6926_v41 = vld [vmem:[%s7028_s22 + $0x398] sm:$0xff]   ;;  %v6927_v42 = vld [vmem:[%s7028_s22 + $0x1a0] sm:$0xff]  }
  0x5e   : > { %470 = vst.msk [vmem:[#allocation2 + $0x500] sm:$0xff] %vm309_vm0, %v6978_v46  ;;  %471 = vst.msk [vmem:[#allocation2 + $0x508] sm:$0xff] %vm309_vm0, %v6978_v46 }
  0x5f   : > { %472 = vst.msk [vmem:[#allocation2 + $0x510] sm:$0xff] %vm309_vm0, %v6978_v46  ;;  %473 = vst.msk [vmem:[#allocation2 + $0x518] sm:$0xff] %vm309_vm0, %v6978_v46 }
  0x60   : > { %474 = vst.msk [vmem:[#allocation2 + $0x520] sm:$0xff] %vm309_vm0, %v6978_v46  ;;  %475 = vst.msk [vmem:[#allocation2 + $0x528] sm:$0xff] %vm309_vm0, %v6978_v46 }
  0x61   : > { %476 = vst.msk [vmem:[#allocation2 + $0x530] sm:$0xff] %vm309_vm0, %v6978_v46  ;;  %477 = vst.msk [vmem:[#allocation2 + $0x538] sm:$0xff] %vm309_vm0, %v6978_v46 }
  0x62   : > { %478 = vst.msk [vmem:[#allocation2 + $0x540] sm:$0xff] %vm309_vm0, %v6978_v46  ;;  %479 = vst.msk [vmem:[#allocation2 + $0x548] sm:$0xff] %vm309_vm0, %v6978_v46 }
  0x63   : > { %480 = vst.msk [vmem:[#allocation2 + $0x550] sm:$0xff] %vm309_vm0, %v6978_v46  ;;  %481 = vst.msk [vmem:[#allocation2 + $0x558] sm:$0xff] %vm309_vm0, %v6978_v46  ;;  %6580 = vmatmul.mubr.msk.bf16.gmra.mrb[40].mxu0 %vm309_vm0, %v7115_v43  ;;  %v6928_v43 = vld [vmem:[%s7028_s22 + $0x3a0] sm:$0xff]  }
  0x64   : > { %482 = vst.msk [vmem:[#allocation2 + $0x560] sm:$0xff] %vm309_vm0, %v6978_v46  ;;  %483 = vst.msk [vmem:[#allocation2 + $0x568] sm:$0xff] %vm309_vm0, %v6978_v46  ;;  %6708 = vmatmul.mubr.msk.bf16.gmra.mrb[40].mxu1 %vm309_vm0, %v7118_v44  ;;  %6583 = vmatprep.mubr.msk.bf16.mxu0 %vm309_vm0, %v7121_v45  ;;  %v6929_v44 = vld [vmem:[%s7028_s22 + $0x1a8] sm:$0xff]  }
  0x65   : > { %484 = vst.msk [vmem:[#allocation2 + $0x570] sm:$0xff] %vm309_vm0, %v6978_v46  ;;  %485 = vst.msk [vmem:[#allocation2 + $0x578] sm:$0xff] %vm309_vm0, %v6978_v46  ;;  %6711 = vmatprep.mubr.msk.bf16.mxu1 %vm309_vm0, %v6868_v47  ;;  %v6930_v45 = vld [vmem:[%s7028_s22 + $0x3a8] sm:$0xff]   ;;  %v6932_v47 = vld [vmem:[%s7028_s22 + $0x3b0] sm:$0xff]  }
  0x66   : > { %486 = vst.msk [vmem:[#allocation2 + $0x580] sm:$0xff] %vm309_vm0, %v6978_v46  ;;  %487 = vst.msk [vmem:[#allocation2 + $0x588] sm:$0xff] %vm309_vm0, %v6978_v46 }
  0x67   : > { %488 = vst.msk [vmem:[#allocation2 + $0x590] sm:$0xff] %vm309_vm0, %v6978_v46  ;;  %489 = vst.msk [vmem:[#allocation2 + $0x598] sm:$0xff] %vm309_vm0, %v6978_v46 }
  0x68   : > { %490 = vst.msk [vmem:[#allocation2 + $0x5a0] sm:$0xff] %vm309_vm0, %v6978_v46  ;;  %491 = vst.msk [vmem:[#allocation2 + $0x5a8] sm:$0xff] %vm309_vm0, %v6978_v46 }
  0x69   : > { %492 = vst.msk [vmem:[#allocation2 + $0x5b0] sm:$0xff] %vm309_vm0, %v6978_v46  ;;  %493 = vst.msk [vmem:[#allocation2 + $0x5b8] sm:$0xff] %vm309_vm0, %v6978_v46 }
  0x6a   : > { %494 = vst.msk [vmem:[#allocation2 + $0x5c0] sm:$0xff] %vm309_vm0, %v6978_v46  ;;  %495 = vst.msk [vmem:[#allocation2 + $0x5c8] sm:$0xff] %vm309_vm0, %v6978_v46 }
  0x6b   : > { %496 = vst.msk [vmem:[#allocation2 + $0x5d0] sm:$0xff] %vm309_vm0, %v6978_v46  ;;  %497 = vst.msk [vmem:[#allocation2 + $0x5d8] sm:$0xff] %vm309_vm0, %v6978_v46  ;;  %6584 = vmatmul.mubr.msk.bf16.gmra.mrb[44].mxu0 %vm309_vm0, %v6869_v48  ;;  %v568_v48 = vld [vmem:[#allocation2 + $0x10] sm:$0xff] }
  0x6c   : > { %498 = vst.msk [vmem:[#allocation2 + $0x5e0] sm:$0xff] %vm309_vm0, %v6978_v46  ;;  %499 = vst.msk [vmem:[#allocation2 + $0x5e8] sm:$0xff] %vm309_vm0, %v6978_v46  ;;  %6712 = vmatmul.mubr.msk.bf16.gmra.mrb[44].mxu1 %vm309_vm0, %v6870_v49  ;;  %6587 = vmatprep.mubr.msk.bf16.mxu0 %vm309_vm0, %v6871_v50  ;;  %v696_v49 = vld [vmem:[#allocation2 + $0x410] sm:$0xff]  ;;  %v566_v50 = vld [vmem:[#allocation2] sm:$0xff] }
  0x6d   : > { %500 = vst.msk [vmem:[#allocation2 + $0x5f0] sm:$0xff] %vm309_vm0, %v6978_v46  ;;  %501 = vst.msk [vmem:[#allocation2 + $0x5f8] sm:$0xff] %vm309_vm0, %v6978_v46  ;;  %6715 = vmatprep.mubr.msk.bf16.mxu1 %vm309_vm0, %v6872_v51 }
  0x6e   : > { %502 = vst.msk [vmem:[#allocation2 + $0x600] sm:$0xff] %vm309_vm0, %v6978_v46  ;;  %503 = vst.msk [vmem:[#allocation2 + $0x608] sm:$0xff] %vm309_vm0, %v6978_v46 }
  0x6f   : > { %504 = vst.msk [vmem:[#allocation2 + $0x610] sm:$0xff] %vm309_vm0, %v6978_v46  ;;  %505 = vst.msk [vmem:[#allocation2 + $0x618] sm:$0xff] %vm309_vm0, %v6978_v46 }
  0x70   : > { %506 = vst.msk [vmem:[#allocation2 + $0x620] sm:$0xff] %vm309_vm0, %v6978_v46  ;;  %507 = vst.msk [vmem:[#allocation2 + $0x628] sm:$0xff] %vm309_vm0, %v6978_v46 }
  0x71   : > { %508 = vst.msk [vmem:[#allocation2 + $0x630] sm:$0xff] %vm309_vm0, %v6978_v46  ;;  %509 = vst.msk [vmem:[#allocation2 + $0x638] sm:$0xff] %vm309_vm0, %v6978_v46 }
  0x72   : > { %510 = vst.msk [vmem:[#allocation2 + $0x640] sm:$0xff] %vm309_vm0, %v6978_v46  ;;  %511 = vst.msk [vmem:[#allocation2 + $0x648] sm:$0xff] %vm309_vm0, %v6978_v46 }
  0x73   : > { %512 = vst.msk [vmem:[#allocation2 + $0x650] sm:$0xff] %vm309_vm0, %v6978_v46  ;;  %513 = vst.msk [vmem:[#allocation2 + $0x658] sm:$0xff] %vm309_vm0, %v6978_v46  ;;  %6588 = vmatmul.mubr.msk.bf16.gmra.mrb[48].mxu0 %vm309_vm0, %v6873_v52  ;;  %v694_v52 = vld [vmem:[#allocation2 + $0x400] sm:$0xff] }
  0x74   : > { %514 = vst.msk [vmem:[#allocation2 + $0x660] sm:$0xff] %vm309_vm0, %v6978_v46  ;;  %515 = vst.msk [vmem:[#allocation2 + $0x668] sm:$0xff] %vm309_vm0, %v6978_v46  ;;  %6716 = vmatmul.mubr.msk.bf16.gmra.mrb[48].mxu1 %vm309_vm0, %v6874_v53  ;;  %6591 = vmatprep.mubr.msk.bf16.mxu0 %vm309_vm0, %v6875_v54  ;;  %v569_v53 = vld [vmem:[#allocation2 + $0x18] sm:$0xff] }
  0x75   : > { %516 = vst.msk [vmem:[#allocation2 + $0x670] sm:$0xff] %vm309_vm0, %v6978_v46  ;;  %517 = vst.msk [vmem:[#allocation2 + $0x678] sm:$0xff] %vm309_vm0, %v6978_v46  ;;  %6719 = vmatprep.mubr.msk.bf16.mxu1 %vm309_vm0, %v6876_v55 }
  0x76   : > { %518 = vst.msk [vmem:[#allocation2 + $0x680] sm:$0xff] %vm309_vm0, %v6978_v46  ;;  %519 = vst.msk [vmem:[#allocation2 + $0x688] sm:$0xff] %vm309_vm0, %v6978_v46 }
  0x77   : > { %520 = vst.msk [vmem:[#allocation2 + $0x690] sm:$0xff] %vm309_vm0, %v6978_v46  ;;  %521 = vst.msk [vmem:[#allocation2 + $0x698] sm:$0xff] %vm309_vm0, %v6978_v46 }
  0x78   : > { %522 = vst.msk [vmem:[#allocation2 + $0x6a0] sm:$0xff] %vm309_vm0, %v6978_v46  ;;  %523 = vst.msk [vmem:[#allocation2 + $0x6a8] sm:$0xff] %vm309_vm0, %v6978_v46 }
  0x79   : > { %524 = vst.msk [vmem:[#allocation2 + $0x6b0] sm:$0xff] %vm309_vm0, %v6978_v46  ;;  %525 = vst.msk [vmem:[#allocation2 + $0x6b8] sm:$0xff] %vm309_vm0, %v6978_v46 }
  0x7a   : > { %526 = vst.msk [vmem:[#allocation2 + $0x6c0] sm:$0xff] %vm309_vm0, %v6978_v46  ;;  %527 = vst.msk [vmem:[#allocation2 + $0x6c8] sm:$0xff] %vm309_vm0, %v6978_v46 }
  0x7b   : > { %528 = vst.msk [vmem:[#allocation2 + $0x6d0] sm:$0xff] %vm309_vm0, %v6978_v46  ;;  %529 = vst.msk [vmem:[#allocation2 + $0x6d8] sm:$0xff] %vm309_vm0, %v6978_v46  ;;  %6592 = vmatmul.mubr.msk.bf16.gmra.mrb[52].mxu0 %vm309_vm0, %v6877_v56 }
  0x7c   : > { %530 = vst.msk [vmem:[#allocation2 + $0x6e0] sm:$0xff] %vm309_vm0, %v6978_v46  ;;  %531 = vst.msk [vmem:[#allocation2 + $0x6e8] sm:$0xff] %vm309_vm0, %v6978_v46  ;;  %6720 = vmatmul.mubr.msk.bf16.gmra.mrb[52].mxu1 %vm309_vm0, %v6878_v57  ;;  %6595 = vmatprep.mubr.msk.bf16.mxu0 %vm309_vm0, %v6879_v58  ;;  %v697_v57 = vld [vmem:[#allocation2 + $0x418] sm:$0xff]  ;;  %v567_v58 = vld [vmem:[#allocation2 + $0x8] sm:$0xff] }
  0x7d   : > { %532 = vst.msk [vmem:[#allocation2 + $0x6f0] sm:$0xff] %vm309_vm0, %v6978_v46  ;;  %533 = vst.msk [vmem:[#allocation2 + $0x6f8] sm:$0xff] %vm309_vm0, %v6978_v46  ;;  %6723 = vmatprep.mubr.msk.bf16.mxu1 %vm309_vm0, %v6880_v59  ;;  %v6933_v59 = vld [vmem:[%s7028_s22 + $0x1b8] sm:$0xff]  }
  0x7e   : > { %534 = vst.msk [vmem:[#allocation2 + $0x700] sm:$0xff] %vm309_vm0, %v6978_v46  ;;  %535 = vst.msk [vmem:[#allocation2 + $0x708] sm:$0xff] %vm309_vm0, %v6978_v46 }
  0x7f   : > { %536 = vst.msk [vmem:[#allocation2 + $0x710] sm:$0xff] %vm309_vm0, %v6978_v46  ;;  %537 = vst.msk [vmem:[#allocation2 + $0x718] sm:$0xff] %vm309_vm0, %v6978_v46 }
  0x80   : > { %538 = vst.msk [vmem:[#allocation2 + $0x720] sm:$0xff] %vm309_vm0, %v6978_v46  ;;  %539 = vst.msk [vmem:[#allocation2 + $0x728] sm:$0xff] %vm309_vm0, %v6978_v46 }
  0x81   : > { %540 = vst.msk [vmem:[#allocation2 + $0x730] sm:$0xff] %vm309_vm0, %v6978_v46  ;;  %541 = vst.msk [vmem:[#allocation2 + $0x738] sm:$0xff] %vm309_vm0, %v6978_v46 }
  0x82   : > { %542 = vst.msk [vmem:[#allocation2 + $0x740] sm:$0xff] %vm309_vm0, %v6978_v46  ;;  %543 = vst.msk [vmem:[#allocation2 + $0x748] sm:$0xff] %vm309_vm0, %v6978_v46 }
  0x83   : > { %544 = vst.msk [vmem:[#allocation2 + $0x750] sm:$0xff] %vm309_vm0, %v6978_v46  ;;  %545 = vst.msk [vmem:[#allocation2 + $0x758] sm:$0xff] %vm309_vm0, %v6978_v46  ;;  %6596 = vmatmul.mubr.msk.bf16.gmra.mrb[56].mxu0 %vm309_vm0, %v6881_v60 }
  0x84   : > { %546 = vst.msk [vmem:[#allocation2 + $0x760] sm:$0xff] %vm309_vm0, %v6978_v46  ;;  %547 = vst.msk [vmem:[#allocation2 + $0x768] sm:$0xff] %vm309_vm0, %v6978_v46  ;;  %6724 = vmatmul.mubr.msk.bf16.gmra.mrb[56].mxu1 %vm309_vm0, %v6882_v61  ;;  %6599 = vmatprep.mubr.msk.bf16.mxu0 %vm309_vm0, %v6883_v62 }
  0x85   : > { %548 = vst.msk [vmem:[#allocation2 + $0x770] sm:$0xff] %vm309_vm0, %v6978_v46  ;;  %549 = vst.msk [vmem:[#allocation2 + $0x778] sm:$0xff] %vm309_vm0, %v6978_v46  ;;  %6727 = vmatprep.mubr.msk.bf16.mxu1 %vm309_vm0, %v6884_v63 }
  0x86   : > { %550 = vst.msk [vmem:[#allocation2 + $0x780] sm:$0xff] %vm309_vm0, %v6978_v46  ;;  %551 = vst.msk [vmem:[#allocation2 + $0x788] sm:$0xff] %vm309_vm0, %v6978_v46 }
  0x87   : > { %552 = vst.msk [vmem:[#allocation2 + $0x790] sm:$0xff] %vm309_vm0, %v6978_v46  ;;  %553 = vst.msk [vmem:[#allocation2 + $0x798] sm:$0xff] %vm309_vm0, %v6978_v46 }
  0x88   : > { %554 = vst.msk [vmem:[#allocation2 + $0x7a0] sm:$0xff] %vm309_vm0, %v6978_v46  ;;  %555 = vst.msk [vmem:[#allocation2 + $0x7a8] sm:$0xff] %vm309_vm0, %v6978_v46 }
  0x89   : > { %556 = vst.msk [vmem:[#allocation2 + $0x7b0] sm:$0xff] %vm309_vm0, %v6978_v46  ;;  %557 = vst.msk [vmem:[#allocation2 + $0x7b8] sm:$0xff] %vm309_vm0, %v6978_v46 }
  0x8a   : > { %558 = vst.msk [vmem:[#allocation2 + $0x7c0] sm:$0xff] %vm309_vm0, %v6978_v46  ;;  %559 = vst.msk [vmem:[#allocation2 + $0x7c8] sm:$0xff] %vm309_vm0, %v6978_v46 }
  0x8b   : > { %560 = vst.msk [vmem:[#allocation2 + $0x7d0] sm:$0xff] %vm309_vm0, %v6978_v46  ;;  %561 = vst.msk [vmem:[#allocation2 + $0x7d8] sm:$0xff] %vm309_vm0, %v6978_v46  ;;  %6600 = vmatmul.mubr.msk.bf16.gmra.mrb[60].mxu0 %vm309_vm0, %v6885_v0  ;;  %v695_v0 = vld [vmem:[#allocation2 + $0x408] sm:$0xff] }
  0x8c   : > { %562 = vst.msk [vmem:[#allocation2 + $0x7e0] sm:$0xff] %vm309_vm0, %v6978_v46  ;;  %563 = vst.msk [vmem:[#allocation2 + $0x7e8] sm:$0xff] %vm309_vm0, %v6978_v46  ;;  %6728 = vmatmul.mubr.msk.bf16.gmra.mrb[60].mxu1 %vm309_vm0, %v6886_v1  ;;  %6603 = vmatprep.mubr.msk.bf16.mxu0 %vm309_vm0, %v6887_v2  ;;  %v6934_v1 = vld [vmem:[%s7028_s22 + $0x3b8] sm:$0xff]   ;;  %v6935_v2 = vld [vmem:[%s7028_s22 + $0x1c0] sm:$0xff]  }
  0x8d   : > { %564 = vst.msk [vmem:[#allocation2 + $0x7f0] sm:$0xff] %vm309_vm0, %v6978_v46  ;;  %565 = vst.msk [vmem:[#allocation2 + $0x7f8] sm:$0xff] %vm309_vm0, %v6978_v46  ;;  %6731 = vmatprep.mubr.msk.bf16.mxu1 %vm309_vm0, %v6888_v3  ;;  %v6931_v46 = vld [vmem:[%s7028_s22 + $0x1b0] sm:$0xff]  }
  0x93   : > { %6604 = vmatmul.mubr.msk.bf16.gmra.mrb[64].mxu0 %vm309_vm0, %v6889_v4 }
  0x94   : > { %6732 = vmatmul.mubr.msk.bf16.gmra.mrb[64].mxu1 %vm309_vm0, %v6890_v5  ;;  %6607 = vmatprep.mubr.msk.bf16.mxu0 %vm309_vm0, %v6891_v6 }
  0x95   : > { %6735 = vmatprep.mubr.msk.bf16.mxu1 %vm309_vm0, %v6892_v7  ;;  %v6936_v7 = vld [vmem:[%s7028_s22 + $0x3c0] sm:$0xff]  }
  0x9b   : > { %6608 = vmatmul.mubr.msk.bf16.gmra.mrb[68].mxu0 %vm309_vm0, %v6893_v8 }
  0x9c   : > { %6736 = vmatmul.mubr.msk.bf16.gmra.mrb[68].mxu1 %vm309_vm0, %v6894_v9  ;;  %6611 = vmatprep.mubr.msk.bf16.mxu0 %vm309_vm0, %v6895_v10 }
  0x9d   : > { %6739 = vmatprep.mubr.msk.bf16.mxu1 %vm309_vm0, %v6896_v11 }
  0xa3   : > { %6612 = vmatmul.mubr.msk.bf16.gmra.mrb[72].mxu0 %vm309_vm0, %v6897_v12  ;;  %v572_v12 = vld [vmem:[#allocation2 + $0x30] sm:$0xff] }
  0xa4   : > { %6740 = vmatmul.mubr.msk.bf16.gmra.mrb[72].mxu1 %vm309_vm0, %v6898_v13  ;;  %6615 = vmatprep.mubr.msk.bf16.mxu0 %vm309_vm0, %v6899_v14  ;;  %v7788_v13 = vld [vmem:[%s8869_s2] ss:$0 sm:$0xff]  ;;  %v700_v14 = vld [vmem:[#allocation2 + $0x430] sm:$0xff] }
  0xa5   : > { %6743 = vmatprep.mubr.msk.bf16.mxu1 %vm309_vm0, %v6900_v15  ;;  %v570_v15 = vld [vmem:[#allocation2 + $0x20] sm:$0xff] }
  0xab   : > { %6616 = vmatmul.mubr.msk.bf16.gmra.mrb[76].mxu0 %vm309_vm0, %v6901_v16 }
  0xac   : > { %6744 = vmatmul.mubr.msk.bf16.gmra.mrb[76].mxu1 %vm309_vm0, %v6902_v17  ;;  %6619 = vmatprep.mubr.msk.bf16.mxu0 %vm309_vm0, %v6903_v18  ;;  %v698_v17 = vld [vmem:[#allocation2 + $0x420] sm:$0xff]  ;;  %v573_v18 = vld [vmem:[#allocation2 + $0x38] sm:$0xff] }
  0xad   : > { %6747 = vmatprep.mubr.msk.bf16.mxu1 %vm309_vm0, %v6904_v19  ;;  %v701_v19 = vld [vmem:[#allocation2 + $0x438] sm:$0xff] }
  0xb3   : > { %6620 = vmatmul.mubr.msk.bf16.gmra.mrb[80].mxu0 %vm309_vm0, %v6905_v20 }
  0xb4   : > { %6748 = vmatmul.mubr.msk.bf16.gmra.mrb[80].mxu1 %vm309_vm0, %v6906_v21  ;;  %6623 = vmatprep.mubr.msk.bf16.mxu0 %vm309_vm0, %v6907_v22 }
  0xb5   : > { %6751 = vmatprep.mubr.msk.bf16.mxu1 %vm309_vm0, %v6908_v23  ;;  %v571_v23 = vld [vmem:[#allocation2 + $0x28] sm:$0xff] }
  0xbb   : > { %6624 = vmatmul.mubr.msk.bf16.gmra.mrb[84].mxu0 %vm309_vm0, %v6909_v24  ;;  %v699_v24 = vld [vmem:[#allocation2 + $0x428] sm:$0xff] }
  0xbc   : > { %6752 = vmatmul.mubr.msk.bf16.gmra.mrb[84].mxu1 %vm309_vm0, %v6910_v25  ;;  %6627 = vmatprep.mubr.msk.bf16.mxu0 %vm309_vm0, %v6911_v26  ;;  %v6937_v25 = vld [vmem:[%s7028_s22 + $0x1c8] sm:$0xff]  }
  0xbd   : > { %6755 = vmatprep.mubr.msk.bf16.mxu1 %vm309_vm0, %v6912_v27 }
  0xc3   : > { %6628 = vmatmul.mubr.msk.bf16.gmra.mrb[88].mxu0 %vm309_vm0, %v6913_v28 }
  0xc4   : > { %6756 = vmatmul.mubr.msk.bf16.gmra.mrb[88].mxu1 %vm309_vm0, %v6914_v29  ;;  %6631 = vmatprep.mubr.msk.bf16.mxu0 %vm309_vm0, %v6915_v30 }
  0xc5   : > { %6759 = vmatprep.mubr.msk.bf16.mxu1 %vm309_vm0, %v6916_v31  ;;  %v6938_v31 = vld [vmem:[%s7028_s22 + $0x3c8] sm:$0xff]  }
  0xcb   : > { %6632 = vmatmul.mubr.msk.bf16.gmra.mrb[92].mxu0 %vm309_vm0, %v6917_v32  ;;  %v6939_v32 = vld [vmem:[%s7028_s22 + $0x1d0] sm:$0xff]  }
  0xcc   : > { %6760 = vmatmul.mubr.msk.bf16.gmra.mrb[92].mxu1 %vm309_vm0, %v6918_v33  ;;  %6635 = vmatprep.mubr.msk.bf16.mxu0 %vm309_vm0, %v6919_v34 }
  0xcd   : > { %6763 = vmatprep.mubr.msk.bf16.mxu1 %vm309_vm0, %v6920_v35 }
  0xd3   : > { %6636 = vmatmul.mubr.msk.bf16.gmra.mrb[96].mxu0 %vm309_vm0, %v6921_v36 }
  0xd4   : > { %6764 = vmatmul.mubr.msk.bf16.gmra.mrb[96].mxu1 %vm309_vm0, %v6922_v37  ;;  %6639 = vmatprep.mubr.msk.bf16.mxu0 %vm309_vm0, %v6923_v38 }
  0xd5   : > { %6767 = vmatprep.mubr.msk.bf16.mxu1 %vm309_vm0, %v6924_v39 }
  0xdb   : > { %6640 = vmatmul.mubr.msk.bf16.gmra.mrb[100].mxu0 %vm309_vm0, %v6925_v40  ;;  %v6940_v40 = vld [vmem:[%s7028_s22 + $0x3d0] sm:$0xff]  }
  0xdc   : > { %6768 = vmatmul.mubr.msk.bf16.gmra.mrb[100].mxu1 %vm309_vm0, %v6926_v41  ;;  %6643 = vmatprep.mubr.msk.bf16.mxu0 %vm309_vm0, %v6927_v42 }
  0xdd   : > { %6771 = vmatprep.mubr.msk.bf16.mxu1 %vm309_vm0, %v6928_v43 }
  0xe3   : > { %6644 = vmatmul.mubr.msk.bf16.gmra.mrb[104].mxu0 %vm309_vm0, %v6929_v44 }
  0xe4   : > { %6772 = vmatmul.mubr.msk.bf16.gmra.mrb[104].mxu1 %vm309_vm0, %v6930_v45  ;;  %6647 = vmatprep.mubr.msk.bf16.mxu0 %vm309_vm0, %v6931_v46 }
  0xe5   : > { %6775 = vmatprep.mubr.msk.bf16.mxu1 %vm309_vm0, %v6932_v47 }
  0xe6   : > { %v6541_v51 = vpop.f32.mrb[0].mxu0 }
  0xe7   : > { %v3170_v54 = vadd.f32 %v6541_v51, %v568_v48  ;;  %v6669_v55 = vpop.f32.mrb[0].mxu1  ;;  %v2145_v56 = vpop.f32.mrb[1].mxu0 }
  0xe8   : > { %v3298_v60 = vadd.f32 %v6669_v55, %v696_v49  ;;  %v3168_v61 = vadd.f32 %v2145_v56, %v566_v50  ;;  %v2657_v62 = vpop.f32.mrb[1].mxu1  ;;  %v6542_v63 = vpop.f32.mrb[2].mxu0 }
  0xe9   : > { %3426 = vst.msk [vmem:[#allocation2 + $0x10] sm:$0xff] %vm309_vm0, %v3170_v54  ;;  %v3296_v3 = vadd.f32 %v2657_v62, %v694_v52  ;;  %v3171_v4 = vadd.f32 %v6542_v63, %v569_v53  ;;  %v6670_v5 = vpop.f32.mrb[2].mxu1  ;;  %v2148_v6 = vpop.f32.mrb[3].mxu0  ;;  %v704_v63 = vld [vmem:[#allocation2 + $0x450] sm:$0xff] }
  0xea   : > { %3554 = vst.msk [vmem:[#allocation2 + $0x410] sm:$0xff] %vm309_vm0, %v3298_v60  ;;  %3424 = vst.msk [vmem:[#allocation2] sm:$0xff] %vm309_vm0, %v3168_v61  ;;  %v3299_v8 = vadd.f32 %v6670_v5, %v697_v57  ;;  %v3169_v9 = vadd.f32 %v2148_v6, %v567_v58  ;;  %v2660_v10 = vpop.f32.mrb[3].mxu1  ;;  %v577_v5 = vld [vmem:[#allocation2 + $0x58] sm:$0xff] }
  0xeb   : > { %3552 = vst.msk [vmem:[#allocation2 + $0x400] sm:$0xff] %vm309_vm0, %v3296_v3  ;;  %3427 = vst.msk [vmem:[#allocation2 + $0x18] sm:$0xff] %vm309_vm0, %v3171_v4  ;;  %v3297_v11 = vadd.f32 %v2660_v10, %v695_v0  ;;  %6648 = vmatmul.mubr.msk.bf16.gmra.mrb[108].mxu0 %vm309_vm0, %v6933_v59  ;;  %v576_v59 = vld [vmem:[#allocation2 + $0x50] sm:$0xff]  ;;  %v574_v0 = vld [vmem:[#allocation2 + $0x40] sm:$0xff] }
  0xec   : > { %3555 = vst.msk [vmem:[#allocation2 + $0x418] sm:$0xff] %vm309_vm0, %v3299_v8  ;;  %3425 = vst.msk [vmem:[#allocation2 + $0x8] sm:$0xff] %vm309_vm0, %v3169_v9  ;;  %6776 = vmatmul.mubr.msk.bf16.gmra.mrb[108].mxu1 %vm309_vm0, %v6934_v1  ;;  %6651 = vmatprep.mubr.msk.bf16.mxu0 %vm309_vm0, %v6935_v2  ;;  %v702_v4 = vld [vmem:[#allocation2 + $0x440] sm:$0xff]  ;;  %v705_v6 = vld [vmem:[#allocation2 + $0x458] sm:$0xff] }
  0xed   : > { %3553 = vst.msk [vmem:[#allocation2 + $0x408] sm:$0xff] %vm309_vm0, %v3297_v11  ;;  %6779 = vmatprep.mubr.msk.bf16.mxu1 %vm309_vm0, %v6936_v7  ;;  %v575_v11 = vld [vmem:[#allocation2 + $0x48] sm:$0xff] }
  0xee   : > { %v6545_v16 = vpop.f32.mrb[4].mxu0 }
  0xef   : > { %v3174_v20 = vadd.f32 %v6545_v16, %v572_v12  ;;  %v6673_v21 = vpop.f32.mrb[4].mxu1  ;;  %v2161_v22 = vpop.f32.mrb[5].mxu0  ;;  %v703_v12 = vld [vmem:[#allocation2 + $0x448] sm:$0xff] }
  0xf0   : > { %v3685_v26 = vld [vmem:[#allocation2 + $0x10] sm:$0xff]  ;;  %v3302_v27 = vadd.f32 %v6673_v21, %v700_v14  ;;  %v3172_v28 = vadd.f32 %v2161_v22, %v570_v15  ;;  %v2673_v29 = vpop.f32.mrb[5].mxu1  ;;  %v6546_v30 = vpop.f32.mrb[6].mxu0  ;;  %v6941_v14 = vld [vmem:[%s7028_s22 + $0x1d8] sm:$0xff]   ;;  %v6943_v21 = vld [vmem:[%s7028_s22 + $0x1e0] sm:$0xff]  }
  0xf1   : > { %v3948_v33 = vadd.f32 %v7788_v13, %v3685_v26  ;;  %v3813_v34 = vld [vmem:[#allocation2 + $0x410] sm:$0xff]  ;;  %v3683_v35 = vld [vmem:[#allocation2] sm:$0xff]  ;;  %3430 = vst.msk [vmem:[#allocation2 + $0x30] sm:$0xff] %vm309_vm0, %v3174_v20  ;;  %v3300_v36 = vadd.f32 %v2673_v29, %v698_v17  ;;  %v3175_v37 = vadd.f32 %v6546_v30, %v573_v18  ;;  %v6674_v38 = vpop.f32.mrb[6].mxu1  ;;  %v2164_v39 = vpop.f32.mrb[7].mxu0  ;;  %v6942_v20 = vld [vmem:[%s7028_s22 + $0x3d8] sm:$0xff]  }
  0xf2   : > { %v4076_v41 = vadd.f32 %v7788_v13, %v3813_v34  ;;  %v3946_v42 = vadd.f32 %v7788_v13, %v3683_v35  ;;  %v3811_v43 = vld [vmem:[#allocation2 + $0x400] sm:$0xff]  ;;  %v3686_v44 = vld [vmem:[#allocation2 + $0x18] sm:$0xff]  ;;  %3558 = vst.msk [vmem:[#allocation2 + $0x430] sm:$0xff] %vm309_vm0, %v3302_v27  ;;  %3428 = vst.msk [vmem:[#allocation2 + $0x20] sm:$0xff] %vm309_vm0, %v3172_v28  ;;  %v3303_v45 = vadd.f32 %v6674_v38, %v701_v19  ;;  %v2676_v47 = vpop.f32.mrb[7].mxu1 }
  0xf3   : > { %v3173_v46 = vadd.f32 %v2164_v39, %v571_v23  ;;  %v6154_v48 = vpack.c.bf16 %v3948_v33, %v3948_v33  ;;  %v4074_v49 = vadd.f32 %v7788_v13, %v3811_v43  ;;  %v3949_v50 = vadd.f32 %v7788_v13, %v3686_v44  ;;  %v3814_v51 = vld [vmem:[#allocation2 + $0x418] sm:$0xff]  ;;  %v3684_v52 = vld [vmem:[#allocation2 + $0x8] sm:$0xff]  ;;  %3556 = vst.msk [vmem:[#allocation2 + $0x420] sm:$0xff] %vm309_vm0, %v3300_v36  ;;  %v6944_v29 = vld [vmem:[%s7028_s22 + $0x3e0] sm:$0xff]  }
  0xf4   : > { %3431 = vst.msk [vmem:[#allocation2 + $0x38] sm:$0xff] %vm309_vm0, %v3175_v37  ;;  %v3301_v53 = vadd.f32 %v2676_v47, %v699_v24  ;;  %6652 = vmatmul.mubr.msk.bf16.gmra.mrb[112].mxu0 %vm309_vm0, %v6937_v25  ;;  %v6282_v54 = vpack.c.bf16 %v4076_v41, %v4076_v41  ;;  %v6152_v55 = vpack.c.bf16 %v3946_v42, %v3946_v42  ;;  %v3812_v58 = vld [vmem:[#allocation2 + $0x408] sm:$0xff]  ;;  %3559 = vst.msk [vmem:[#allocation2 + $0x438] sm:$0xff] %vm309_vm0, %v3303_v45 }
  0xf5   : > { %v4077_v56 = vadd.f32 %v7788_v13, %v3814_v51  ;;  %v3947_v57 = vadd.f32 %v7788_v13, %v3684_v52  ;;  %3429 = vst.msk [vmem:[#allocation2 + $0x28] sm:$0xff] %vm309_vm0, %v3173_v46  ;;  %6780 = vmatmul.mubr.msk.bf16.gmra.mrb[112].mxu1 %vm309_vm0, %v6938_v31  ;;  %v6280_v60 = vpack.c.bf16 %v4074_v49, %v4074_v49  ;;  %v708_v52 = vld [vmem:[#allocation2 + $0x470] sm:$0xff] }
  0xf6   : > { %5229 = vst.msk [vmem:[%s7803_s27 + $0x8] sm:$0xf] %vm5226_vm1, %v6154_v48  ;;  %v6155_v61 = vpack.c.bf16 %v3949_v50, %v3949_v50  ;;  %v4075_v62 = vadd.f32 %v7788_v13, %v3812_v58  ;;  %6655 = vmatprep.mubr.msk.bf16.mxu0 %vm309_vm0, %v6939_v32  ;;  %6783 = vmatprep.mubr.msk.bf16.mxu1 %vm309_vm0, %v6940_v40  ;;  %5357 = vst.msk [vmem:[%s7803_s27 + $0x208] sm:$0xf] %vm5226_vm1, %v6282_v54  ;;  %v6549_v3 = vpop.f32.mrb[8].mxu0  ;;  %v580_v48 = vld [vmem:[#allocation2 + $0x70] sm:$0xff] }
  0xf7   : > { %3557 = vst.msk [vmem:[#allocation2 + $0x428] sm:$0xff] %vm309_vm0, %v3301_v53  ;;  %v6283_v1 = vpack.c.bf16 %v4077_v56, %v4077_v56  ;;  %v6153_v2 = vpack.c.bf16 %v3947_v57, %v3947_v57  ;;  %v3178_v8 = vadd.f32 %v6549_v3, %v576_v59  ;;  %v6677_v9 = vpop.f32.mrb[8].mxu1  ;;  %v2177_v10 = vpop.f32.mrb[9].mxu0  ;;  %v578_v53 = vld [vmem:[#allocation2 + $0x60] sm:$0xff]  ;;  %v581_v58 = vld [vmem:[#allocation2 + $0x78] sm:$0xff] }
  0xf8   : > { %5227 = vst.msk [vmem:[%s7803_s27] sm:$0xf] %vm5226_vm1, %v6152_v55  ;;  %5355 = vst.msk [vmem:[%s7803_s27 + $0x200] sm:$0xf] %vm5226_vm1, %v6280_v60  ;;  %v6281_v7 = vpack.c.bf16 %v4075_v62, %v4075_v62  ;;  %v3689_v15 = vld [vmem:[#allocation2 + $0x30] sm:$0xff]  ;;  %v3306_v16 = vadd.f32 %v6677_v9, %v704_v63  ;;  %v3176_v17 = vadd.f32 %v2177_v10, %v574_v0  ;;  %v2689_v18 = vpop.f32.mrb[9].mxu1 }
  0xf9   : > { %5230 = vst.msk [vmem:[%s7803_s27 + $0xc] sm:$0xf] %vm5226_vm1, %v6155_v61  ;;  %5358 = vst.msk [vmem:[%s7803_s27 + $0x20c] sm:$0xf] %vm5226_vm1, %v6283_v1  ;;  %v6550_v19 = vpop.f32.mrb[10].mxu0  ;;  %v3952_v22 = vadd.f32 %v7788_v13, %v3689_v15  ;;  %v3817_v23 = vld [vmem:[#allocation2 + $0x430] sm:$0xff]  ;;  %v3304_v25 = vadd.f32 %v2689_v18, %v702_v4 }
  0xfa   : > { %5228 = vst.msk [vmem:[%s7803_s27 + $0x4] sm:$0xf] %vm5226_vm1, %v6153_v2  ;;  %5356 = vst.msk [vmem:[%s7803_s27 + $0x204] sm:$0xf] %vm5226_vm1, %v6281_v7  ;;  %v3687_v24 = vld [vmem:[#allocation2 + $0x20] sm:$0xff]  ;;  %v3179_v26 = vadd.f32 %v6550_v19, %v577_v5  ;;  %v6678_v27 = vpop.f32.mrb[10].mxu1  ;;  %v4080_v30 = vadd.f32 %v7788_v13, %v3817_v23 }
  0xfb   : > { %3434 = vst.msk [vmem:[#allocation2 + $0x50] sm:$0xff] %vm309_vm0, %v3178_v8  ;;  %v2180_v28 = vpop.f32.mrb[11].mxu0  ;;  %v3950_v31 = vadd.f32 %v7788_v13, %v3687_v24  ;;  %v3815_v32 = vld [vmem:[#allocation2 + $0x420] sm:$0xff]  ;;  %v3690_v33 = vld [vmem:[#allocation2 + $0x38] sm:$0xff]  ;;  %3562 = vst.msk [vmem:[#allocation2 + $0x450] sm:$0xff] %vm309_vm0, %v3306_v16  ;;  %v3307_v34 = vadd.f32 %v6678_v27, %v705_v6  ;;  %v2692_v36 = vpop.f32.mrb[11].mxu1  ;;  %v6158_v37 = vpack.c.bf16 %v3952_v22, %v3952_v22 }
  0xfc   : > { %3432 = vst.msk [vmem:[#allocation2 + $0x40] sm:$0xff] %vm309_vm0, %v3176_v17  ;;  %v3177_v35 = vadd.f32 %v2180_v28, %v575_v11  ;;  %v4078_v38 = vadd.f32 %v7788_v13, %v3815_v32  ;;  %v3953_v39 = vadd.f32 %v7788_v13, %v3690_v33  ;;  %v3818_v40 = vld [vmem:[#allocation2 + $0x438] sm:$0xff]  ;;  %v3688_v41 = vld [vmem:[#allocation2 + $0x28] sm:$0xff]  ;;  %3560 = vst.msk [vmem:[#allocation2 + $0x440] sm:$0xff] %vm309_vm0, %v3304_v25  ;;  %6656 = vmatmul.mubr.msk.bf16.gmra.mrb[116].mxu0 %vm309_vm0, %v6941_v14 }
  0xfd   : > { %3435 = vst.msk [vmem:[#allocation2 + $0x58] sm:$0xff] %vm309_vm0, %v3179_v26  ;;  %v3305_v42 = vadd.f32 %v2692_v36, %v703_v12  ;;  %v6286_v43 = vpack.c.bf16 %v4080_v30, %v4080_v30  ;;  %v6156_v44 = vpack.c.bf16 %v3950_v31, %v3950_v31  ;;  %v4081_v45 = vadd.f32 %v7788_v13, %v3818_v40  ;;  %v706_v57 = vld [vmem:[#allocation2 + $0x460] sm:$0xff]  ;;  %v709_v59 = vld [vmem:[#allocation2 + $0x478] sm:$0xff]  ;;  %v579_v0 = vld [vmem:[#allocation2 + $0x68] sm:$0xff] }
  0xfe   : > { %v3951_v46 = vadd.f32 %v7788_v13, %v3688_v41  ;;  %v3816_v47 = vld [vmem:[#allocation2 + $0x428] sm:$0xff]  ;;  %3563 = vst.msk [vmem:[#allocation2 + $0x458] sm:$0xff] %vm309_vm0, %v3307_v34  ;;  %3433 = vst.msk [vmem:[#allocation2 + $0x48] sm:$0xff] %vm309_vm0, %v3177_v35  ;;  %6784 = vmatmul.mubr.msk.bf16.gmra.mrb[116].mxu1 %vm309_vm0, %v6942_v20  ;;  %v6284_v49 = vpack.c.bf16 %v4078_v38, %v4078_v38  ;;  %v6159_v50 = vpack.c.bf16 %v3953_v39, %v3953_v39  ;;  %v6553_v56 = vpop.f32.mrb[12].mxu0  ;;  %v6947_v9 = vld [vmem:[%s7028_s22 + $0x1f0] sm:$0xff]  }
  0xff   : > { %5233 = vst.msk [vmem:[%s7803_s27 + $0x18] sm:$0xf] %vm5226_vm1, %v6158_v37  ;;  %v4079_v51 = vadd.f32 %v7788_v13, %v3816_v47  ;;  %6659 = vmatprep.mubr.msk.bf16.mxu0 %vm309_vm0, %v6943_v21  ;;  %6787 = vmatprep.mubr.msk.bf16.mxu1 %vm309_vm0, %v6944_v29  ;;  %5361 = vst.msk [vmem:[%s7803_s27 + $0x218] sm:$0xf] %vm5226_vm1, %v6286_v43  ;;  %v6287_v54 = vpack.c.bf16 %v4081_v45, %v4081_v45  ;;  %v6681_v62 = vpop.f32.mrb[12].mxu1  ;;  %v2193_v63 = vpop.f32.mrb[13].mxu0 }
 0x100   : > { %3561 = vst.msk [vmem:[#allocation2 + $0x448] sm:$0xff] %vm309_vm0, %v3305_v42  ;;  %v6157_v55 = vpack.c.bf16 %v3951_v46, %v3951_v46  ;;  %v3182_v61 = vadd.f32 %v6553_v56, %v580_v48  ;;  %v707_v1 = vld [vmem:[#allocation2 + $0x468] sm:$0xff]  ;;  %v3310_v4 = vadd.f32 %v6681_v62, %v708_v52  ;;  %v3180_v5 = vadd.f32 %v2193_v63, %v578_v53  ;;  %v2705_v6 = vpop.f32.mrb[13].mxu1  ;;  %v6554_v7 = vpop.f32.mrb[14].mxu0  ;;  %v6948_v18 = vld [vmem:[%s7028_s22 + $0x3f0] sm:$0xff]   ;;  %v582_v42 = vld [vmem:[#allocation2 + $0x80] sm:$0xff] }
 0x101   : > { %5231 = vst.msk [vmem:[%s7803_s27 + $0x10] sm:$0xf] %vm5226_vm1, %v6156_v44  ;;  %5359 = vst.msk [vmem:[%s7803_s27 + $0x210] sm:$0xf] %vm5226_vm1, %v6284_v49  ;;  %v6285_v60 = vpack.c.bf16 %v4079_v51, %v4079_v51  ;;  %v6945_v2 = vld [vmem:[%s7028_s22 + $0x1e8] sm:$0xff]   ;;  %v3308_v14 = vadd.f32 %v2705_v6, %v706_v57  ;;  %v3183_v15 = vadd.f32 %v6554_v7, %v581_v58  ;;  %v6682_v16 = vpop.f32.mrb[14].mxu1 }
 0x102   : > { %5234 = vst.msk [vmem:[%s7803_s27 + $0x1c] sm:$0xf] %vm5226_vm1, %v6159_v50  ;;  %5362 = vst.msk [vmem:[%s7803_s27 + $0x21c] sm:$0xf] %vm5226_vm1, %v6287_v54  ;;  %v3693_v3 = vld [vmem:[#allocation2 + $0x50] sm:$0xff]  ;;  %v6946_v8 = vld [vmem:[%s7028_s22 + $0x3e8] sm:$0xff]   ;;  %v3311_v23 = vadd.f32 %v6682_v16, %v709_v59 }
 0x103   : > { %5232 = vst.msk [vmem:[%s7803_s27 + $0x14] sm:$0xf] %vm5226_vm1, %v6157_v55  ;;  %5360 = vst.msk [vmem:[%s7803_s27 + $0x214] sm:$0xf] %vm5226_vm1, %v6285_v60  ;;  %v3956_v10 = vadd.f32 %v7788_v13, %v3693_v3  ;;  %v3821_v11 = vld [vmem:[#allocation2 + $0x450] sm:$0xff]  ;;  %v3691_v12 = vld [vmem:[#allocation2 + $0x40] sm:$0xff] }
 0x104   : > { %3438 = vst.msk [vmem:[#allocation2 + $0x70] sm:$0xff] %vm309_vm0, %v3182_v61  ;;  %v2196_v17 = vpop.f32.mrb[15].mxu0  ;;  %v4084_v19 = vadd.f32 %v7788_v13, %v3821_v11  ;;  %v3954_v20 = vadd.f32 %v7788_v13, %v3691_v12  ;;  %v3819_v21 = vld [vmem:[#allocation2 + $0x440] sm:$0xff]  ;;  %v3694_v22 = vld [vmem:[#allocation2 + $0x58] sm:$0xff]  ;;  %3566 = vst.msk [vmem:[#allocation2 + $0x470] sm:$0xff] %vm309_vm0, %v3310_v4  ;;  %v2708_v25 = vpop.f32.mrb[15].mxu1  ;;  %6660 = vmatmul.mubr.msk.bf16.gmra.mrb[120].mxu0 %vm309_vm0, %v6945_v2 }
 0x105   : > { %3436 = vst.msk [vmem:[#allocation2 + $0x60] sm:$0xff] %vm309_vm0, %v3180_v5  ;;  %v3181_v24 = vadd.f32 %v2196_v17, %v579_v0  ;;  %v6162_v26 = vpack.c.bf16 %v3956_v10, %v3956_v10  ;;  %v4082_v27 = vadd.f32 %v7788_v13, %v3819_v21  ;;  %v3957_v28 = vadd.f32 %v7788_v13, %v3694_v22  ;;  %v3822_v29 = vld [vmem:[#allocation2 + $0x458] sm:$0xff]  ;;  %v3692_v30 = vld [vmem:[#allocation2 + $0x48] sm:$0xff]  ;;  %v584_v37 = vld [vmem:[#allocation2 + $0x90] sm:$0xff] }
 0x106   : > { %3564 = vst.msk [vmem:[#allocation2 + $0x460] sm:$0xff] %vm309_vm0, %v3308_v14  ;;  %3439 = vst.msk [vmem:[#allocation2 + $0x78] sm:$0xff] %vm309_vm0, %v3183_v15  ;;  %v3309_v31 = vadd.f32 %v2708_v25, %v707_v1  ;;  %v6290_v32 = vpack.c.bf16 %v4084_v19, %v4084_v19  ;;  %v6160_v33 = vpack.c.bf16 %v3954_v20, %v3954_v20  ;;  %6788 = vmatmul.mubr.msk.bf16.gmra.mrb[120].mxu1 %vm309_vm0, %v6946_v8  ;;  %v712_v41 = vld [vmem:[#allocation2 + $0x490] sm:$0xff]  ;;  %v6557_v45 = vpop.f32.mrb[16].mxu0  ;;  %v710_v46 = vld [vmem:[#allocation2 + $0x480] sm:$0xff] }
 0x107   : > { %v4085_v34 = vadd.f32 %v7788_v13, %v3822_v29  ;;  %v3955_v35 = vadd.f32 %v7788_v13, %v3692_v30  ;;  %v3820_v36 = vld [vmem:[#allocation2 + $0x448] sm:$0xff]  ;;  %3567 = vst.msk [vmem:[#allocation2 + $0x478] sm:$0xff] %vm309_vm0, %v3311_v23  ;;  %3437 = vst.msk [vmem:[#allocation2 + $0x68] sm:$0xff] %vm309_vm0, %v3181_v24  ;;  %v6288_v38 = vpack.c.bf16 %v4082_v27, %v4082_v27  ;;  %6663 = vmatprep.mubr.msk.bf16.mxu0 %vm309_vm0, %v6947_v9  ;;  %v585_v47 = vld [vmem:[#allocation2 + $0x98] sm:$0xff]  ;;  %v6685_v50 = vpop.f32.mrb[16].mxu1  ;;  %v2209_v51 = vpop.f32.mrb[17].mxu0 }
 0x108   : > { %5237 = vst.msk [vmem:[%s7803_s27 + $0x28] sm:$0xf] %vm5226_vm1, %v6162_v26  ;;  %v6163_v39 = vpack.c.bf16 %v3957_v28, %v3957_v28  ;;  %v4083_v40 = vadd.f32 %v7788_v13, %v3820_v36  ;;  %6791 = vmatprep.mubr.msk.bf16.mxu1 %vm309_vm0, %v6948_v18  ;;  %5365 = vst.msk [vmem:[%s7803_s27 + $0x228] sm:$0xf] %vm5226_vm1, %v6290_v32  ;;  %v3186_v49 = vadd.f32 %v6557_v45, %v584_v37  ;;  %v713_v52 = vld [vmem:[#allocation2 + $0x498] sm:$0xff]  ;;  %v583_v53 = vld [vmem:[#allocation2 + $0x88] sm:$0xff] }
 0x109   : > { %3565 = vst.msk [vmem:[#allocation2 + $0x468] sm:$0xff] %vm309_vm0, %v3309_v31  ;;  %v6291_v43 = vpack.c.bf16 %v4085_v34, %v4085_v34  ;;  %v6161_v44 = vpack.c.bf16 %v3955_v35, %v3955_v35  ;;  %v6949_v54 = vld [vmem:[%s7028_s22 + $0x1f8] sm:$0xff]   ;;  %v3314_v56 = vadd.f32 %v6685_v50, %v712_v41  ;;  %v3184_v57 = vadd.f32 %v2209_v51, %v582_v42  ;;  %v2721_v58 = vpop.f32.mrb[17].mxu1  ;;  %v6558_v59 = vpop.f32.mrb[18].mxu0  ;;  %v711_v60 = vld [vmem:[#allocation2 + $0x488] sm:$0xff]  ;;  %v588_v24 = vld [vmem:[#allocation2 + $0xb0] sm:$0xff] }
 0x10a   : > { %5235 = vst.msk [vmem:[%s7803_s27 + $0x20] sm:$0xf] %vm5226_vm1, %v6160_v33  ;;  %5363 = vst.msk [vmem:[%s7803_s27 + $0x220] sm:$0xf] %vm5226_vm1, %v6288_v38  ;;  %v6289_v48 = vpack.c.bf16 %v4083_v40, %v4083_v40  ;;  %v6950_v61 = vld [vmem:[%s7028_s22 + $0x3f8] sm:$0xff]   ;;  %v3312_v1 = vadd.f32 %v2721_v58, %v710_v46  ;;  %v3187_v2 = vadd.f32 %v6558_v59, %v585_v47  ;;  %v6686_v3 = vpop.f32.mrb[18].mxu1 }
 0x10b   : > { %5238 = vst.msk [vmem:[%s7803_s27 + $0x2c] sm:$0xf] %vm5226_vm1, %v6163_v39  ;;  %5366 = vst.msk [vmem:[%s7803_s27 + $0x22c] sm:$0xf] %vm5226_vm1, %v6291_v43  ;;  %v3697_v55 = vld [vmem:[#allocation2 + $0x70] sm:$0xff]  ;;  %v2212_v4 = vpop.f32.mrb[19].mxu0  ;;  %v3315_v9 = vadd.f32 %v6686_v3, %v713_v52 }
 0x10c   : > { %5236 = vst.msk [vmem:[%s7803_s27 + $0x24] sm:$0xf] %vm5226_vm1, %v6161_v44  ;;  %5364 = vst.msk [vmem:[%s7803_s27 + $0x224] sm:$0xf] %vm5226_vm1, %v6289_v48  ;;  %v3960_v62 = vadd.f32 %v7788_v13, %v3697_v55  ;;  %v3825_v63 = vld [vmem:[#allocation2 + $0x470] sm:$0xff]  ;;  %v3695_v0 = vld [vmem:[#allocation2 + $0x60] sm:$0xff]  ;;  %v3185_v10 = vadd.f32 %v2212_v4, %v583_v53  ;;  %6664 = vmatmul.mubr.msk.bf16.gmra.mrb[124].mxu0 %vm309_vm0, %v6949_v54 }
 0x10d   : > { %3442 = vst.msk [vmem:[#allocation2 + $0x90] sm:$0xff] %vm309_vm0, %v3186_v49  ;;  %v4088_v5 = vadd.f32 %v7788_v13, %v3825_v63  ;;  %v3958_v6 = vadd.f32 %v7788_v13, %v3695_v0  ;;  %v3823_v7 = vld [vmem:[#allocation2 + $0x460] sm:$0xff]  ;;  %v3698_v8 = vld [vmem:[#allocation2 + $0x78] sm:$0xff]  ;;  %3570 = vst.msk [vmem:[#allocation2 + $0x490] sm:$0xff] %vm309_vm0, %v3314_v56  ;;  %v2724_v11 = vpop.f32.mrb[19].mxu1 }
 0x10e   : > { %3440 = vst.msk [vmem:[#allocation2 + $0x80] sm:$0xff] %vm309_vm0, %v3184_v57  ;;  %v6166_v12 = vpack.c.bf16 %v3960_v62, %v3960_v62  ;;  %v4086_v14 = vadd.f32 %v7788_v13, %v3823_v7  ;;  %v3961_v15 = vadd.f32 %v7788_v13, %v3698_v8  ;;  %v3826_v16 = vld [vmem:[#allocation2 + $0x478] sm:$0xff]  ;;  %v3696_v17 = vld [vmem:[#allocation2 + $0x68] sm:$0xff]  ;;  %3568 = vst.msk [vmem:[#allocation2 + $0x480] sm:$0xff] %vm309_vm0, %v3312_v1  ;;  %6792 = vmatmul.mubr.msk.bf16.gmra.mrb[124].mxu1 %vm309_vm0, %v6950_v61  ;;  %v6561_v32 = vpop.f32.mrb[20].mxu0 }
 0x10f   : > { %3443 = vst.msk [vmem:[#allocation2 + $0x98] sm:$0xff] %vm309_vm0, %v3187_v2  ;;  %v3313_v18 = vadd.f32 %v2724_v11, %v711_v60  ;;  %v6294_v19 = vpack.c.bf16 %v4088_v5, %v4088_v5  ;;  %v6164_v20 = vpack.c.bf16 %v3958_v6, %v3958_v6  ;;  %v4089_v21 = vadd.f32 %v7788_v13, %v3826_v16  ;;  %v716_v28 = vld [vmem:[#allocation2 + $0x4b0] sm:$0xff]  ;;  %v586_v29 = vld [vmem:[#allocation2 + $0xa0] sm:$0xff]  ;;  %v589_v34 = vld [vmem:[#allocation2 + $0xb8] sm:$0xff]  ;;  %v6689_v37 = vpop.f32.mrb[20].mxu1  ;;  %v2225_v38 = vpop.f32.mrb[21].mxu0 }
 0x110   : > { %v3959_v22 = vadd.f32 %v7788_v13, %v3696_v17  ;;  %v3824_v23 = vld [vmem:[#allocation2 + $0x468] sm:$0xff]  ;;  %3571 = vst.msk [vmem:[#allocation2 + $0x498] sm:$0xff] %vm309_vm0, %v3315_v9  ;;  %3441 = vst.msk [vmem:[#allocation2 + $0x88] sm:$0xff] %vm309_vm0, %v3185_v10  ;;  %v6292_v25 = vpack.c.bf16 %v4086_v14, %v4086_v14  ;;  %v6167_v26 = vpack.c.bf16 %v3961_v15, %v3961_v15  ;;  %v714_v33 = vld [vmem:[#allocation2 + $0x4a0] sm:$0xff]  ;;  %v2737_v44 = vpop.f32.mrb[21].mxu1  ;;  %v6562_v45 = vpop.f32.mrb[22].mxu0 }
 0x111   : > { %5241 = vst.msk [vmem:[%s7803_s27 + $0x38] sm:$0xf] %vm5226_vm1, %v6166_v12  ;;  %v4087_v27 = vadd.f32 %v7788_v13, %v3824_v23  ;;  %5369 = vst.msk [vmem:[%s7803_s27 + $0x238] sm:$0xf] %vm5226_vm1, %v6294_v19  ;;  %v6295_v30 = vpack.c.bf16 %v4089_v21, %v4089_v21  ;;  %v3190_v36 = vadd.f32 %v6561_v32, %v588_v24  ;;  %v717_v39 = vld [vmem:[#allocation2 + $0x4b8] sm:$0xff]  ;;  %v587_v40 = vld [vmem:[#allocation2 + $0xa8] sm:$0xff] }
 0x112   : > { %3569 = vst.msk [vmem:[#allocation2 + $0x488] sm:$0xff] %vm309_vm0, %v3313_v18  ;;  %v6165_v31 = vpack.c.bf16 %v3959_v22, %v3959_v22  ;;  %v3318_v42 = vadd.f32 %v6689_v37, %v716_v28  ;;  %v3188_v43 = vadd.f32 %v2225_v38, %v586_v29  ;;  %v715_v46 = vld [vmem:[#allocation2 + $0x4a8] sm:$0xff]  ;;  %v3316_v50 = vadd.f32 %v2737_v44, %v714_v33  ;;  %v6690_v52 = vpop.f32.mrb[22].mxu1  ;;  %v2228_v53 = vpop.f32.mrb[23].mxu0  ;;  %v592_v8 = vld [vmem:[#allocation2 + $0xd0] sm:$0xff]  ;;  %v590_v14 = vld [vmem:[#allocation2 + $0xc0] sm:$0xff] }
 0x113   : > { %5239 = vst.msk [vmem:[%s7803_s27 + $0x30] sm:$0xf] %vm5226_vm1, %v6164_v20  ;;  %5367 = vst.msk [vmem:[%s7803_s27 + $0x230] sm:$0xf] %vm5226_vm1, %v6292_v25  ;;  %v6293_v35 = vpack.c.bf16 %v4087_v27, %v4087_v27  ;;  %v3191_v51 = vadd.f32 %v6562_v45, %v589_v34  ;;  %v3319_v58 = vadd.f32 %v6690_v52, %v717_v39  ;;  %v2740_v60 = vpop.f32.mrb[23].mxu1  ;;  %v720_v12 = vld [vmem:[#allocation2 + $0x4d0] sm:$0xff] }
 0x114   : > { %5242 = vst.msk [vmem:[%s7803_s27 + $0x3c] sm:$0xf] %vm5226_vm1, %v6167_v26  ;;  %5370 = vst.msk [vmem:[%s7803_s27 + $0x23c] sm:$0xf] %vm5226_vm1, %v6295_v30  ;;  %v3701_v41 = vld [vmem:[#allocation2 + $0x90] sm:$0xff]  ;;  %v3189_v59 = vadd.f32 %v2228_v53, %v587_v40  ;;  %v3317_v2 = vadd.f32 %v2740_v60, %v715_v46  ;;  %v718_v18 = vld [vmem:[#allocation2 + $0x4c0] sm:$0xff] }
 0x115   : > { %5240 = vst.msk [vmem:[%s7803_s27 + $0x34] sm:$0xf] %vm5226_vm1, %v6165_v31  ;;  %5368 = vst.msk [vmem:[%s7803_s27 + $0x234] sm:$0xf] %vm5226_vm1, %v6293_v35  ;;  %v3964_v47 = vadd.f32 %v7788_v13, %v3701_v41  ;;  %v3829_v48 = vld [vmem:[#allocation2 + $0x490] sm:$0xff]  ;;  %v3699_v49 = vld [vmem:[#allocation2 + $0x80] sm:$0xff] }
 0x116   : > { %3446 = vst.msk [vmem:[#allocation2 + $0xb0] sm:$0xff] %vm309_vm0, %v3190_v36  ;;  %v4092_v54 = vadd.f32 %v7788_v13, %v3829_v48  ;;  %v3962_v55 = vadd.f32 %v7788_v13, %v3699_v49  ;;  %v3827_v56 = vld [vmem:[#allocation2 + $0x480] sm:$0xff]  ;;  %v3702_v57 = vld [vmem:[#allocation2 + $0x98] sm:$0xff]  ;;  %3574 = vst.msk [vmem:[#allocation2 + $0x4b0] sm:$0xff] %vm309_vm0, %v3318_v42  ;;  %v6565_v17 = vpop.f32.mrb[24].mxu0 }
 0x117   : > { %3444 = vst.msk [vmem:[#allocation2 + $0xa0] sm:$0xff] %vm309_vm0, %v3188_v43  ;;  %v6170_v61 = vpack.c.bf16 %v3964_v47, %v3964_v47  ;;  %v4090_v62 = vadd.f32 %v7788_v13, %v3827_v56  ;;  %v3965_v63 = vadd.f32 %v7788_v13, %v3702_v57  ;;  %v3830_v0 = vld [vmem:[#allocation2 + $0x498] sm:$0xff]  ;;  %v3700_v1 = vld [vmem:[#allocation2 + $0x88] sm:$0xff]  ;;  %3572 = vst.msk [vmem:[#allocation2 + $0x4a0] sm:$0xff] %vm309_vm0, %v3316_v50  ;;  %v6693_v22 = vpop.f32.mrb[24].mxu1  ;;  %v2241_v23 = vpop.f32.mrb[25].mxu0 }
 0x118   : > { %3447 = vst.msk [vmem:[#allocation2 + $0xb8] sm:$0xff] %vm309_vm0, %v3191_v51  ;;  %v6298_v3 = vpack.c.bf16 %v4092_v54, %v4092_v54  ;;  %v6168_v4 = vpack.c.bf16 %v3962_v55, %v3962_v55  ;;  %v4093_v5 = vadd.f32 %v7788_v13, %v3830_v0  ;;  %v3963_v6 = vadd.f32 %v7788_v13, %v3700_v1  ;;  %v593_v19 = vld [vmem:[#allocation2 + $0xd8] sm:$0xff]  ;;  %v591_v25 = vld [vmem:[#allocation2 + $0xc8] sm:$0xff]  ;;  %v2753_v29 = vpop.f32.mrb[25].mxu1  ;;  %v6566_v30 = vpop.f32.mrb[26].mxu0  ;;  %v596_v57 = vld [vmem:[#allocation2 + $0xf0] sm:$0xff] }
 0x119   : > { %v3828_v7 = vld [vmem:[#allocation2 + $0x488] sm:$0xff]  ;;  %3575 = vst.msk [vmem:[#allocation2 + $0x4b8] sm:$0xff] %vm309_vm0, %v3319_v58  ;;  %3445 = vst.msk [vmem:[#allocation2 + $0xa8] sm:$0xff] %vm309_vm0, %v3189_v59  ;;  %v6296_v9 = vpack.c.bf16 %v4090_v62, %v4090_v62  ;;  %v6171_v10 = vpack.c.bf16 %v3965_v63, %v3965_v63  ;;  %v3194_v21 = vadd.f32 %v6565_v17, %v592_v8  ;;  %v721_v24 = vld [vmem:[#allocation2 + $0x4d8] sm:$0xff]  ;;  %v6694_v37 = vpop.f32.mrb[26].mxu1  ;;  %v2244_v38 = vpop.f32.mrb[27].mxu0 }
 0x11a   : > { %5245 = vst.msk [vmem:[%s7803_s27 + $0x48] sm:$0xf] %vm5226_vm1, %v6170_v61  ;;  %v4091_v11 = vadd.f32 %v7788_v13, %v3828_v7  ;;  %5373 = vst.msk [vmem:[%s7803_s27 + $0x248] sm:$0xf] %vm5226_vm1, %v6298_v3  ;;  %v6299_v15 = vpack.c.bf16 %v4093_v5, %v4093_v5  ;;  %v6169_v16 = vpack.c.bf16 %v3963_v6, %v3963_v6  ;;  %v719_v31 = vld [vmem:[#allocation2 + $0x4c8] sm:$0xff]  ;;  %v2756_v45 = vpop.f32.mrb[27].mxu1 }
 0x11b   : > { %3573 = vst.msk [vmem:[#allocation2 + $0x4a8] sm:$0xff] %vm309_vm0, %v3317_v2  ;;  %v3322_v27 = vadd.f32 %v6693_v22, %v720_v12  ;;  %v3192_v28 = vadd.f32 %v2241_v23, %v590_v14  ;;  %3450 = vst.msk [vmem:[#allocation2 + $0xd0] sm:$0xff] %vm309_vm0, %v3194_v21  ;;  %v3320_v35 = vadd.f32 %v2753_v29, %v718_v18  ;;  %v724_v61 = vld [vmem:[#allocation2 + $0x4f0] sm:$0xff]  ;;  %v594_v62 = vld [vmem:[#allocation2 + $0xe0] sm:$0xff] }
 0x11c   : > { %5243 = vst.msk [vmem:[%s7803_s27 + $0x40] sm:$0xf] %vm5226_vm1, %v6168_v4  ;;  %5371 = vst.msk [vmem:[%s7803_s27 + $0x240] sm:$0xf] %vm5226_vm1, %v6296_v9  ;;  %v6297_v20 = vpack.c.bf16 %v4091_v11, %v4091_v11  ;;  %v3195_v36 = vadd.f32 %v6566_v30, %v593_v19  ;;  %v3323_v43 = vadd.f32 %v6694_v37, %v721_v24  ;;  %v722_v2 = vld [vmem:[#allocation2 + $0x4e0] sm:$0xff]  ;;  %v597_v3 = vld [vmem:[#allocation2 + $0xf8] sm:$0xff] }
 0x11d   : > { %5246 = vst.msk [vmem:[%s7803_s27 + $0x4c] sm:$0xf] %vm5226_vm1, %v6171_v10  ;;  %5374 = vst.msk [vmem:[%s7803_s27 + $0x24c] sm:$0xf] %vm5226_vm1, %v6299_v15  ;;  %v3705_v26 = vld [vmem:[#allocation2 + $0xb0] sm:$0xff]  ;;  %v3193_v44 = vadd.f32 %v2244_v38, %v591_v25  ;;  %v3321_v51 = vadd.f32 %v2756_v45, %v719_v31  ;;  %v725_v8 = vld [vmem:[#allocation2 + $0x4f8] sm:$0xff] }
 0x11e   : > { %5244 = vst.msk [vmem:[%s7803_s27 + $0x44] sm:$0xf] %vm5226_vm1, %v6169_v16  ;;  %5372 = vst.msk [vmem:[%s7803_s27 + $0x244] sm:$0xf] %vm5226_vm1, %v6297_v20  ;;  %v3968_v32 = vadd.f32 %v7788_v13, %v3705_v26  ;;  %v3833_v33 = vld [vmem:[#allocation2 + $0x4b0] sm:$0xff]  ;;  %v3703_v34 = vld [vmem:[#allocation2 + $0xa0] sm:$0xff] }
 0x11f   : > { %v4096_v39 = vadd.f32 %v7788_v13, %v3833_v33  ;;  %v3966_v40 = vadd.f32 %v7788_v13, %v3703_v34  ;;  %v3831_v41 = vld [vmem:[#allocation2 + $0x4a0] sm:$0xff]  ;;  %v3706_v42 = vld [vmem:[#allocation2 + $0xb8] sm:$0xff]  ;;  %3578 = vst.msk [vmem:[#allocation2 + $0x4d0] sm:$0xff] %vm309_vm0, %v3322_v27  ;;  %3448 = vst.msk [vmem:[#allocation2 + $0xc0] sm:$0xff] %vm309_vm0, %v3192_v28  ;;  %v6569_v1 = vpop.f32.mrb[28].mxu0  ;;  %v6697_v6 = vpop.f32.mrb[28].mxu1 }
 0x120   : > { %v6174_v46 = vpack.c.bf16 %v3968_v32, %v3968_v32  ;;  %v4094_v47 = vadd.f32 %v7788_v13, %v3831_v41  ;;  %v3969_v48 = vadd.f32 %v7788_v13, %v3706_v42  ;;  %v3834_v49 = vld [vmem:[#allocation2 + $0x4b8] sm:$0xff]  ;;  %v3704_v50 = vld [vmem:[#allocation2 + $0xa8] sm:$0xff]  ;;  %3576 = vst.msk [vmem:[#allocation2 + $0x4c0] sm:$0xff] %vm309_vm0, %v3320_v35  ;;  %3451 = vst.msk [vmem:[#allocation2 + $0xd8] sm:$0xff] %vm309_vm0, %v3195_v36  ;;  %v2257_v7 = vpop.f32.mrb[29].mxu0  ;;  %v2769_v14 = vpop.f32.mrb[29].mxu1 }
 0x121   : > { %v6302_v52 = vpack.c.bf16 %v4096_v39, %v4096_v39  ;;  %v6172_v53 = vpack.c.bf16 %v3966_v40, %v3966_v40  ;;  %v4097_v54 = vadd.f32 %v7788_v13, %v3834_v49  ;;  %v3967_v55 = vadd.f32 %v7788_v13, %v3704_v50  ;;  %3579 = vst.msk [vmem:[#allocation2 + $0x4d8] sm:$0xff] %vm309_vm0, %v3323_v43  ;;  %v595_v9 = vld [vmem:[#allocation2 + $0xe8] sm:$0xff]  ;;  %v6570_v15 = vpop.f32.mrb[30].mxu0  ;;  %v6698_v22 = vpop.f32.mrb[30].mxu1  ;;  %v600_v42 = vld [vmem:[#allocation2 + $0x110] sm:$0xff] }
 0x122   : > { %v3832_v56 = vld [vmem:[#allocation2 + $0x4a8] sm:$0xff]  ;;  %3449 = vst.msk [vmem:[#allocation2 + $0xc8] sm:$0xff] %vm309_vm0, %v3193_v44  ;;  %v6300_v58 = vpack.c.bf16 %v4094_v47, %v4094_v47  ;;  %v6175_v59 = vpack.c.bf16 %v3969_v48, %v3969_v48  ;;  %3577 = vst.msk [vmem:[#allocation2 + $0x4c8] sm:$0xff] %vm309_vm0, %v3321_v51  ;;  %v3198_v5 = vadd.f32 %v6569_v1, %v596_v57  ;;  %v3709_v10 = vld [vmem:[#allocation2 + $0xd0] sm:$0xff]  ;;  %v2260_v23 = vpop.f32.mrb[31].mxu0  ;;  %v2772_v30 = vpop.f32.mrb[31].mxu1 }
 0x123   : > { %5249 = vst.msk [vmem:[%s7803_s27 + $0x58] sm:$0xf] %vm5226_vm1, %v6174_v46  ;;  %v4095_v60 = vadd.f32 %v7788_v13, %v3832_v56  ;;  %5377 = vst.msk [vmem:[%s7803_s27 + $0x258] sm:$0xf] %vm5226_vm1, %v6302_v52  ;;  %v6303_v63 = vpack.c.bf16 %v4097_v54, %v4097_v54  ;;  %v6173_v0 = vpack.c.bf16 %v3967_v55, %v3967_v55  ;;  %v723_v16 = vld [vmem:[#allocation2 + $0x4e8] sm:$0xff]  ;;  %v728_v46 = vld [vmem:[#allocation2 + $0x510] sm:$0xff] }
 0x124   : > { %5247 = vst.msk [vmem:[%s7803_s27 + $0x50] sm:$0xf] %vm5226_vm1, %v6172_v53  ;;  %5375 = vst.msk [vmem:[%s7803_s27 + $0x250] sm:$0xf] %vm5226_vm1, %v6300_v58  ;;  %v3326_v11 = vadd.f32 %v6697_v6, %v724_v61  ;;  %v3196_v12 = vadd.f32 %v2257_v7, %v594_v62  ;;  %v3972_v17 = vadd.f32 %v7788_v13, %v3709_v10  ;;  %v598_v47 = vld [vmem:[#allocation2 + $0x100] sm:$0xff]  ;;  %v601_v52 = vld [vmem:[#allocation2 + $0x118] sm:$0xff] }
 0x125   : > { %5250 = vst.msk [vmem:[%s7803_s27 + $0x5c] sm:$0xf] %vm5226_vm1, %v6175_v59  ;;  %v6301_v4 = vpack.c.bf16 %v4095_v60, %v4095_v60  ;;  %5378 = vst.msk [vmem:[%s7803_s27 + $0x25c] sm:$0xf] %vm5226_vm1, %v6303_v63  ;;  %v3324_v20 = vadd.f32 %v2769_v14, %v722_v2  ;;  %v3199_v21 = vadd.f32 %v6570_v15, %v597_v3  ;;  %v726_v51 = vld [vmem:[#allocation2 + $0x500] sm:$0xff]  ;;  %v729_v57 = vld [vmem:[#allocation2 + $0x518] sm:$0xff] }
 0x126   : > { %5248 = vst.msk [vmem:[%s7803_s27 + $0x54] sm:$0xf] %vm5226_vm1, %v6173_v0  ;;  %v3837_v18 = vld [vmem:[#allocation2 + $0x4d0] sm:$0xff]  ;;  %v3707_v19 = vld [vmem:[#allocation2 + $0xc0] sm:$0xff]  ;;  %v3327_v28 = vadd.f32 %v6698_v22, %v725_v8  ;;  %v3197_v29 = vadd.f32 %v2260_v23, %v595_v9  ;;  %v6178_v31 = vpack.c.bf16 %v3972_v17, %v3972_v17  ;;  %v3325_v36 = vadd.f32 %v2772_v30, %v723_v16  ;;  %v6573_v50 = vpop.f32.mrb[32].mxu0  ;;  %v599_v58 = vld [vmem:[#allocation2 + $0x108] sm:$0xff] }
 0x127   : > { %5376 = vst.msk [vmem:[%s7803_s27 + $0x254] sm:$0xf] %vm5226_vm1, %v6301_v4  ;;  %v4100_v24 = vadd.f32 %v7788_v13, %v3837_v18  ;;  %v3970_v25 = vadd.f32 %v7788_v13, %v3707_v19  ;;  %v3835_v26 = vld [vmem:[#allocation2 + $0x4c0] sm:$0xff]  ;;  %v3710_v27 = vld [vmem:[#allocation2 + $0xd8] sm:$0xff]  ;;  %v3202_v54 = vadd.f32 %v6573_v50, %v600_v42  ;;  %v6701_v55 = vpop.f32.mrb[32].mxu1  ;;  %v2273_v56 = vpop.f32.mrb[33].mxu0 }
 0x128   : > { %3454 = vst.msk [vmem:[#allocation2 + $0xf0] sm:$0xff] %vm309_vm0, %v3198_v5  ;;  %3582 = vst.msk [vmem:[#allocation2 + $0x4f0] sm:$0xff] %vm309_vm0, %v3326_v11  ;;  %v4098_v32 = vadd.f32 %v7788_v13, %v3835_v26  ;;  %v3973_v33 = vadd.f32 %v7788_v13, %v3710_v27  ;;  %v3838_v34 = vld [vmem:[#allocation2 + $0x4d8] sm:$0xff]  ;;  %v3330_v60 = vadd.f32 %v6701_v55, %v728_v46  ;;  %v2785_v62 = vpop.f32.mrb[33].mxu1  ;;  %v6574_v63 = vpop.f32.mrb[34].mxu0  ;;  %v727_v0 = vld [vmem:[#allocation2 + $0x508] sm:$0xff] }
 0x129   : > { %3452 = vst.msk [vmem:[#allocation2 + $0xe0] sm:$0xff] %vm309_vm0, %v3196_v12  ;;  %v3708_v35 = vld [vmem:[#allocation2 + $0xc8] sm:$0xff]  ;;  %3580 = vst.msk [vmem:[#allocation2 + $0x4e0] sm:$0xff] %vm309_vm0, %v3324_v20  ;;  %v6306_v37 = vpack.c.bf16 %v4100_v24, %v4100_v24  ;;  %v6176_v38 = vpack.c.bf16 %v3970_v25, %v3970_v25  ;;  %v4101_v39 = vadd.f32 %v7788_v13, %v3838_v34  ;;  %v6702_v6 = vpop.f32.mrb[34].mxu1  ;;  %v2276_v7 = vpop.f32.mrb[35].mxu0  ;;  %v604_v27 = vld [vmem:[#allocation2 + $0x130] sm:$0xff] }
 0x12a   : > { %3455 = vst.msk [vmem:[#allocation2 + $0xf8] sm:$0xff] %vm309_vm0, %v3199_v21  ;;  %v3971_v40 = vadd.f32 %v7788_v13, %v3708_v35  ;;  %v3836_v41 = vld [vmem:[#allocation2 + $0x4c8] sm:$0xff]  ;;  %3583 = vst.msk [vmem:[#allocation2 + $0x4f8] sm:$0xff] %vm309_vm0, %v3327_v28  ;;  %v6304_v43 = vpack.c.bf16 %v4098_v32, %v4098_v32  ;;  %v6179_v44 = vpack.c.bf16 %v3973_v33, %v3973_v33  ;;  %v2788_v15 = vpop.f32.mrb[35].mxu1  ;;  %v8060_v17 = vld [vmem:[%s8869_s2] ss:$0 sm:$0xff] }
 0x12b   : > { %3453 = vst.msk [vmem:[#allocation2 + $0xe8] sm:$0xff] %vm309_vm0, %v3197_v29  ;;  %v4099_v45 = vadd.f32 %v7788_v13, %v3836_v41  ;;  %3581 = vst.msk [vmem:[#allocation2 + $0x4e8] sm:$0xff] %vm309_vm0, %v3325_v36  ;;  %v6307_v48 = vpack.c.bf16 %v4101_v39, %v4101_v39  ;;  %v3200_v61 = vadd.f32 %v2273_v56, %v598_v47  ;;  %v602_v32 = vld [vmem:[#allocation2 + $0x120] sm:$0xff]  ;;  %v733_v42 = vld [vmem:[#allocation2 + $0x538] sm:$0xff] }
 0x12c   : > { %5253 = vst.msk [vmem:[%s7803_s27 + $0x68] sm:$0xf] %vm5226_vm1, %v6178_v31  ;;  %5381 = vst.msk [vmem:[%s7803_s27 + $0x268] sm:$0xf] %vm5226_vm1, %v6306_v37  ;;  %v6177_v49 = vpack.c.bf16 %v3971_v40, %v3971_v40  ;;  %v3328_v4 = vadd.f32 %v2785_v62, %v726_v51  ;;  %v3203_v5 = vadd.f32 %v6574_v63, %v601_v52  ;;  %v732_v31 = vld [vmem:[#allocation2 + $0x530] sm:$0xff]  ;;  %v730_v36 = vld [vmem:[#allocation2 + $0x520] sm:$0xff] }
 0x12d   : > { %5251 = vst.msk [vmem:[%s7803_s27 + $0x60] sm:$0xf] %vm5226_vm1, %v6176_v38  ;;  %5379 = vst.msk [vmem:[%s7803_s27 + $0x260] sm:$0xf] %vm5226_vm1, %v6304_v43  ;;  %v6305_v53 = vpack.c.bf16 %v4099_v45, %v4099_v45  ;;  %v3331_v12 = vadd.f32 %v6702_v6, %v729_v57  ;;  %v3201_v14 = vadd.f32 %v2276_v7, %v599_v58  ;;  %v605_v37 = vld [vmem:[#allocation2 + $0x138] sm:$0xff]  ;;  %v603_v43 = vld [vmem:[#allocation2 + $0x128] sm:$0xff] }
 0x12e   : > { %5254 = vst.msk [vmem:[%s7803_s27 + $0x6c] sm:$0xf] %vm5226_vm1, %v6179_v44  ;;  %5382 = vst.msk [vmem:[%s7803_s27 + $0x26c] sm:$0xf] %vm5226_vm1, %v6307_v48  ;;  %v3329_v21 = vadd.f32 %v2788_v15, %v727_v0  ;;  %v6577_v35 = vpop.f32.mrb[36].mxu0 }
 0x12f   : > { %5252 = vst.msk [vmem:[%s7803_s27 + $0x64] sm:$0xf] %vm5226_vm1, %v6177_v49  ;;  %v3713_v59 = vld [vmem:[#allocation2 + $0xf0] sm:$0xff]  ;;  %5380 = vst.msk [vmem:[%s7803_s27 + $0x264] sm:$0xf] %vm5226_vm1, %v6305_v53  ;;  %v3206_v39 = vadd.f32 %v6577_v35, %v604_v27  ;;  %v6705_v40 = vpop.f32.mrb[36].mxu1 }
 0x130   : > { %v3976_v1 = vadd.f32 %v7788_v13, %v3713_v59  ;;  %v3841_v2 = vld [vmem:[#allocation2 + $0x4f0] sm:$0xff]  ;;  %v3711_v3 = vld [vmem:[#allocation2 + $0xe0] sm:$0xff]  ;;  %3458 = vst.msk [vmem:[#allocation2 + $0x110] sm:$0xff] %vm309_vm0, %v3202_v54  ;;  %3586 = vst.msk [vmem:[#allocation2 + $0x510] sm:$0xff] %vm309_vm0, %v3330_v60  ;;  %v2289_v41 = vpop.f32.mrb[37].mxu0  ;;  %v3334_v45 = vadd.f32 %v6705_v40, %v732_v31  ;;  %v2801_v47 = vpop.f32.mrb[37].mxu1 }
 0x131   : > { %v4104_v8 = vadd.f32 %v7788_v13, %v3841_v2  ;;  %v3974_v9 = vadd.f32 %v7788_v13, %v3711_v3  ;;  %v3839_v10 = vld [vmem:[#allocation2 + $0x4e0] sm:$0xff]  ;;  %v3714_v11 = vld [vmem:[#allocation2 + $0xf8] sm:$0xff]  ;;  %3456 = vst.msk [vmem:[#allocation2 + $0x100] sm:$0xff] %vm309_vm0, %v3200_v61  ;;  %3584 = vst.msk [vmem:[#allocation2 + $0x500] sm:$0xff] %vm309_vm0, %v3328_v4  ;;  %v3204_v46 = vadd.f32 %v2289_v41, %v602_v32  ;;  %v6578_v48 = vpop.f32.mrb[38].mxu0  ;;  %v6706_v55 = vpop.f32.mrb[38].mxu1 }
 0x132   : > { %v6182_v16 = vpack.c.bf16 %v3976_v1, %v3976_v1  ;;  %v4102_v18 = vadd.f32 %v8060_v17, %v3839_v10  ;;  %v3977_v13 = vadd.f32 %v8060_v17, %v3714_v11  ;;  %v3842_v19 = vld [vmem:[#allocation2 + $0x4f8] sm:$0xff]  ;;  %v3712_v20 = vld [vmem:[#allocation2 + $0xe8] sm:$0xff]  ;;  %3459 = vst.msk [vmem:[#allocation2 + $0x118] sm:$0xff] %vm309_vm0, %v3203_v5  ;;  %3587 = vst.msk [vmem:[#allocation2 + $0x518] sm:$0xff] %vm309_vm0, %v3331_v12  ;;  %v2292_v56 = vpop.f32.mrb[39].mxu0  ;;  %v2804_v63 = vpop.f32.mrb[39].mxu1 }
 0x133   : > { %v6310_v22 = vpack.c.bf16 %v4104_v8, %v4104_v8  ;;  %v6180_v23 = vpack.c.bf16 %v3974_v9, %v3974_v9  ;;  %v4105_v24 = vadd.f32 %v8060_v17, %v3842_v19  ;;  %v3975_v25 = vadd.f32 %v8060_v17, %v3712_v20  ;;  %v3840_v26 = vld [vmem:[#allocation2 + $0x4e8] sm:$0xff]  ;;  %3457 = vst.msk [vmem:[#allocation2 + $0x108] sm:$0xff] %vm309_vm0, %v3201_v14  ;;  %v608_v11 = vld [vmem:[#allocation2 + $0x150] sm:$0xff]  ;;  %v737_v27 = vld [vmem:[#allocation2 + $0x558] sm:$0xff] }
 0x134   : > { %5257 = vst.msk [vmem:[%s7803_s27 + $0x78] sm:$0xf] %vm5226_vm1, %v6182_v16  ;;  %v6308_v28 = vpack.c.bf16 %v4102_v18, %v4102_v18  ;;  %v6183_v29 = vpack.c.bf16 %v3977_v13, %v3977_v13  ;;  %v4103_v30 = vadd.f32 %v8060_v17, %v3840_v26  ;;  %v731_v49 = vld [vmem:[#allocation2 + $0x528] sm:$0xff]  ;;  %v3332_v53 = vadd.f32 %v2801_v47, %v730_v36  ;;  %v736_v16 = vld [vmem:[#allocation2 + $0x550] sm:$0xff]  ;;  %v606_v18 = vld [vmem:[#allocation2 + $0x140] sm:$0xff] }
 0x135   : > { %3585 = vst.msk [vmem:[#allocation2 + $0x508] sm:$0xff] %vm309_vm0, %v3329_v21  ;;  %v6311_v33 = vpack.c.bf16 %v4105_v24, %v4105_v24  ;;  %v6181_v34 = vpack.c.bf16 %v3975_v25, %v3975_v25  ;;  %3462 = vst.msk [vmem:[#allocation2 + $0x130] sm:$0xff] %vm309_vm0, %v3206_v39  ;;  %v3207_v54 = vadd.f32 %v6578_v48, %v605_v37  ;;  %v734_v21 = vld [vmem:[#allocation2 + $0x540] sm:$0xff] }
 0x136   : > { %5385 = vst.msk [vmem:[%s7803_s27 + $0x278] sm:$0xf] %vm5226_vm1, %v6310_v22  ;;  %5255 = vst.msk [vmem:[%s7803_s27 + $0x70] sm:$0xf] %vm5226_vm1, %v6180_v23  ;;  %v6309_v38 = vpack.c.bf16 %v4103_v30, %v4103_v30  ;;  %v3335_v61 = vadd.f32 %v6706_v55, %v733_v42  ;;  %v3205_v62 = vadd.f32 %v2292_v56, %v603_v43  ;;  %v6581_v20 = vpop.f32.mrb[40].mxu0  ;;  %v609_v22 = vld [vmem:[#allocation2 + $0x158] sm:$0xff] }
 0x137   : > { %5383 = vst.msk [vmem:[%s7803_s27 + $0x270] sm:$0xf] %vm5226_vm1, %v6308_v28  ;;  %5258 = vst.msk [vmem:[%s7803_s27 + $0x7c] sm:$0xf] %vm5226_vm1, %v6183_v29  ;;  %v3717_v44 = vld [vmem:[#allocation2 + $0x110] sm:$0xff]  ;;  %v3333_v5 = vadd.f32 %v2804_v63, %v731_v49  ;;  %v3210_v24 = vadd.f32 %v6581_v20, %v608_v11  ;;  %v6709_v25 = vpop.f32.mrb[40].mxu1 }
 0x138   : > { %5386 = vst.msk [vmem:[%s7803_s27 + $0x27c] sm:$0xf] %vm5226_vm1, %v6311_v33  ;;  %5256 = vst.msk [vmem:[%s7803_s27 + $0x74] sm:$0xf] %vm5226_vm1, %v6181_v34  ;;  %v3980_v50 = vadd.f32 %v8060_v17, %v3717_v44  ;;  %v3845_v51 = vld [vmem:[#allocation2 + $0x510] sm:$0xff]  ;;  %v3715_v52 = vld [vmem:[#allocation2 + $0x100] sm:$0xff]  ;;  %v3338_v30 = vadd.f32 %v6709_v25, %v736_v16 }
 0x139   : > { %5384 = vst.msk [vmem:[%s7803_s27 + $0x274] sm:$0xf] %vm5226_vm1, %v6309_v38  ;;  %v4108_v57 = vadd.f32 %v8060_v17, %v3845_v51  ;;  %v3978_v58 = vadd.f32 %v8060_v17, %v3715_v52  ;;  %v3843_v59 = vld [vmem:[#allocation2 + $0x500] sm:$0xff]  ;;  %v3718_v60 = vld [vmem:[#allocation2 + $0x118] sm:$0xff]  ;;  %v2305_v26 = vpop.f32.mrb[41].mxu0  ;;  %v607_v28 = vld [vmem:[#allocation2 + $0x148] sm:$0xff] }
 0x13a   : > { %3590 = vst.msk [vmem:[#allocation2 + $0x530] sm:$0xff] %vm309_vm0, %v3334_v45  ;;  %3460 = vst.msk [vmem:[#allocation2 + $0x120] sm:$0xff] %vm309_vm0, %v3204_v46  ;;  %v6186_v0 = vpack.c.bf16 %v3980_v50, %v3980_v50  ;;  %v4106_v1 = vadd.f32 %v8060_v17, %v3843_v59  ;;  %v3981_v2 = vadd.f32 %v8060_v17, %v3718_v60  ;;  %v3846_v3 = vld [vmem:[#allocation2 + $0x518] sm:$0xff]  ;;  %v3716_v4 = vld [vmem:[#allocation2 + $0x108] sm:$0xff]  ;;  %v2817_v32 = vpop.f32.mrb[41].mxu1  ;;  %v6582_v33 = vpop.f32.mrb[42].mxu0 }
 0x13b   : > { %3588 = vst.msk [vmem:[#allocation2 + $0x520] sm:$0xff] %vm309_vm0, %v3332_v53  ;;  %3463 = vst.msk [vmem:[#allocation2 + $0x138] sm:$0xff] %vm309_vm0, %v3207_v54  ;;  %v6314_v6 = vpack.c.bf16 %v4108_v57, %v4108_v57  ;;  %v6184_v7 = vpack.c.bf16 %v3978_v58, %v3978_v58  ;;  %v4109_v8 = vadd.f32 %v8060_v17, %v3846_v3  ;;  %v735_v34 = vld [vmem:[#allocation2 + $0x548] sm:$0xff]  ;;  %v6710_v40 = vpop.f32.mrb[42].mxu1  ;;  %v2308_v41 = vpop.f32.mrb[43].mxu0  ;;  %v612_v60 = vld [vmem:[#allocation2 + $0x170] sm:$0xff] }
 0x13c   : > { %v3979_v9 = vadd.f32 %v8060_v17, %v3716_v4  ;;  %v3844_v10 = vld [vmem:[#allocation2 + $0x508] sm:$0xff]  ;;  %3591 = vst.msk [vmem:[#allocation2 + $0x538] sm:$0xff] %vm309_vm0, %v3335_v61  ;;  %3461 = vst.msk [vmem:[#allocation2 + $0x128] sm:$0xff] %vm309_vm0, %v3205_v62  ;;  %v6312_v12 = vpack.c.bf16 %v4106_v1, %v4106_v1  ;;  %v6187_v14 = vpack.c.bf16 %v3981_v2, %v3981_v2  ;;  %v3721_v29 = vld [vmem:[#allocation2 + $0x130] sm:$0xff]  ;;  %v2820_v48 = vpop.f32.mrb[43].mxu1 }
 0x13d   : > { %5261 = vst.msk [vmem:[%s7803_s27 + $0x88] sm:$0xf] %vm5226_vm1, %v6186_v0  ;;  %v4107_v15 = vadd.f32 %v8060_v17, %v3844_v10  ;;  %5389 = vst.msk [vmem:[%s7803_s27 + $0x288] sm:$0xf] %vm5226_vm1, %v6314_v6  ;;  %v6315_v13 = vpack.c.bf16 %v4109_v8, %v4109_v8  ;;  %v3208_v31 = vadd.f32 %v2305_v26, %v606_v18  ;;  %v740_v0 = vld [vmem:[#allocation2 + $0x570] sm:$0xff]  ;;  %v610_v1 = vld [vmem:[#allocation2 + $0x160] sm:$0xff] }
 0x13e   : > { %3589 = vst.msk [vmem:[#allocation2 + $0x528] sm:$0xff] %vm309_vm0, %v3333_v5  ;;  %v6185_v19 = vpack.c.bf16 %v3979_v9, %v3979_v9  ;;  %v3984_v35 = vadd.f32 %v8060_v17, %v3721_v29  ;;  %3466 = vst.msk [vmem:[#allocation2 + $0x150] sm:$0xff] %vm309_vm0, %v3210_v24  ;;  %v3336_v38 = vadd.f32 %v2817_v32, %v734_v21  ;;  %v6585_v4 = vpop.f32.mrb[44].mxu0  ;;  %v738_v5 = vld [vmem:[#allocation2 + $0x560] sm:$0xff]  ;;  %v613_v6 = vld [vmem:[#allocation2 + $0x178] sm:$0xff] }
 0x13f   : > { %5259 = vst.msk [vmem:[%s7803_s27 + $0x80] sm:$0xf] %vm5226_vm1, %v6184_v7  ;;  %5387 = vst.msk [vmem:[%s7803_s27 + $0x280] sm:$0xf] %vm5226_vm1, %v6312_v12  ;;  %v6313_v23 = vpack.c.bf16 %v4107_v15, %v4107_v15  ;;  %v3211_v39 = vadd.f32 %v6582_v33, %v609_v22  ;;  %v3339_v46 = vadd.f32 %v6710_v40, %v737_v27  ;;  %v6713_v9 = vpop.f32.mrb[44].mxu1  ;;  %v2321_v10 = vpop.f32.mrb[45].mxu0 }
 0x140   : > { %5262 = vst.msk [vmem:[%s7803_s27 + $0x8c] sm:$0xf] %vm5226_vm1, %v6187_v14  ;;  %5390 = vst.msk [vmem:[%s7803_s27 + $0x28c] sm:$0xf] %vm5226_vm1, %v6315_v13  ;;  %v3209_v47 = vadd.f32 %v2308_v41, %v607_v28  ;;  %v6190_v49 = vpack.c.bf16 %v3984_v35, %v3984_v35  ;;  %v3337_v54 = vadd.f32 %v2820_v48, %v735_v34  ;;  %v741_v11 = vld [vmem:[#allocation2 + $0x578] sm:$0xff]  ;;  %v611_v12 = vld [vmem:[#allocation2 + $0x168] sm:$0xff] }
 0x141   : > { %5260 = vst.msk [vmem:[%s7803_s27 + $0x84] sm:$0xf] %vm5226_vm1, %v6185_v19  ;;  %5388 = vst.msk [vmem:[%s7803_s27 + $0x284] sm:$0xf] %vm5226_vm1, %v6313_v23  ;;  %v3849_v36 = vld [vmem:[#allocation2 + $0x530] sm:$0xff]  ;;  %v3719_v37 = vld [vmem:[#allocation2 + $0x120] sm:$0xff]  ;;  %v3214_v8 = vadd.f32 %v6585_v4, %v612_v60  ;;  %v3342_v15 = vadd.f32 %v6713_v9, %v740_v0  ;;  %v3212_v16 = vadd.f32 %v2321_v10, %v610_v1 }
 0x142   : > { %v4112_v42 = vadd.f32 %v8060_v17, %v3849_v36  ;;  %v3982_v43 = vadd.f32 %v8060_v17, %v3719_v37  ;;  %v3847_v44 = vld [vmem:[#allocation2 + $0x520] sm:$0xff]  ;;  %v3722_v45 = vld [vmem:[#allocation2 + $0x138] sm:$0xff]  ;;  %3594 = vst.msk [vmem:[#allocation2 + $0x550] sm:$0xff] %vm309_vm0, %v3338_v30  ;;  %3464 = vst.msk [vmem:[#allocation2 + $0x140] sm:$0xff] %vm309_vm0, %v3208_v31  ;;  %v2833_v18 = vpop.f32.mrb[45].mxu1  ;;  %v6586_v13 = vpop.f32.mrb[46].mxu0 }
 0x143   : > { %v4110_v50 = vadd.f32 %v8060_v17, %v3847_v44  ;;  %v3985_v51 = vadd.f32 %v8060_v17, %v3722_v45  ;;  %v3850_v52 = vld [vmem:[#allocation2 + $0x538] sm:$0xff]  ;;  %v3720_v53 = vld [vmem:[#allocation2 + $0x128] sm:$0xff]  ;;  %3592 = vst.msk [vmem:[#allocation2 + $0x540] sm:$0xff] %vm309_vm0, %v3336_v38  ;;  %3467 = vst.msk [vmem:[#allocation2 + $0x158] sm:$0xff] %vm309_vm0, %v3211_v39  ;;  %v3340_v23 = vadd.f32 %v2833_v18, %v738_v5  ;;  %v6714_v25 = vpop.f32.mrb[46].mxu1  ;;  %v2324_v26 = vpop.f32.mrb[47].mxu0 }
 0x144   : > { %v6318_v55 = vpack.c.bf16 %v4112_v42, %v4112_v42  ;;  %v6188_v56 = vpack.c.bf16 %v3982_v43, %v3982_v43  ;;  %v4113_v57 = vadd.f32 %v8060_v17, %v3850_v52  ;;  %v3983_v58 = vadd.f32 %v8060_v17, %v3720_v53  ;;  %3595 = vst.msk [vmem:[#allocation2 + $0x558] sm:$0xff] %vm309_vm0, %v3339_v46  ;;  %v739_v19 = vld [vmem:[#allocation2 + $0x568] sm:$0xff]  ;;  %v2836_v33 = vpop.f32.mrb[47].mxu1  ;;  %v616_v45 = vld [vmem:[#allocation2 + $0x190] sm:$0xff]  ;;  %v745_v60 = vld [vmem:[#allocation2 + $0x598] sm:$0xff] }
 0x145   : > { %v3848_v59 = vld [vmem:[#allocation2 + $0x528] sm:$0xff]  ;;  %3465 = vst.msk [vmem:[#allocation2 + $0x148] sm:$0xff] %vm309_vm0, %v3209_v47  ;;  %v6316_v61 = vpack.c.bf16 %v4110_v50, %v4110_v50  ;;  %v6191_v62 = vpack.c.bf16 %v3985_v51, %v3985_v51  ;;  %3593 = vst.msk [vmem:[#allocation2 + $0x548] sm:$0xff] %vm309_vm0, %v3337_v54  ;;  %v3725_v14 = vld [vmem:[#allocation2 + $0x150] sm:$0xff]  ;;  %v3215_v24 = vadd.f32 %v6586_v13, %v613_v6 }
 0x146   : > { %5265 = vst.msk [vmem:[%s7803_s27 + $0x98] sm:$0xf] %vm5226_vm1, %v6190_v49  ;;  %v4111_v63 = vadd.f32 %v8060_v17, %v3848_v59  ;;  %5393 = vst.msk [vmem:[%s7803_s27 + $0x298] sm:$0xf] %vm5226_vm1, %v6318_v55  ;;  %v6319_v2 = vpack.c.bf16 %v4113_v57, %v4113_v57  ;;  %v6189_v3 = vpack.c.bf16 %v3983_v58, %v3983_v58  ;;  %v744_v49 = vld [vmem:[#allocation2 + $0x590] sm:$0xff]  ;;  %v614_v50 = vld [vmem:[#allocation2 + $0x180] sm:$0xff] }
 0x147   : > { %5263 = vst.msk [vmem:[%s7803_s27 + $0x90] sm:$0xf] %vm5226_vm1, %v6188_v56  ;;  %5391 = vst.msk [vmem:[%s7803_s27 + $0x290] sm:$0xf] %vm5226_vm1, %v6316_v61  ;;  %v3988_v20 = vadd.f32 %v8060_v17, %v3725_v14  ;;  %v3343_v31 = vadd.f32 %v6714_v25, %v741_v11  ;;  %v3213_v32 = vadd.f32 %v2324_v26, %v611_v12  ;;  %v6589_v53 = vpop.f32.mrb[48].mxu0  ;;  %v742_v54 = vld [vmem:[#allocation2 + $0x580] sm:$0xff] }
 0x148   : > { %5266 = vst.msk [vmem:[%s7803_s27 + $0x9c] sm:$0xf] %vm5226_vm1, %v6191_v62  ;;  %v6317_v7 = vpack.c.bf16 %v4111_v63, %v4111_v63  ;;  %5394 = vst.msk [vmem:[%s7803_s27 + $0x29c] sm:$0xf] %vm5226_vm1, %v6319_v2  ;;  %v3341_v39 = vadd.f32 %v2836_v33, %v739_v19  ;;  %v617_v55 = vld [vmem:[#allocation2 + $0x198] sm:$0xff]  ;;  %v3218_v57 = vadd.f32 %v6589_v53, %v616_v45  ;;  %v6717_v58 = vpop.f32.mrb[48].mxu1 }
 0x149   : > { %5264 = vst.msk [vmem:[%s7803_s27 + $0x94] sm:$0xf] %vm5226_vm1, %v6189_v3  ;;  %v3853_v21 = vld [vmem:[#allocation2 + $0x550] sm:$0xff]  ;;  %v3723_v22 = vld [vmem:[#allocation2 + $0x140] sm:$0xff]  ;;  %v6194_v34 = vpack.c.bf16 %v3988_v20, %v3988_v20  ;;  %v2337_v59 = vpop.f32.mrb[49].mxu0  ;;  %v615_v61 = vld [vmem:[#allocation2 + $0x188] sm:$0xff]  ;;  %v3346_v63 = vadd.f32 %v6717_v58, %v744_v49 }
 0x14a   : > { %5392 = vst.msk [vmem:[%s7803_s27 + $0x294] sm:$0xf] %vm5226_vm1, %v6317_v7  ;;  %v4116_v27 = vadd.f32 %v8060_v17, %v3853_v21  ;;  %v3986_v28 = vadd.f32 %v8060_v17, %v3723_v22  ;;  %v3851_v29 = vld [vmem:[#allocation2 + $0x540] sm:$0xff]  ;;  %v3726_v30 = vld [vmem:[#allocation2 + $0x158] sm:$0xff]  ;;  %v3216_v0 = vadd.f32 %v2337_v59, %v614_v50  ;;  %v2849_v1 = vpop.f32.mrb[49].mxu1  ;;  %v6590_v2 = vpop.f32.mrb[50].mxu0 }
 0x14b   : > { %3470 = vst.msk [vmem:[#allocation2 + $0x170] sm:$0xff] %vm309_vm0, %v3214_v8  ;;  %3598 = vst.msk [vmem:[#allocation2 + $0x570] sm:$0xff] %vm309_vm0, %v3342_v15  ;;  %v4114_v35 = vadd.f32 %v8060_v17, %v3851_v29  ;;  %v3989_v36 = vadd.f32 %v8060_v17, %v3726_v30  ;;  %v3854_v37 = vld [vmem:[#allocation2 + $0x558] sm:$0xff]  ;;  %v743_v3 = vld [vmem:[#allocation2 + $0x588] sm:$0xff]  ;;  %v3344_v7 = vadd.f32 %v2849_v1, %v742_v54  ;;  %v6718_v9 = vpop.f32.mrb[50].mxu1  ;;  %v2340_v10 = vpop.f32.mrb[51].mxu0 }
 0x14c   : > { %3468 = vst.msk [vmem:[#allocation2 + $0x160] sm:$0xff] %vm309_vm0, %v3212_v16  ;;  %v3724_v38 = vld [vmem:[#allocation2 + $0x148] sm:$0xff]  ;;  %3596 = vst.msk [vmem:[#allocation2 + $0x560] sm:$0xff] %vm309_vm0, %v3340_v23  ;;  %v6322_v40 = vpack.c.bf16 %v4116_v27, %v4116_v27  ;;  %v6192_v41 = vpack.c.bf16 %v3986_v28, %v3986_v28  ;;  %v4117_v42 = vadd.f32 %v8060_v17, %v3854_v37  ;;  %v2852_v13 = vpop.f32.mrb[51].mxu1  ;;  %v620_v30 = vld [vmem:[#allocation2 + $0x1b0] sm:$0xff] }
 0x14d   : > { %3471 = vst.msk [vmem:[#allocation2 + $0x178] sm:$0xff] %vm309_vm0, %v3215_v24  ;;  %v3987_v43 = vadd.f32 %v8060_v17, %v3724_v38  ;;  %v3852_v44 = vld [vmem:[#allocation2 + $0x548] sm:$0xff]  ;;  %3599 = vst.msk [vmem:[#allocation2 + $0x578] sm:$0xff] %vm309_vm0, %v3343_v31  ;;  %v6320_v46 = vpack.c.bf16 %v4114_v35, %v4114_v35  ;;  %v6195_v47 = vpack.c.bf16 %v3989_v36, %v3989_v36  ;;  %v618_v35 = vld [vmem:[#allocation2 + $0x1a0] sm:$0xff] }
 0x14e   : > { %3469 = vst.msk [vmem:[#allocation2 + $0x168] sm:$0xff] %vm309_vm0, %v3213_v32  ;;  %v4115_v48 = vadd.f32 %v8060_v17, %v3852_v44  ;;  %3597 = vst.msk [vmem:[#allocation2 + $0x568] sm:$0xff] %vm309_vm0, %v3341_v39  ;;  %v6323_v51 = vpack.c.bf16 %v4117_v42, %v4117_v42  ;;  %v3219_v8 = vadd.f32 %v6590_v2, %v617_v55  ;;  %v6593_v38 = vpop.f32.mrb[52].mxu0  ;;  %v746_v39 = vld [vmem:[#allocation2 + $0x5a0] sm:$0xff]  ;;  %v749_v45 = vld [vmem:[#allocation2 + $0x5b8] sm:$0xff] }
 0x14f   : > { %5269 = vst.msk [vmem:[%s7803_s27 + $0xa8] sm:$0xf] %vm5226_vm1, %v6194_v34  ;;  %5397 = vst.msk [vmem:[%s7803_s27 + $0x2a8] sm:$0xf] %vm5226_vm1, %v6322_v40  ;;  %v6193_v52 = vpack.c.bf16 %v3987_v43, %v3987_v43  ;;  %v3347_v16 = vadd.f32 %v6718_v9, %v745_v60  ;;  %v3217_v18 = vadd.f32 %v2340_v10, %v615_v61  ;;  %v748_v34 = vld [vmem:[#allocation2 + $0x5b0] sm:$0xff]  ;;  %v621_v40 = vld [vmem:[#allocation2 + $0x1b8] sm:$0xff] }
 0x150   : > { %5267 = vst.msk [vmem:[%s7803_s27 + $0xa0] sm:$0xf] %vm5226_vm1, %v6192_v41  ;;  %5395 = vst.msk [vmem:[%s7803_s27 + $0x2a0] sm:$0xf] %vm5226_vm1, %v6320_v46  ;;  %v6321_v56 = vpack.c.bf16 %v4115_v48, %v4115_v48  ;;  %v3345_v24 = vadd.f32 %v2852_v13, %v743_v3  ;;  %v3222_v42 = vadd.f32 %v6593_v38, %v620_v30  ;;  %v6721_v43 = vpop.f32.mrb[52].mxu1  ;;  %v2353_v44 = vpop.f32.mrb[53].mxu0 }
 0x151   : > { %5270 = vst.msk [vmem:[%s7803_s27 + $0xac] sm:$0xf] %vm5226_vm1, %v6195_v47  ;;  %5398 = vst.msk [vmem:[%s7803_s27 + $0x2ac] sm:$0xf] %vm5226_vm1, %v6323_v51  ;;  %v619_v46 = vld [vmem:[#allocation2 + $0x1a8] sm:$0xff]  ;;  %v3350_v48 = vadd.f32 %v6721_v43, %v748_v34  ;;  %v3220_v49 = vadd.f32 %v2353_v44, %v618_v35  ;;  %v2865_v50 = vpop.f32.mrb[53].mxu1 }
 0x152   : > { %5268 = vst.msk [vmem:[%s7803_s27 + $0xa4] sm:$0xf] %vm5226_vm1, %v6193_v52  ;;  %v3729_v62 = vld [vmem:[#allocation2 + $0x170] sm:$0xff]  ;;  %5396 = vst.msk [vmem:[%s7803_s27 + $0x2a4] sm:$0xf] %vm5226_vm1, %v6321_v56  ;;  %v6594_v51 = vpop.f32.mrb[54].mxu0  ;;  %v3348_v56 = vadd.f32 %v2865_v50, %v746_v39 }
 0x153   : > { %v3992_v4 = vadd.f32 %v8060_v17, %v3729_v62  ;;  %v3857_v5 = vld [vmem:[#allocation2 + $0x570] sm:$0xff]  ;;  %v3727_v6 = vld [vmem:[#allocation2 + $0x160] sm:$0xff]  ;;  %3474 = vst.msk [vmem:[#allocation2 + $0x190] sm:$0xff] %vm309_vm0, %v3218_v57  ;;  %3602 = vst.msk [vmem:[#allocation2 + $0x590] sm:$0xff] %vm309_vm0, %v3346_v63  ;;  %v3223_v57 = vadd.f32 %v6594_v51, %v621_v40  ;;  %v6722_v58 = vpop.f32.mrb[54].mxu1  ;;  %v2356_v59 = vpop.f32.mrb[55].mxu0 }
 0x154   : > { %v4120_v11 = vadd.f32 %v8060_v17, %v3857_v5  ;;  %v3990_v12 = vadd.f32 %v8060_v17, %v3727_v6  ;;  %v3855_v14 = vld [vmem:[#allocation2 + $0x560] sm:$0xff]  ;;  %v3730_v15 = vld [vmem:[#allocation2 + $0x178] sm:$0xff]  ;;  %3472 = vst.msk [vmem:[#allocation2 + $0x180] sm:$0xff] %vm309_vm0, %v3216_v0  ;;  %3600 = vst.msk [vmem:[#allocation2 + $0x580] sm:$0xff] %vm309_vm0, %v3344_v7  ;;  %v3351_v0 = vadd.f32 %v6722_v58, %v749_v45  ;;  %v2868_v2 = vpop.f32.mrb[55].mxu1 }
 0x155   : > { %v6198_v19 = vpack.c.bf16 %v3992_v4, %v3992_v4  ;;  %v4118_v20 = vadd.f32 %v8060_v17, %v3855_v14  ;;  %v3993_v21 = vadd.f32 %v8060_v17, %v3730_v15  ;;  %v3858_v22 = vld [vmem:[#allocation2 + $0x578] sm:$0xff]  ;;  %v3728_v23 = vld [vmem:[#allocation2 + $0x168] sm:$0xff]  ;;  %3475 = vst.msk [vmem:[#allocation2 + $0x198] sm:$0xff] %vm309_vm0, %v3219_v8  ;;  %3603 = vst.msk [vmem:[#allocation2 + $0x598] sm:$0xff] %vm309_vm0, %v3347_v16 }
 0x156   : > { %v6326_v25 = vpack.c.bf16 %v4120_v11, %v4120_v11  ;;  %v6196_v26 = vpack.c.bf16 %v3990_v12, %v3990_v12  ;;  %v4121_v27 = vadd.f32 %v8060_v17, %v3858_v22  ;;  %v3991_v28 = vadd.f32 %v8060_v17, %v3728_v23  ;;  %v3856_v29 = vld [vmem:[#allocation2 + $0x568] sm:$0xff]  ;;  %3473 = vst.msk [vmem:[#allocation2 + $0x188] sm:$0xff] %vm309_vm0, %v3217_v18  ;;  %v624_v15 = vld [vmem:[#allocation2 + $0x1d0] sm:$0xff]  ;;  %v6597_v23 = vpop.f32.mrb[56].mxu0  ;;  %v753_v30 = vld [vmem:[#allocation2 + $0x5d8] sm:$0xff] }
 0x157   : > { %5273 = vst.msk [vmem:[%s7803_s27 + $0xb8] sm:$0xf] %vm5226_vm1, %v6198_v19  ;;  %v6324_v31 = vpack.c.bf16 %v4118_v20, %v4118_v20  ;;  %v6199_v32 = vpack.c.bf16 %v3993_v21, %v3993_v21  ;;  %v4119_v33 = vadd.f32 %v8060_v17, %v3856_v29  ;;  %v747_v52 = vld [vmem:[#allocation2 + $0x5a8] sm:$0xff]  ;;  %v3221_v1 = vadd.f32 %v2356_v59, %v619_v46  ;;  %v752_v19 = vld [vmem:[#allocation2 + $0x5d0] sm:$0xff]  ;;  %v622_v20 = vld [vmem:[#allocation2 + $0x1c0] sm:$0xff]  ;;  %v2369_v29 = vpop.f32.mrb[57].mxu0 }
 0x158   : > { %3601 = vst.msk [vmem:[#allocation2 + $0x588] sm:$0xff] %vm309_vm0, %v3345_v24  ;;  %v6327_v36 = vpack.c.bf16 %v4121_v27, %v4121_v27  ;;  %v6197_v37 = vpack.c.bf16 %v3991_v28, %v3991_v28  ;;  %3478 = vst.msk [vmem:[#allocation2 + $0x1b0] sm:$0xff] %vm309_vm0, %v3222_v42  ;;  %v3349_v8 = vadd.f32 %v2868_v2, %v747_v52  ;;  %v750_v24 = vld [vmem:[#allocation2 + $0x5c0] sm:$0xff]  ;;  %v6725_v28 = vpop.f32.mrb[56].mxu1 }
 0x159   : > { %5401 = vst.msk [vmem:[%s7803_s27 + $0x2b8] sm:$0xf] %vm5226_vm1, %v6326_v25  ;;  %5271 = vst.msk [vmem:[%s7803_s27 + $0xb0] sm:$0xf] %vm5226_vm1, %v6196_v26  ;;  %v6325_v41 = vpack.c.bf16 %v4119_v33, %v4119_v33  ;;  %v625_v25 = vld [vmem:[#allocation2 + $0x1d8] sm:$0xff]  ;;  %v3226_v27 = vadd.f32 %v6597_v23, %v624_v15  ;;  %v3354_v33 = vadd.f32 %v6725_v28, %v752_v19  ;;  %v2881_v35 = vpop.f32.mrb[57].mxu1 }
 0x15a   : > { %5399 = vst.msk [vmem:[%s7803_s27 + $0x2b0] sm:$0xf] %vm5226_vm1, %v6324_v31  ;;  %5274 = vst.msk [vmem:[%s7803_s27 + $0xbc] sm:$0xf] %vm5226_vm1, %v6199_v32  ;;  %v3733_v47 = vld [vmem:[#allocation2 + $0x190] sm:$0xff]  ;;  %v623_v31 = vld [vmem:[#allocation2 + $0x1c8] sm:$0xff]  ;;  %v3224_v34 = vadd.f32 %v2369_v29, %v622_v20 }
 0x15b   : > { %5402 = vst.msk [vmem:[%s7803_s27 + $0x2bc] sm:$0xf] %vm5226_vm1, %v6327_v36  ;;  %5272 = vst.msk [vmem:[%s7803_s27 + $0xb4] sm:$0xf] %vm5226_vm1, %v6197_v37  ;;  %v3996_v53 = vadd.f32 %v8060_v17, %v3733_v47  ;;  %v3861_v54 = vld [vmem:[#allocation2 + $0x590] sm:$0xff]  ;;  %v3731_v55 = vld [vmem:[#allocation2 + $0x180] sm:$0xff] }
 0x15c   : > { %5400 = vst.msk [vmem:[%s7803_s27 + $0x2b4] sm:$0xf] %vm5226_vm1, %v6325_v41  ;;  %v4124_v60 = vadd.f32 %v8060_v17, %v3861_v54  ;;  %v3994_v61 = vadd.f32 %v8060_v17, %v3731_v55  ;;  %v3859_v62 = vld [vmem:[#allocation2 + $0x580] sm:$0xff]  ;;  %v3734_v63 = vld [vmem:[#allocation2 + $0x198] sm:$0xff]  ;;  %v6598_v36 = vpop.f32.mrb[58].mxu0  ;;  %v751_v37 = vld [vmem:[#allocation2 + $0x5c8] sm:$0xff]  ;;  %v3352_v41 = vadd.f32 %v2881_v35, %v750_v24 }
 0x15d   : > { %3606 = vst.msk [vmem:[#allocation2 + $0x5b0] sm:$0xff] %vm309_vm0, %v3350_v48  ;;  %3476 = vst.msk [vmem:[#allocation2 + $0x1a0] sm:$0xff] %vm309_vm0, %v3220_v49  ;;  %v6202_v3 = vpack.c.bf16 %v3996_v53, %v3996_v53  ;;  %v4122_v4 = vadd.f32 %v8060_v17, %v3859_v62  ;;  %v3997_v5 = vadd.f32 %v8060_v17, %v3734_v63  ;;  %v3862_v6 = vld [vmem:[#allocation2 + $0x598] sm:$0xff]  ;;  %v3732_v7 = vld [vmem:[#allocation2 + $0x188] sm:$0xff]  ;;  %v6726_v43 = vpop.f32.mrb[58].mxu1  ;;  %v2372_v44 = vpop.f32.mrb[59].mxu0 }
 0x15e   : > { %3604 = vst.msk [vmem:[#allocation2 + $0x5a0] sm:$0xff] %vm309_vm0, %v3348_v56  ;;  %3479 = vst.msk [vmem:[#allocation2 + $0x1b8] sm:$0xff] %vm309_vm0, %v3223_v57  ;;  %v6330_v9 = vpack.c.bf16 %v4124_v60, %v4124_v60  ;;  %v6200_v10 = vpack.c.bf16 %v3994_v61, %v3994_v61  ;;  %v4125_v11 = vadd.f32 %v8060_v17, %v3862_v6  ;;  %v2884_v51 = vpop.f32.mrb[59].mxu1  ;;  %v628_v63 = vld [vmem:[#allocation2 + $0x1f0] sm:$0xff]  ;;  %v757_v15 = vld [vmem:[#allocation2 + $0x5f8] sm:$0xff] }
 0x15f   : > { %v3995_v12 = vadd.f32 %v8060_v17, %v3732_v7  ;;  %v3860_v14 = vld [vmem:[#allocation2 + $0x588] sm:$0xff]  ;;  %3607 = vst.msk [vmem:[#allocation2 + $0x5b8] sm:$0xff] %vm309_vm0, %v3351_v0  ;;  %3477 = vst.msk [vmem:[#allocation2 + $0x1a8] sm:$0xff] %vm309_vm0, %v3221_v1  ;;  %v6328_v16 = vpack.c.bf16 %v4122_v4, %v4122_v4  ;;  %v6203_v18 = vpack.c.bf16 %v3997_v5, %v3997_v5  ;;  %v3737_v32 = vld [vmem:[#allocation2 + $0x1b0] sm:$0xff]  ;;  %v6601_v7 = vpop.f32.mrb[60].mxu0 }
 0x160   : > { %5277 = vst.msk [vmem:[%s7803_s27 + $0xc8] sm:$0xf] %vm5226_vm1, %v6202_v3  ;;  %v4123_v13 = vadd.f32 %v8060_v17, %v3860_v14  ;;  %5405 = vst.msk [vmem:[%s7803_s27 + $0x2c8] sm:$0xf] %vm5226_vm1, %v6330_v9  ;;  %v6331_v21 = vpack.c.bf16 %v4125_v11, %v4125_v11  ;;  %v4000_v38 = vadd.f32 %v8060_v17, %v3737_v32  ;;  %v756_v3 = vld [vmem:[#allocation2 + $0x5f0] sm:$0xff]  ;;  %v626_v4 = vld [vmem:[#allocation2 + $0x1e0] sm:$0xff] }
 0x161   : > { %3605 = vst.msk [vmem:[#allocation2 + $0x5a8] sm:$0xff] %vm309_vm0, %v3349_v8  ;;  %v6201_v22 = vpack.c.bf16 %v3995_v12, %v3995_v12  ;;  %3482 = vst.msk [vmem:[#allocation2 + $0x1d0] sm:$0xff] %vm309_vm0, %v3226_v27  ;;  %v3227_v42 = vadd.f32 %v6598_v36, %v625_v25  ;;  %v3355_v49 = vadd.f32 %v6726_v43, %v753_v30  ;;  %v754_v8 = vld [vmem:[#allocation2 + $0x5e0] sm:$0xff]  ;;  %v629_v9 = vld [vmem:[#allocation2 + $0x1f8] sm:$0xff]  ;;  %v6729_v12 = vpop.f32.mrb[60].mxu1  ;;  %v2385_v14 = vpop.f32.mrb[61].mxu0 }
 0x162   : > { %5275 = vst.msk [vmem:[%s7803_s27 + $0xc0] sm:$0xf] %vm5226_vm1, %v6200_v10  ;;  %5403 = vst.msk [vmem:[%s7803_s27 + $0x2c0] sm:$0xf] %vm5226_vm1, %v6328_v16  ;;  %v6329_v26 = vpack.c.bf16 %v4123_v13, %v4123_v13  ;;  %v3225_v50 = vadd.f32 %v2372_v44, %v623_v31  ;;  %v6206_v52 = vpack.c.bf16 %v4000_v38, %v4000_v38  ;;  %v627_v16 = vld [vmem:[#allocation2 + $0x1e8] sm:$0xff]  ;;  %v2897_v20 = vpop.f32.mrb[61].mxu1 }
 0x163   : > { %5278 = vst.msk [vmem:[%s7803_s27 + $0xcc] sm:$0xf] %vm5226_vm1, %v6203_v18  ;;  %5406 = vst.msk [vmem:[%s7803_s27 + $0x2cc] sm:$0xf] %vm5226_vm1, %v6331_v21  ;;  %v3353_v57 = vadd.f32 %v2884_v51, %v751_v37  ;;  %v3230_v11 = vadd.f32 %v6601_v7, %v628_v63  ;;  %v3358_v13 = vadd.f32 %v6729_v12, %v756_v3  ;;  %v6602_v21 = vpop.f32.mrb[62].mxu0  ;;  %v6730_v28 = vpop.f32.mrb[62].mxu1 }
 0x164   : > { %5276 = vst.msk [vmem:[%s7803_s27 + $0xc4] sm:$0xf] %vm5226_vm1, %v6201_v22  ;;  %5404 = vst.msk [vmem:[%s7803_s27 + $0x2c4] sm:$0xf] %vm5226_vm1, %v6329_v26  ;;  %v3865_v39 = vld [vmem:[#allocation2 + $0x5b0] sm:$0xff]  ;;  %v3735_v40 = vld [vmem:[#allocation2 + $0x1a0] sm:$0xff]  ;;  %v3228_v19 = vadd.f32 %v2385_v14, %v626_v4  ;;  %v3356_v26 = vadd.f32 %v2897_v20, %v754_v8  ;;  %v3231_v27 = vadd.f32 %v6602_v21, %v629_v9 }
 0x165   : > { %v4128_v45 = vadd.f32 %v8060_v17, %v3865_v39  ;;  %v3998_v46 = vadd.f32 %v8060_v17, %v3735_v40  ;;  %v3863_v47 = vld [vmem:[#allocation2 + $0x5a0] sm:$0xff]  ;;  %v3738_v48 = vld [vmem:[#allocation2 + $0x1b8] sm:$0xff]  ;;  %3610 = vst.msk [vmem:[#allocation2 + $0x5d0] sm:$0xff] %vm309_vm0, %v3354_v33  ;;  %3480 = vst.msk [vmem:[#allocation2 + $0x1c0] sm:$0xff] %vm309_vm0, %v3224_v34  ;;  %v2388_v29 = vpop.f32.mrb[63].mxu0  ;;  %v3359_v34 = vadd.f32 %v6730_v28, %v757_v15  ;;  %v2900_v36 = vpop.f32.mrb[63].mxu1 }
 0x166   : > { %v4126_v53 = vadd.f32 %v8060_v17, %v3863_v47  ;;  %v4001_v54 = vadd.f32 %v8060_v17, %v3738_v48  ;;  %v3866_v55 = vld [vmem:[#allocation2 + $0x5b8] sm:$0xff]  ;;  %v3736_v56 = vld [vmem:[#allocation2 + $0x1a8] sm:$0xff]  ;;  %3608 = vst.msk [vmem:[#allocation2 + $0x5c0] sm:$0xff] %vm309_vm0, %v3352_v41  ;;  %3483 = vst.msk [vmem:[#allocation2 + $0x1d8] sm:$0xff] %vm309_vm0, %v3227_v42  ;;  %v3229_v35 = vadd.f32 %v2388_v29, %v627_v16 }
 0x167   : > { %v6334_v58 = vpack.c.bf16 %v4128_v45, %v4128_v45  ;;  %v6204_v59 = vpack.c.bf16 %v3998_v46, %v3998_v46  ;;  %v4129_v60 = vadd.f32 %v8060_v17, %v3866_v55  ;;  %v3999_v61 = vadd.f32 %v8060_v17, %v3736_v56  ;;  %3611 = vst.msk [vmem:[#allocation2 + $0x5d8] sm:$0xff] %vm309_vm0, %v3355_v49  ;;  %v755_v22 = vld [vmem:[#allocation2 + $0x5e8] sm:$0xff]  ;;  %v632_v48 = vld [vmem:[#allocation2 + $0x210] sm:$0xff]  ;;  %v6605_v56 = vpop.f32.mrb[64].mxu0  ;;  %v761_v63 = vld [vmem:[#allocation2 + $0x618] sm:$0xff] }
 0x168   : > { %v3864_v62 = vld [vmem:[#allocation2 + $0x5a8] sm:$0xff]  ;;  %3481 = vst.msk [vmem:[#allocation2 + $0x1c8] sm:$0xff] %vm309_vm0, %v3225_v50  ;;  %v6332_v0 = vpack.c.bf16 %v4126_v53, %v4126_v53  ;;  %v6207_v1 = vpack.c.bf16 %v4001_v54, %v4001_v54  ;;  %3609 = vst.msk [vmem:[#allocation2 + $0x5c8] sm:$0xff] %vm309_vm0, %v3353_v57  ;;  %v3741_v18 = vld [vmem:[#allocation2 + $0x1d0] sm:$0xff]  ;;  %v3357_v42 = vadd.f32 %v2900_v36, %v755_v22 }
 0x169   : > { %5281 = vst.msk [vmem:[%s7803_s27 + $0xd8] sm:$0xf] %vm5226_vm1, %v6206_v52  ;;  %v4127_v2 = vadd.f32 %v8060_v17, %v3864_v62  ;;  %5409 = vst.msk [vmem:[%s7803_s27 + $0x2d8] sm:$0xf] %vm5226_vm1, %v6334_v58  ;;  %v6335_v5 = vpack.c.bf16 %v4129_v60, %v4129_v60  ;;  %v6205_v6 = vpack.c.bf16 %v3999_v61, %v3999_v61  ;;  %v760_v52 = vld [vmem:[#allocation2 + $0x610] sm:$0xff]  ;;  %v630_v53 = vld [vmem:[#allocation2 + $0x200] sm:$0xff] }
 0x16a   : > { %5279 = vst.msk [vmem:[%s7803_s27 + $0xd0] sm:$0xf] %vm5226_vm1, %v6204_v59  ;;  %5407 = vst.msk [vmem:[%s7803_s27 + $0x2d0] sm:$0xf] %vm5226_vm1, %v6332_v0  ;;  %v4004_v23 = vadd.f32 %v8060_v17, %v3741_v18  ;;  %v758_v57 = vld [vmem:[#allocation2 + $0x600] sm:$0xff]  ;;  %v633_v58 = vld [vmem:[#allocation2 + $0x218] sm:$0xff]  ;;  %v3234_v60 = vadd.f32 %v6605_v56, %v632_v48 }
 0x16b   : > { %5282 = vst.msk [vmem:[%s7803_s27 + $0xdc] sm:$0xf] %vm5226_vm1, %v6207_v1  ;;  %v6333_v10 = vpack.c.bf16 %v4127_v2, %v4127_v2  ;;  %5410 = vst.msk [vmem:[%s7803_s27 + $0x2dc] sm:$0xf] %vm5226_vm1, %v6335_v5  ;;  %v6733_v61 = vpop.f32.mrb[64].mxu1  ;;  %v2401_v62 = vpop.f32.mrb[65].mxu0 }
 0x16c   : > { %5280 = vst.msk [vmem:[%s7803_s27 + $0xd4] sm:$0xf] %vm5226_vm1, %v6205_v6  ;;  %v3869_v24 = vld [vmem:[#allocation2 + $0x5d0] sm:$0xff]  ;;  %v3739_v25 = vld [vmem:[#allocation2 + $0x1c0] sm:$0xff]  ;;  %v6210_v37 = vpack.c.bf16 %v4004_v23, %v4004_v23  ;;  %v631_v0 = vld [vmem:[#allocation2 + $0x208] sm:$0xff]  ;;  %v3362_v2 = vadd.f32 %v6733_v61, %v760_v52  ;;  %v3232_v3 = vadd.f32 %v2401_v62, %v630_v53  ;;  %v2913_v4 = vpop.f32.mrb[65].mxu1 }
 0x16d   : > { %5408 = vst.msk [vmem:[%s7803_s27 + $0x2d4] sm:$0xf] %vm5226_vm1, %v6333_v10  ;;  %v4132_v30 = vadd.f32 %v8060_v17, %v3869_v24  ;;  %v4002_v31 = vadd.f32 %v8060_v17, %v3739_v25  ;;  %v3867_v32 = vld [vmem:[#allocation2 + $0x5c0] sm:$0xff]  ;;  %v3742_v33 = vld [vmem:[#allocation2 + $0x1d8] sm:$0xff]  ;;  %v6606_v5 = vpop.f32.mrb[66].mxu0  ;;  %v759_v6 = vld [vmem:[#allocation2 + $0x608] sm:$0xff]  ;;  %v3360_v10 = vadd.f32 %v2913_v4, %v758_v57 }
 0x16e   : > { %3486 = vst.msk [vmem:[#allocation2 + $0x1f0] sm:$0xff] %vm309_vm0, %v3230_v11  ;;  %3614 = vst.msk [vmem:[#allocation2 + $0x5f0] sm:$0xff] %vm309_vm0, %v3358_v13  ;;  %v4130_v38 = vadd.f32 %v8060_v17, %v3867_v32  ;;  %v4005_v39 = vadd.f32 %v8060_v17, %v3742_v33  ;;  %v3870_v40 = vld [vmem:[#allocation2 + $0x5d8] sm:$0xff]  ;;  %v3235_v11 = vadd.f32 %v6606_v5, %v633_v58  ;;  %v6734_v12 = vpop.f32.mrb[66].mxu1  ;;  %v2404_v14 = vpop.f32.mrb[67].mxu0  ;;  %v636_v33 = vld [vmem:[#allocation2 + $0x230] sm:$0xff] }
 0x16f   : > { %3484 = vst.msk [vmem:[#allocation2 + $0x1e0] sm:$0xff] %vm309_vm0, %v3228_v19  ;;  %v3740_v41 = vld [vmem:[#allocation2 + $0x1c8] sm:$0xff]  ;;  %3612 = vst.msk [vmem:[#allocation2 + $0x5e0] sm:$0xff] %vm309_vm0, %v3356_v26  ;;  %v6338_v43 = vpack.c.bf16 %v4132_v30, %v4132_v30  ;;  %v6208_v44 = vpack.c.bf16 %v4002_v31, %v4002_v31  ;;  %v4133_v45 = vadd.f32 %v8060_v17, %v3870_v40  ;;  %v2916_v21 = vpop.f32.mrb[67].mxu1  ;;  %v8321_v23 = vld [vmem:[%s8869_s2] ss:$0 sm:$0xff] }
 0x170   : > { %3487 = vst.msk [vmem:[#allocation2 + $0x1f8] sm:$0xff] %vm309_vm0, %v3231_v27  ;;  %v4003_v46 = vadd.f32 %v8060_v17, %v3740_v41  ;;  %v3868_v47 = vld [vmem:[#allocation2 + $0x5c8] sm:$0xff]  ;;  %3615 = vst.msk [vmem:[#allocation2 + $0x5f8] sm:$0xff] %vm309_vm0, %v3359_v34  ;;  %v6336_v49 = vpack.c.bf16 %v4130_v38, %v4130_v38  ;;  %v6211_v50 = vpack.c.bf16 %v4005_v39, %v4005_v39  ;;  %v634_v38 = vld [vmem:[#allocation2 + $0x220] sm:$0xff]  ;;  %v6609_v41 = vpop.f32.mrb[68].mxu0 }
 0x171   : > { %3485 = vst.msk [vmem:[#allocation2 + $0x1e8] sm:$0xff] %vm309_vm0, %v3229_v35  ;;  %v4131_v51 = vadd.f32 %v8060_v17, %v3868_v47  ;;  %3613 = vst.msk [vmem:[#allocation2 + $0x5e8] sm:$0xff] %vm309_vm0, %v3357_v42  ;;  %v6339_v54 = vpack.c.bf16 %v4133_v45, %v4133_v45  ;;  %v3363_v19 = vadd.f32 %v6734_v12, %v761_v63  ;;  %v762_v42 = vld [vmem:[#allocation2 + $0x620] sm:$0xff]  ;;  %v2417_v47 = vpop.f32.mrb[69].mxu0  ;;  %v765_v48 = vld [vmem:[#allocation2 + $0x638] sm:$0xff] }
 0x172   : > { %5285 = vst.msk [vmem:[%s7803_s27 + $0xe8] sm:$0xf] %vm5226_vm1, %v6210_v37  ;;  %5413 = vst.msk [vmem:[%s7803_s27 + $0x2e8] sm:$0xf] %vm5226_vm1, %v6338_v43  ;;  %v6209_v55 = vpack.c.bf16 %v4003_v46, %v4003_v46  ;;  %v3233_v20 = vadd.f32 %v2404_v14, %v631_v0  ;;  %v3361_v27 = vadd.f32 %v2916_v21, %v759_v6  ;;  %v764_v37 = vld [vmem:[#allocation2 + $0x630] sm:$0xff]  ;;  %v637_v43 = vld [vmem:[#allocation2 + $0x238] sm:$0xff] }
 0x173   : > { %5283 = vst.msk [vmem:[%s7803_s27 + $0xe0] sm:$0xf] %vm5226_vm1, %v6208_v44  ;;  %5411 = vst.msk [vmem:[%s7803_s27 + $0x2e0] sm:$0xf] %vm5226_vm1, %v6336_v49  ;;  %v6337_v59 = vpack.c.bf16 %v4131_v51, %v4131_v51  ;;  %v3238_v45 = vadd.f32 %v6609_v41, %v636_v33  ;;  %v6737_v46 = vpop.f32.mrb[68].mxu1  ;;  %v635_v49 = vld [vmem:[#allocation2 + $0x228] sm:$0xff]  ;;  %v3236_v52 = vadd.f32 %v2417_v47, %v634_v38 }
 0x174   : > { %5286 = vst.msk [vmem:[%s7803_s27 + $0xec] sm:$0xf] %vm5226_vm1, %v6211_v50  ;;  %5414 = vst.msk [vmem:[%s7803_s27 + $0x2ec] sm:$0xf] %vm5226_vm1, %v6339_v54  ;;  %v3366_v51 = vadd.f32 %v6737_v46, %v764_v37  ;;  %v2929_v53 = vpop.f32.mrb[69].mxu1  ;;  %v6610_v54 = vpop.f32.mrb[70].mxu0 }
 0x175   : > { %5284 = vst.msk [vmem:[%s7803_s27 + $0xe4] sm:$0xf] %vm5226_vm1, %v6209_v55  ;;  %v3745_v1 = vld [vmem:[#allocation2 + $0x1f0] sm:$0xff]  ;;  %5412 = vst.msk [vmem:[%s7803_s27 + $0x2e4] sm:$0xf] %vm5226_vm1, %v6337_v59  ;;  %v763_v55 = vld [vmem:[#allocation2 + $0x628] sm:$0xff]  ;;  %v3364_v59 = vadd.f32 %v2929_v53, %v762_v42 }
 0x176   : > { %v4008_v7 = vadd.f32 %v8060_v17, %v3745_v1  ;;  %v3873_v8 = vld [vmem:[#allocation2 + $0x5f0] sm:$0xff]  ;;  %v3743_v9 = vld [vmem:[#allocation2 + $0x1e0] sm:$0xff]  ;;  %3490 = vst.msk [vmem:[#allocation2 + $0x210] sm:$0xff] %vm309_vm0, %v3234_v60  ;;  %3618 = vst.msk [vmem:[#allocation2 + $0x610] sm:$0xff] %vm309_vm0, %v3362_v2  ;;  %v3239_v60 = vadd.f32 %v6610_v54, %v637_v43  ;;  %v6738_v61 = vpop.f32.mrb[70].mxu1  ;;  %v2420_v62 = vpop.f32.mrb[71].mxu0 }
 0x177   : > { %v4136_v15 = vadd.f32 %v8060_v17, %v3873_v8  ;;  %v4006_v16 = vadd.f32 %v8060_v17, %v3743_v9  ;;  %v3871_v18 = vld [vmem:[#allocation2 + $0x5e0] sm:$0xff]  ;;  %v3746_v13 = vld [vmem:[#allocation2 + $0x1f8] sm:$0xff]  ;;  %3488 = vst.msk [vmem:[#allocation2 + $0x200] sm:$0xff] %vm309_vm0, %v3232_v3  ;;  %3616 = vst.msk [vmem:[#allocation2 + $0x600] sm:$0xff] %vm309_vm0, %v3360_v10  ;;  %v3367_v3 = vadd.f32 %v6738_v61, %v765_v48  ;;  %v2932_v5 = vpop.f32.mrb[71].mxu1 }
 0x178   : > { %v6214_v22 = vpack.c.bf16 %v4008_v7, %v4008_v7  ;;  %v4134_v24 = vadd.f32 %v8321_v23, %v3871_v18  ;;  %v4009_v17 = vadd.f32 %v8321_v23, %v3746_v13  ;;  %v3874_v25 = vld [vmem:[#allocation2 + $0x5f8] sm:$0xff]  ;;  %v3744_v26 = vld [vmem:[#allocation2 + $0x1e8] sm:$0xff]  ;;  %3491 = vst.msk [vmem:[#allocation2 + $0x218] sm:$0xff] %vm309_vm0, %v3235_v11  ;;  %3619 = vst.msk [vmem:[#allocation2 + $0x618] sm:$0xff] %vm309_vm0, %v3363_v19 }
 0x179   : > { %v6342_v28 = vpack.c.bf16 %v4136_v15, %v4136_v15  ;;  %v6212_v29 = vpack.c.bf16 %v4006_v16, %v4006_v16  ;;  %v4137_v30 = vadd.f32 %v8321_v23, %v3874_v25  ;;  %v4007_v31 = vadd.f32 %v8321_v23, %v3744_v26  ;;  %v3872_v32 = vld [vmem:[#allocation2 + $0x5e8] sm:$0xff]  ;;  %3489 = vst.msk [vmem:[#allocation2 + $0x208] sm:$0xff] %vm309_vm0, %v3233_v20  ;;  %v640_v13 = vld [vmem:[#allocation2 + $0x250] sm:$0xff]  ;;  %v6613_v26 = vpop.f32.mrb[72].mxu0  ;;  %v769_v33 = vld [vmem:[#allocation2 + $0x658] sm:$0xff] }
 0x17a   : > { %5289 = vst.msk [vmem:[%s7803_s27 + $0xf8] sm:$0xf] %vm5226_vm1, %v6214_v22  ;;  %v6340_v34 = vpack.c.bf16 %v4134_v24, %v4134_v24  ;;  %v6215_v35 = vpack.c.bf16 %v4009_v17, %v4009_v17  ;;  %v4135_v36 = vadd.f32 %v8321_v23, %v3872_v32  ;;  %v3237_v4 = vadd.f32 %v2420_v62, %v635_v49  ;;  %v768_v22 = vld [vmem:[#allocation2 + $0x650] sm:$0xff]  ;;  %v638_v24 = vld [vmem:[#allocation2 + $0x240] sm:$0xff]  ;;  %v2433_v32 = vpop.f32.mrb[73].mxu0 }
 0x17b   : > { %3617 = vst.msk [vmem:[#allocation2 + $0x608] sm:$0xff] %vm309_vm0, %v3361_v27  ;;  %v6343_v39 = vpack.c.bf16 %v4137_v30, %v4137_v30  ;;  %v6213_v40 = vpack.c.bf16 %v4007_v31, %v4007_v31  ;;  %3494 = vst.msk [vmem:[#allocation2 + $0x230] sm:$0xff] %vm309_vm0, %v3238_v45  ;;  %v3365_v11 = vadd.f32 %v2932_v5, %v763_v55  ;;  %v766_v27 = vld [vmem:[#allocation2 + $0x640] sm:$0xff]  ;;  %v6741_v31 = vpop.f32.mrb[72].mxu1 }
 0x17c   : > { %5417 = vst.msk [vmem:[%s7803_s27 + $0x2f8] sm:$0xf] %vm5226_vm1, %v6342_v28  ;;  %5287 = vst.msk [vmem:[%s7803_s27 + $0xf0] sm:$0xf] %vm5226_vm1, %v6212_v29  ;;  %v6341_v44 = vpack.c.bf16 %v4135_v36, %v4135_v36  ;;  %v641_v28 = vld [vmem:[#allocation2 + $0x258] sm:$0xff]  ;;  %v3242_v30 = vadd.f32 %v6613_v26, %v640_v13  ;;  %v3370_v36 = vadd.f32 %v6741_v31, %v768_v22  ;;  %v2945_v38 = vpop.f32.mrb[73].mxu1 }
 0x17d   : > { %5415 = vst.msk [vmem:[%s7803_s27 + $0x2f0] sm:$0xf] %vm5226_vm1, %v6340_v34  ;;  %5290 = vst.msk [vmem:[%s7803_s27 + $0xfc] sm:$0xf] %vm5226_vm1, %v6215_v35  ;;  %v3749_v50 = vld [vmem:[#allocation2 + $0x210] sm:$0xff]  ;;  %v639_v34 = vld [vmem:[#allocation2 + $0x248] sm:$0xff]  ;;  %v3240_v37 = vadd.f32 %v2433_v32, %v638_v24 }
 0x17e   : > { %5418 = vst.msk [vmem:[%s7803_s27 + $0x2fc] sm:$0xf] %vm5226_vm1, %v6343_v39  ;;  %5288 = vst.msk [vmem:[%s7803_s27 + $0xf4] sm:$0xf] %vm5226_vm1, %v6213_v40  ;;  %v4012_v56 = vadd.f32 %v8321_v23, %v3749_v50  ;;  %v3877_v57 = vld [vmem:[#allocation2 + $0x610] sm:$0xff]  ;;  %v3747_v58 = vld [vmem:[#allocation2 + $0x200] sm:$0xff] }
 0x17f   : > { %5416 = vst.msk [vmem:[%s7803_s27 + $0x2f4] sm:$0xf] %vm5226_vm1, %v6341_v44  ;;  %v4140_v63 = vadd.f32 %v8321_v23, %v3877_v57  ;;  %v4010_v0 = vadd.f32 %v8321_v23, %v3747_v58  ;;  %v3875_v1 = vld [vmem:[#allocation2 + $0x600] sm:$0xff]  ;;  %v3750_v2 = vld [vmem:[#allocation2 + $0x218] sm:$0xff]  ;;  %v6614_v39 = vpop.f32.mrb[74].mxu0  ;;  %v767_v40 = vld [vmem:[#allocation2 + $0x648] sm:$0xff]  ;;  %v3368_v44 = vadd.f32 %v2945_v38, %v766_v27 }
 0x180   : > { %3622 = vst.msk [vmem:[#allocation2 + $0x630] sm:$0xff] %vm309_vm0, %v3366_v51  ;;  %3492 = vst.msk [vmem:[#allocation2 + $0x220] sm:$0xff] %vm309_vm0, %v3236_v52  ;;  %v6218_v6 = vpack.c.bf16 %v4012_v56, %v4012_v56  ;;  %v4138_v7 = vadd.f32 %v8321_v23, %v3875_v1  ;;  %v4013_v8 = vadd.f32 %v8321_v23, %v3750_v2  ;;  %v3878_v9 = vld [vmem:[#allocation2 + $0x618] sm:$0xff]  ;;  %v3748_v10 = vld [vmem:[#allocation2 + $0x208] sm:$0xff]  ;;  %v6742_v46 = vpop.f32.mrb[74].mxu1  ;;  %v2436_v47 = vpop.f32.mrb[75].mxu0 }
 0x181   : > { %3620 = vst.msk [vmem:[#allocation2 + $0x620] sm:$0xff] %vm309_vm0, %v3364_v59  ;;  %3495 = vst.msk [vmem:[#allocation2 + $0x238] sm:$0xff] %vm309_vm0, %v3239_v60  ;;  %v6346_v12 = vpack.c.bf16 %v4140_v63, %v4140_v63  ;;  %v6216_v14 = vpack.c.bf16 %v4010_v0, %v4010_v0  ;;  %v4141_v15 = vadd.f32 %v8321_v23, %v3878_v9  ;;  %v2948_v54 = vpop.f32.mrb[75].mxu1  ;;  %v644_v2 = vld [vmem:[#allocation2 + $0x270] sm:$0xff]  ;;  %v773_v13 = vld [vmem:[#allocation2 + $0x678] sm:$0xff] }
 0x182   : > { %v4011_v16 = vadd.f32 %v8321_v23, %v3748_v10  ;;  %v3876_v18 = vld [vmem:[#allocation2 + $0x608] sm:$0xff]  ;;  %3623 = vst.msk [vmem:[#allocation2 + $0x638] sm:$0xff] %vm309_vm0, %v3367_v3  ;;  %3493 = vst.msk [vmem:[#allocation2 + $0x228] sm:$0xff] %vm309_vm0, %v3237_v4  ;;  %v6344_v19 = vpack.c.bf16 %v4138_v7, %v4138_v7  ;;  %v6219_v20 = vpack.c.bf16 %v4013_v8, %v4013_v8  ;;  %v3753_v35 = vld [vmem:[#allocation2 + $0x230] sm:$0xff]  ;;  %v6617_v10 = vpop.f32.mrb[76].mxu0 }
 0x183   : > { %5293 = vst.msk [vmem:[%s7803_s27 + $0x108] sm:$0xf] %vm5226_vm1, %v6218_v6  ;;  %v4139_v21 = vadd.f32 %v8321_v23, %v3876_v18  ;;  %5421 = vst.msk [vmem:[%s7803_s27 + $0x308] sm:$0xf] %vm5226_vm1, %v6346_v12  ;;  %v6347_v17 = vpack.c.bf16 %v4141_v15, %v4141_v15  ;;  %v4016_v41 = vadd.f32 %v8321_v23, %v3753_v35  ;;  %v772_v6 = vld [vmem:[#allocation2 + $0x670] sm:$0xff]  ;;  %v642_v7 = vld [vmem:[#allocation2 + $0x260] sm:$0xff] }
 0x184   : > { %3621 = vst.msk [vmem:[#allocation2 + $0x628] sm:$0xff] %vm309_vm0, %v3365_v11  ;;  %v6217_v25 = vpack.c.bf16 %v4011_v16, %v4011_v16  ;;  %3498 = vst.msk [vmem:[#allocation2 + $0x250] sm:$0xff] %vm309_vm0, %v3242_v30  ;;  %v3243_v45 = vadd.f32 %v6614_v39, %v641_v28  ;;  %v3371_v52 = vadd.f32 %v6742_v46, %v769_v33  ;;  %v770_v11 = vld [vmem:[#allocation2 + $0x660] sm:$0xff]  ;;  %v645_v12 = vld [vmem:[#allocation2 + $0x278] sm:$0xff]  ;;  %v6745_v16 = vpop.f32.mrb[76].mxu1  ;;  %v2449_v18 = vpop.f32.mrb[77].mxu0 }
 0x185   : > { %5291 = vst.msk [vmem:[%s7803_s27 + $0x100] sm:$0xf] %vm5226_vm1, %v6216_v14  ;;  %5419 = vst.msk [vmem:[%s7803_s27 + $0x300] sm:$0xf] %vm5226_vm1, %v6344_v19  ;;  %v6345_v29 = vpack.c.bf16 %v4139_v21, %v4139_v21  ;;  %v3241_v53 = vadd.f32 %v2436_v47, %v639_v34  ;;  %v6222_v55 = vpack.c.bf16 %v4016_v41, %v4016_v41  ;;  %v643_v19 = vld [vmem:[#allocation2 + $0x268] sm:$0xff]  ;;  %v2961_v24 = vpop.f32.mrb[77].mxu1 }
 0x186   : > { %5294 = vst.msk [vmem:[%s7803_s27 + $0x10c] sm:$0xf] %vm5226_vm1, %v6219_v20  ;;  %5422 = vst.msk [vmem:[%s7803_s27 + $0x30c] sm:$0xf] %vm5226_vm1, %v6347_v17  ;;  %v3369_v60 = vadd.f32 %v2948_v54, %v767_v40  ;;  %v3246_v15 = vadd.f32 %v6617_v10, %v644_v2  ;;  %v3374_v21 = vadd.f32 %v6745_v16, %v772_v6  ;;  %v6618_v17 = vpop.f32.mrb[78].mxu0  ;;  %v6746_v31 = vpop.f32.mrb[78].mxu1 }
 0x187   : > { %5292 = vst.msk [vmem:[%s7803_s27 + $0x104] sm:$0xf] %vm5226_vm1, %v6217_v25  ;;  %5420 = vst.msk [vmem:[%s7803_s27 + $0x304] sm:$0xf] %vm5226_vm1, %v6345_v29  ;;  %v3881_v42 = vld [vmem:[#allocation2 + $0x630] sm:$0xff]  ;;  %v3751_v43 = vld [vmem:[#allocation2 + $0x220] sm:$0xff]  ;;  %v3244_v22 = vadd.f32 %v2449_v18, %v642_v7  ;;  %v3372_v29 = vadd.f32 %v2961_v24, %v770_v11  ;;  %v3247_v30 = vadd.f32 %v6618_v17, %v645_v12 }
 0x188   : > { %v4144_v48 = vadd.f32 %v8321_v23, %v3881_v42  ;;  %v4014_v49 = vadd.f32 %v8321_v23, %v3751_v43  ;;  %v3879_v50 = vld [vmem:[#allocation2 + $0x620] sm:$0xff]  ;;  %v3754_v51 = vld [vmem:[#allocation2 + $0x238] sm:$0xff]  ;;  %3626 = vst.msk [vmem:[#allocation2 + $0x650] sm:$0xff] %vm309_vm0, %v3370_v36  ;;  %3496 = vst.msk [vmem:[#allocation2 + $0x240] sm:$0xff] %vm309_vm0, %v3240_v37  ;;  %v2452_v32 = vpop.f32.mrb[79].mxu0  ;;  %v3375_v37 = vadd.f32 %v6746_v31, %v773_v13  ;;  %v2964_v39 = vpop.f32.mrb[79].mxu1 }
 0x189   : > { %v4142_v56 = vadd.f32 %v8321_v23, %v3879_v50  ;;  %v4017_v57 = vadd.f32 %v8321_v23, %v3754_v51  ;;  %v3882_v58 = vld [vmem:[#allocation2 + $0x638] sm:$0xff]  ;;  %v3752_v59 = vld [vmem:[#allocation2 + $0x228] sm:$0xff]  ;;  %3624 = vst.msk [vmem:[#allocation2 + $0x640] sm:$0xff] %vm309_vm0, %v3368_v44  ;;  %3499 = vst.msk [vmem:[#allocation2 + $0x258] sm:$0xff] %vm309_vm0, %v3243_v45  ;;  %v3245_v38 = vadd.f32 %v2452_v32, %v643_v19 }
 0x18a   : > { %v6350_v61 = vpack.c.bf16 %v4144_v48, %v4144_v48  ;;  %v6220_v62 = vpack.c.bf16 %v4014_v49, %v4014_v49  ;;  %v4145_v63 = vadd.f32 %v8321_v23, %v3882_v58  ;;  %v4015_v0 = vadd.f32 %v8321_v23, %v3752_v59  ;;  %3627 = vst.msk [vmem:[#allocation2 + $0x658] sm:$0xff] %vm309_vm0, %v3371_v52  ;;  %v771_v25 = vld [vmem:[#allocation2 + $0x668] sm:$0xff]  ;;  %v648_v51 = vld [vmem:[#allocation2 + $0x290] sm:$0xff]  ;;  %v6621_v59 = vpop.f32.mrb[80].mxu0  ;;  %v777_v2 = vld [vmem:[#allocation2 + $0x698] sm:$0xff] }
 0x18b   : > { %v3880_v1 = vld [vmem:[#allocation2 + $0x628] sm:$0xff]  ;;  %3497 = vst.msk [vmem:[#allocation2 + $0x248] sm:$0xff] %vm309_vm0, %v3241_v53  ;;  %v6348_v3 = vpack.c.bf16 %v4142_v56, %v4142_v56  ;;  %v6223_v4 = vpack.c.bf16 %v4017_v57, %v4017_v57  ;;  %3625 = vst.msk [vmem:[#allocation2 + $0x648] sm:$0xff] %vm309_vm0, %v3369_v60  ;;  %v3757_v20 = vld [vmem:[#allocation2 + $0x250] sm:$0xff]  ;;  %v3373_v45 = vadd.f32 %v2964_v39, %v771_v25 }
 0x18c   : > { %5297 = vst.msk [vmem:[%s7803_s27 + $0x118] sm:$0xf] %vm5226_vm1, %v6222_v55  ;;  %v4143_v5 = vadd.f32 %v8321_v23, %v3880_v1  ;;  %5425 = vst.msk [vmem:[%s7803_s27 + $0x318] sm:$0xf] %vm5226_vm1, %v6350_v61  ;;  %v6351_v8 = vpack.c.bf16 %v4145_v63, %v4145_v63  ;;  %v6221_v9 = vpack.c.bf16 %v4015_v0, %v4015_v0  ;;  %v776_v55 = vld [vmem:[#allocation2 + $0x690] sm:$0xff]  ;;  %v646_v56 = vld [vmem:[#allocation2 + $0x280] sm:$0xff] }
 0x18d   : > { %5295 = vst.msk [vmem:[%s7803_s27 + $0x110] sm:$0xf] %vm5226_vm1, %v6220_v62  ;;  %5423 = vst.msk [vmem:[%s7803_s27 + $0x310] sm:$0xf] %vm5226_vm1, %v6348_v3  ;;  %v4020_v26 = vadd.f32 %v8321_v23, %v3757_v20  ;;  %v774_v60 = vld [vmem:[#allocation2 + $0x680] sm:$0xff]  ;;  %v649_v61 = vld [vmem:[#allocation2 + $0x298] sm:$0xff]  ;;  %v3250_v63 = vadd.f32 %v6621_v59, %v648_v51 }
 0x18e   : > { %5298 = vst.msk [vmem:[%s7803_s27 + $0x11c] sm:$0xf] %vm5226_vm1, %v6223_v4  ;;  %v6349_v14 = vpack.c.bf16 %v4143_v5, %v4143_v5  ;;  %5426 = vst.msk [vmem:[%s7803_s27 + $0x31c] sm:$0xf] %vm5226_vm1, %v6351_v8  ;;  %v6749_v0 = vpop.f32.mrb[80].mxu1  ;;  %v2465_v1 = vpop.f32.mrb[81].mxu0 }
 0x18f   : > { %5296 = vst.msk [vmem:[%s7803_s27 + $0x114] sm:$0xf] %vm5226_vm1, %v6221_v9  ;;  %v3885_v27 = vld [vmem:[#allocation2 + $0x650] sm:$0xff]  ;;  %v3755_v28 = vld [vmem:[#allocation2 + $0x240] sm:$0xff]  ;;  %v6226_v40 = vpack.c.bf16 %v4020_v26, %v4020_v26  ;;  %v647_v3 = vld [vmem:[#allocation2 + $0x288] sm:$0xff]  ;;  %v3378_v5 = vadd.f32 %v6749_v0, %v776_v55  ;;  %v3248_v6 = vadd.f32 %v2465_v1, %v646_v56  ;;  %v2977_v7 = vpop.f32.mrb[81].mxu1 }
 0x190   : > { %5424 = vst.msk [vmem:[%s7803_s27 + $0x314] sm:$0xf] %vm5226_vm1, %v6349_v14  ;;  %v4148_v33 = vadd.f32 %v8321_v23, %v3885_v27  ;;  %v4018_v34 = vadd.f32 %v8321_v23, %v3755_v28  ;;  %v3883_v35 = vld [vmem:[#allocation2 + $0x640] sm:$0xff]  ;;  %v3758_v36 = vld [vmem:[#allocation2 + $0x258] sm:$0xff]  ;;  %v6622_v8 = vpop.f32.mrb[82].mxu0  ;;  %v775_v9 = vld [vmem:[#allocation2 + $0x688] sm:$0xff]  ;;  %v3376_v14 = vadd.f32 %v2977_v7, %v774_v60 }
 0x191   : > { %3502 = vst.msk [vmem:[#allocation2 + $0x270] sm:$0xff] %vm309_vm0, %v3246_v15  ;;  %3630 = vst.msk [vmem:[#allocation2 + $0x670] sm:$0xff] %vm309_vm0, %v3374_v21  ;;  %v4146_v41 = vadd.f32 %v8321_v23, %v3883_v35  ;;  %v4021_v42 = vadd.f32 %v8321_v23, %v3758_v36  ;;  %v3886_v43 = vld [vmem:[#allocation2 + $0x658] sm:$0xff]  ;;  %v3251_v15 = vadd.f32 %v6622_v8, %v649_v61  ;;  %v6750_v16 = vpop.f32.mrb[82].mxu1  ;;  %v2468_v18 = vpop.f32.mrb[83].mxu0  ;;  %v652_v36 = vld [vmem:[#allocation2 + $0x2b0] sm:$0xff] }
 0x192   : > { %3500 = vst.msk [vmem:[#allocation2 + $0x260] sm:$0xff] %vm309_vm0, %v3244_v22  ;;  %v3756_v44 = vld [vmem:[#allocation2 + $0x248] sm:$0xff]  ;;  %3628 = vst.msk [vmem:[#allocation2 + $0x660] sm:$0xff] %vm309_vm0, %v3372_v29  ;;  %v6354_v46 = vpack.c.bf16 %v4148_v33, %v4148_v33  ;;  %v6224_v47 = vpack.c.bf16 %v4018_v34, %v4018_v34  ;;  %v4149_v48 = vadd.f32 %v8321_v23, %v3886_v43  ;;  %v2980_v17 = vpop.f32.mrb[83].mxu1  ;;  %v781_v51 = vld [vmem:[#allocation2 + $0x6b8] sm:$0xff] }
 0x193   : > { %3503 = vst.msk [vmem:[#allocation2 + $0x278] sm:$0xff] %vm309_vm0, %v3247_v30  ;;  %v4019_v49 = vadd.f32 %v8321_v23, %v3756_v44  ;;  %v3884_v50 = vld [vmem:[#allocation2 + $0x648] sm:$0xff]  ;;  %3631 = vst.msk [vmem:[#allocation2 + $0x678] sm:$0xff] %vm309_vm0, %v3375_v37  ;;  %v6352_v52 = vpack.c.bf16 %v4146_v41, %v4146_v41  ;;  %v6227_v53 = vpack.c.bf16 %v4021_v42, %v4021_v42  ;;  %v650_v41 = vld [vmem:[#allocation2 + $0x2a0] sm:$0xff]  ;;  %v6625_v44 = vpop.f32.mrb[84].mxu0 }
 0x194   : > { %3501 = vst.msk [vmem:[#allocation2 + $0x268] sm:$0xff] %vm309_vm0, %v3245_v38  ;;  %v4147_v54 = vadd.f32 %v8321_v23, %v3884_v50  ;;  %3629 = vst.msk [vmem:[#allocation2 + $0x668] sm:$0xff] %vm309_vm0, %v3373_v45  ;;  %v6355_v57 = vpack.c.bf16 %v4149_v48, %v4149_v48  ;;  %v3379_v22 = vadd.f32 %v6750_v16, %v777_v2  ;;  %v778_v45 = vld [vmem:[#allocation2 + $0x6a0] sm:$0xff]  ;;  %v2481_v50 = vpop.f32.mrb[85].mxu0 }
 0x195   : > { %5301 = vst.msk [vmem:[%s7803_s27 + $0x128] sm:$0xf] %vm5226_vm1, %v6226_v40  ;;  %5429 = vst.msk [vmem:[%s7803_s27 + $0x328] sm:$0xf] %vm5226_vm1, %v6354_v46  ;;  %v6225_v58 = vpack.c.bf16 %v4019_v49, %v4019_v49  ;;  %v3249_v24 = vadd.f32 %v2468_v18, %v647_v3  ;;  %v3377_v30 = vadd.f32 %v2980_v17, %v775_v9  ;;  %v780_v40 = vld [vmem:[#allocation2 + $0x6b0] sm:$0xff]  ;;  %v653_v46 = vld [vmem:[#allocation2 + $0x2b8] sm:$0xff] }
 0x196   : > { %5299 = vst.msk [vmem:[%s7803_s27 + $0x120] sm:$0xf] %vm5226_vm1, %v6224_v47  ;;  %5427 = vst.msk [vmem:[%s7803_s27 + $0x320] sm:$0xf] %vm5226_vm1, %v6352_v52  ;;  %v6353_v62 = vpack.c.bf16 %v4147_v54, %v4147_v54  ;;  %v3254_v48 = vadd.f32 %v6625_v44, %v652_v36  ;;  %v6753_v49 = vpop.f32.mrb[84].mxu1  ;;  %v651_v52 = vld [vmem:[#allocation2 + $0x2a8] sm:$0xff]  ;;  %v3252_v55 = vadd.f32 %v2481_v50, %v650_v41 }
 0x197   : > { %5302 = vst.msk [vmem:[%s7803_s27 + $0x12c] sm:$0xf] %vm5226_vm1, %v6227_v53  ;;  %5430 = vst.msk [vmem:[%s7803_s27 + $0x32c] sm:$0xf] %vm5226_vm1, %v6355_v57  ;;  %v3382_v54 = vadd.f32 %v6753_v49, %v780_v40  ;;  %v2993_v56 = vpop.f32.mrb[85].mxu1  ;;  %v6626_v57 = vpop.f32.mrb[86].mxu0 }
 0x198   : > { %5300 = vst.msk [vmem:[%s7803_s27 + $0x124] sm:$0xf] %vm5226_vm1, %v6225_v58  ;;  %v3761_v4 = vld [vmem:[#allocation2 + $0x270] sm:$0xff]  ;;  %5428 = vst.msk [vmem:[%s7803_s27 + $0x324] sm:$0xf] %vm5226_vm1, %v6353_v62  ;;  %v779_v58 = vld [vmem:[#allocation2 + $0x6a8] sm:$0xff]  ;;  %v3380_v62 = vadd.f32 %v2993_v56, %v778_v45 }
 0x199   : > { %v4024_v10 = vadd.f32 %v8321_v23, %v3761_v4  ;;  %v3889_v11 = vld [vmem:[#allocation2 + $0x670] sm:$0xff]  ;;  %v3759_v12 = vld [vmem:[#allocation2 + $0x260] sm:$0xff]  ;;  %3506 = vst.msk [vmem:[#allocation2 + $0x290] sm:$0xff] %vm309_vm0, %v3250_v63  ;;  %3634 = vst.msk [vmem:[#allocation2 + $0x690] sm:$0xff] %vm309_vm0, %v3378_v5  ;;  %v3255_v63 = vadd.f32 %v6626_v57, %v653_v46  ;;  %v6754_v0 = vpop.f32.mrb[86].mxu1  ;;  %v2484_v1 = vpop.f32.mrb[87].mxu0 }
 0x19a   : > { %v4152_v13 = vadd.f32 %v8321_v23, %v3889_v11  ;;  %v4022_v19 = vadd.f32 %v8321_v23, %v3759_v12  ;;  %v3887_v20 = vld [vmem:[#allocation2 + $0x660] sm:$0xff]  ;;  %v3762_v21 = vld [vmem:[#allocation2 + $0x278] sm:$0xff]  ;;  %3504 = vst.msk [vmem:[#allocation2 + $0x280] sm:$0xff] %vm309_vm0, %v3248_v6  ;;  %3632 = vst.msk [vmem:[#allocation2 + $0x680] sm:$0xff] %vm309_vm0, %v3376_v14  ;;  %v3383_v6 = vadd.f32 %v6754_v0, %v781_v51  ;;  %v2996_v8 = vpop.f32.mrb[87].mxu1 }
 0x19b   : > { %v6230_v25 = vpack.c.bf16 %v4024_v10, %v4024_v10  ;;  %v4150_v26 = vadd.f32 %v8321_v23, %v3887_v20  ;;  %v4025_v27 = vadd.f32 %v8321_v23, %v3762_v21  ;;  %v3890_v28 = vld [vmem:[#allocation2 + $0x678] sm:$0xff]  ;;  %v3760_v29 = vld [vmem:[#allocation2 + $0x268] sm:$0xff]  ;;  %3507 = vst.msk [vmem:[#allocation2 + $0x298] sm:$0xff] %vm309_vm0, %v3251_v15  ;;  %3635 = vst.msk [vmem:[#allocation2 + $0x698] sm:$0xff] %vm309_vm0, %v3379_v22 }
 0x19c   : > { %v6358_v31 = vpack.c.bf16 %v4152_v13, %v4152_v13  ;;  %v6228_v32 = vpack.c.bf16 %v4022_v19, %v4022_v19  ;;  %v4153_v33 = vadd.f32 %v8321_v23, %v3890_v28  ;;  %v4023_v34 = vadd.f32 %v8321_v23, %v3760_v29  ;;  %v3888_v35 = vld [vmem:[#allocation2 + $0x668] sm:$0xff]  ;;  %3505 = vst.msk [vmem:[#allocation2 + $0x288] sm:$0xff] %vm309_vm0, %v3249_v24  ;;  %v656_v21 = vld [vmem:[#allocation2 + $0x2d0] sm:$0xff]  ;;  %v6629_v29 = vpop.f32.mrb[88].mxu0  ;;  %v785_v36 = vld [vmem:[#allocation2 + $0x6d8] sm:$0xff] }
 0x19d   : > { %5305 = vst.msk [vmem:[%s7803_s27 + $0x138] sm:$0xf] %vm5226_vm1, %v6230_v25  ;;  %v6356_v37 = vpack.c.bf16 %v4150_v26, %v4150_v26  ;;  %v6231_v38 = vpack.c.bf16 %v4025_v27, %v4025_v27  ;;  %v4151_v39 = vadd.f32 %v8321_v23, %v3888_v35  ;;  %v3253_v7 = vadd.f32 %v2484_v1, %v651_v52  ;;  %v784_v25 = vld [vmem:[#allocation2 + $0x6d0] sm:$0xff]  ;;  %v654_v26 = vld [vmem:[#allocation2 + $0x2c0] sm:$0xff]  ;;  %v2497_v35 = vpop.f32.mrb[89].mxu0 }
 0x19e   : > { %3633 = vst.msk [vmem:[#allocation2 + $0x688] sm:$0xff] %vm309_vm0, %v3377_v30  ;;  %v6359_v42 = vpack.c.bf16 %v4153_v33, %v4153_v33  ;;  %v6229_v43 = vpack.c.bf16 %v4023_v34, %v4023_v34  ;;  %3510 = vst.msk [vmem:[#allocation2 + $0x2b0] sm:$0xff] %vm309_vm0, %v3254_v48  ;;  %v3381_v15 = vadd.f32 %v2996_v8, %v779_v58  ;;  %v782_v30 = vld [vmem:[#allocation2 + $0x6c0] sm:$0xff]  ;;  %v6757_v34 = vpop.f32.mrb[88].mxu1 }
 0x19f   : > { %5433 = vst.msk [vmem:[%s7803_s27 + $0x338] sm:$0xf] %vm5226_vm1, %v6358_v31  ;;  %5303 = vst.msk [vmem:[%s7803_s27 + $0x130] sm:$0xf] %vm5226_vm1, %v6228_v32  ;;  %v6357_v47 = vpack.c.bf16 %v4151_v39, %v4151_v39  ;;  %v657_v31 = vld [vmem:[#allocation2 + $0x2d8] sm:$0xff]  ;;  %v3258_v33 = vadd.f32 %v6629_v29, %v656_v21  ;;  %v3386_v39 = vadd.f32 %v6757_v34, %v784_v25  ;;  %v3009_v41 = vpop.f32.mrb[89].mxu1 }
 0x1a0   : > { %5431 = vst.msk [vmem:[%s7803_s27 + $0x330] sm:$0xf] %vm5226_vm1, %v6356_v37  ;;  %5306 = vst.msk [vmem:[%s7803_s27 + $0x13c] sm:$0xf] %vm5226_vm1, %v6231_v38  ;;  %v3765_v53 = vld [vmem:[#allocation2 + $0x290] sm:$0xff]  ;;  %v655_v37 = vld [vmem:[#allocation2 + $0x2c8] sm:$0xff]  ;;  %v3256_v40 = vadd.f32 %v2497_v35, %v654_v26 }
 0x1a1   : > { %5434 = vst.msk [vmem:[%s7803_s27 + $0x33c] sm:$0xf] %vm5226_vm1, %v6359_v42  ;;  %5304 = vst.msk [vmem:[%s7803_s27 + $0x134] sm:$0xf] %vm5226_vm1, %v6229_v43  ;;  %v4028_v59 = vadd.f32 %v8321_v23, %v3765_v53  ;;  %v3893_v60 = vld [vmem:[#allocation2 + $0x690] sm:$0xff]  ;;  %v3763_v61 = vld [vmem:[#allocation2 + $0x280] sm:$0xff] }
 0x1a2   : > { %5432 = vst.msk [vmem:[%s7803_s27 + $0x334] sm:$0xf] %vm5226_vm1, %v6357_v47  ;;  %v4156_v2 = vadd.f32 %v8321_v23, %v3893_v60  ;;  %v4026_v3 = vadd.f32 %v8321_v23, %v3763_v61  ;;  %v3891_v4 = vld [vmem:[#allocation2 + $0x680] sm:$0xff]  ;;  %v3766_v5 = vld [vmem:[#allocation2 + $0x298] sm:$0xff]  ;;  %v6630_v42 = vpop.f32.mrb[90].mxu0  ;;  %v783_v43 = vld [vmem:[#allocation2 + $0x6c8] sm:$0xff]  ;;  %v3384_v47 = vadd.f32 %v3009_v41, %v782_v30 }
 0x1a3   : > { %3638 = vst.msk [vmem:[#allocation2 + $0x6b0] sm:$0xff] %vm309_vm0, %v3382_v54  ;;  %3508 = vst.msk [vmem:[#allocation2 + $0x2a0] sm:$0xff] %vm309_vm0, %v3252_v55  ;;  %v6234_v9 = vpack.c.bf16 %v4028_v59, %v4028_v59  ;;  %v4154_v10 = vadd.f32 %v8321_v23, %v3891_v4  ;;  %v4029_v11 = vadd.f32 %v8321_v23, %v3766_v5  ;;  %v3894_v12 = vld [vmem:[#allocation2 + $0x698] sm:$0xff]  ;;  %v3764_v14 = vld [vmem:[#allocation2 + $0x288] sm:$0xff]  ;;  %v6758_v49 = vpop.f32.mrb[90].mxu1  ;;  %v2500_v50 = vpop.f32.mrb[91].mxu0 }
 0x1a4   : > { %3636 = vst.msk [vmem:[#allocation2 + $0x6a0] sm:$0xff] %vm309_vm0, %v3380_v62  ;;  %3511 = vst.msk [vmem:[#allocation2 + $0x2b8] sm:$0xff] %vm309_vm0, %v3255_v63  ;;  %v6362_v16 = vpack.c.bf16 %v4156_v2, %v4156_v2  ;;  %v6232_v18 = vpack.c.bf16 %v4026_v3, %v4026_v3  ;;  %v4157_v13 = vadd.f32 %v8321_v23, %v3894_v12  ;;  %v3012_v57 = vpop.f32.mrb[91].mxu1  ;;  %v660_v5 = vld [vmem:[#allocation2 + $0x2f0] sm:$0xff]  ;;  %v789_v21 = vld [vmem:[#allocation2 + $0x6f8] sm:$0xff] }
 0x1a5   : > { %v4027_v19 = vadd.f32 %v8321_v23, %v3764_v14  ;;  %v3892_v20 = vld [vmem:[#allocation2 + $0x688] sm:$0xff]  ;;  %3639 = vst.msk [vmem:[#allocation2 + $0x6b8] sm:$0xff] %vm309_vm0, %v3383_v6  ;;  %3509 = vst.msk [vmem:[#allocation2 + $0x2a8] sm:$0xff] %vm309_vm0, %v3253_v7  ;;  %v6360_v22 = vpack.c.bf16 %v4154_v10, %v4154_v10  ;;  %v6235_v24 = vpack.c.bf16 %v4029_v11, %v4029_v11  ;;  %v3769_v38 = vld [vmem:[#allocation2 + $0x2b0] sm:$0xff]  ;;  %v6633_v14 = vpop.f32.mrb[92].mxu0 }
 0x1a6   : > { %5309 = vst.msk [vmem:[%s7803_s27 + $0x148] sm:$0xf] %vm5226_vm1, %v6234_v9  ;;  %v4155_v17 = vadd.f32 %v8321_v23, %v3892_v20  ;;  %5437 = vst.msk [vmem:[%s7803_s27 + $0x348] sm:$0xf] %vm5226_vm1, %v6362_v16  ;;  %v6363_v27 = vpack.c.bf16 %v4157_v13, %v4157_v13  ;;  %v4032_v44 = vadd.f32 %v8321_v23, %v3769_v38  ;;  %v788_v9 = vld [vmem:[#allocation2 + $0x6f0] sm:$0xff]  ;;  %v658_v10 = vld [vmem:[#allocation2 + $0x2e0] sm:$0xff] }
 0x1a7   : > { %3637 = vst.msk [vmem:[#allocation2 + $0x6a8] sm:$0xff] %vm309_vm0, %v3381_v15  ;;  %v6233_v28 = vpack.c.bf16 %v4027_v19, %v4027_v19  ;;  %3514 = vst.msk [vmem:[#allocation2 + $0x2d0] sm:$0xff] %vm309_vm0, %v3258_v33  ;;  %v3259_v48 = vadd.f32 %v6630_v42, %v657_v31  ;;  %v3387_v55 = vadd.f32 %v6758_v49, %v785_v36  ;;  %v786_v15 = vld [vmem:[#allocation2 + $0x6e0] sm:$0xff]  ;;  %v661_v16 = vld [vmem:[#allocation2 + $0x2f8] sm:$0xff]  ;;  %v6761_v19 = vpop.f32.mrb[92].mxu1  ;;  %v2513_v20 = vpop.f32.mrb[93].mxu0 }
 0x1a8   : > { %5307 = vst.msk [vmem:[%s7803_s27 + $0x140] sm:$0xf] %vm5226_vm1, %v6232_v18  ;;  %5435 = vst.msk [vmem:[%s7803_s27 + $0x340] sm:$0xf] %vm5226_vm1, %v6360_v22  ;;  %v6361_v32 = vpack.c.bf16 %v4155_v17, %v4155_v17  ;;  %v3257_v56 = vadd.f32 %v2500_v50, %v655_v37  ;;  %v6238_v58 = vpack.c.bf16 %v4032_v44, %v4032_v44  ;;  %v659_v22 = vld [vmem:[#allocation2 + $0x2e8] sm:$0xff]  ;;  %v3025_v26 = vpop.f32.mrb[93].mxu1 }
 0x1a9   : > { %5310 = vst.msk [vmem:[%s7803_s27 + $0x14c] sm:$0xf] %vm5226_vm1, %v6235_v24  ;;  %5438 = vst.msk [vmem:[%s7803_s27 + $0x34c] sm:$0xf] %vm5226_vm1, %v6363_v27  ;;  %v3385_v63 = vadd.f32 %v3012_v57, %v783_v43  ;;  %v3262_v13 = vadd.f32 %v6633_v14, %v660_v5  ;;  %v3390_v17 = vadd.f32 %v6761_v19, %v788_v9  ;;  %v6634_v27 = vpop.f32.mrb[94].mxu0  ;;  %v6762_v34 = vpop.f32.mrb[94].mxu1 }
 0x1aa   : > { %5308 = vst.msk [vmem:[%s7803_s27 + $0x144] sm:$0xf] %vm5226_vm1, %v6233_v28  ;;  %5436 = vst.msk [vmem:[%s7803_s27 + $0x344] sm:$0xf] %vm5226_vm1, %v6361_v32  ;;  %v3897_v45 = vld [vmem:[#allocation2 + $0x6b0] sm:$0xff]  ;;  %v3767_v46 = vld [vmem:[#allocation2 + $0x2a0] sm:$0xff]  ;;  %v3260_v25 = vadd.f32 %v2513_v20, %v658_v10  ;;  %v3388_v32 = vadd.f32 %v3025_v26, %v786_v15  ;;  %v3263_v33 = vadd.f32 %v6634_v27, %v661_v16 }
 0x1ab   : > { %v4160_v51 = vadd.f32 %v8321_v23, %v3897_v45  ;;  %v4030_v52 = vadd.f32 %v8321_v23, %v3767_v46  ;;  %v3895_v53 = vld [vmem:[#allocation2 + $0x6a0] sm:$0xff]  ;;  %v3770_v54 = vld [vmem:[#allocation2 + $0x2b8] sm:$0xff]  ;;  %3642 = vst.msk [vmem:[#allocation2 + $0x6d0] sm:$0xff] %vm309_vm0, %v3386_v39  ;;  %3512 = vst.msk [vmem:[#allocation2 + $0x2c0] sm:$0xff] %vm309_vm0, %v3256_v40  ;;  %v2516_v35 = vpop.f32.mrb[95].mxu0  ;;  %v3391_v40 = vadd.f32 %v6762_v34, %v789_v21  ;;  %v3028_v42 = vpop.f32.mrb[95].mxu1 }
 0x1ac   : > { %v4158_v59 = vadd.f32 %v8321_v23, %v3895_v53  ;;  %v4033_v60 = vadd.f32 %v8321_v23, %v3770_v54  ;;  %v3898_v61 = vld [vmem:[#allocation2 + $0x6b8] sm:$0xff]  ;;  %v3768_v62 = vld [vmem:[#allocation2 + $0x2a8] sm:$0xff]  ;;  %3640 = vst.msk [vmem:[#allocation2 + $0x6c0] sm:$0xff] %vm309_vm0, %v3384_v47  ;;  %3515 = vst.msk [vmem:[#allocation2 + $0x2d8] sm:$0xff] %vm309_vm0, %v3259_v48  ;;  %v3261_v41 = vadd.f32 %v2516_v35, %v659_v22 }
 0x1ad   : > { %v6366_v0 = vpack.c.bf16 %v4160_v51, %v4160_v51  ;;  %v6236_v1 = vpack.c.bf16 %v4030_v52, %v4030_v52  ;;  %v4161_v2 = vadd.f32 %v8321_v23, %v3898_v61  ;;  %v4031_v3 = vadd.f32 %v8321_v23, %v3768_v62  ;;  %3643 = vst.msk [vmem:[#allocation2 + $0x6d8] sm:$0xff] %vm309_vm0, %v3387_v55  ;;  %v787_v28 = vld [vmem:[#allocation2 + $0x6e8] sm:$0xff]  ;;  %v664_v54 = vld [vmem:[#allocation2 + $0x310] sm:$0xff]  ;;  %v6637_v62 = vpop.f32.mrb[96].mxu0  ;;  %v793_v5 = vld [vmem:[#allocation2 + $0x718] sm:$0xff] }
 0x1ae   : > { %v3896_v4 = vld [vmem:[#allocation2 + $0x6a8] sm:$0xff]  ;;  %3513 = vst.msk [vmem:[#allocation2 + $0x2c8] sm:$0xff] %vm309_vm0, %v3257_v56  ;;  %v6364_v6 = vpack.c.bf16 %v4158_v59, %v4158_v59  ;;  %v6239_v7 = vpack.c.bf16 %v4033_v60, %v4033_v60  ;;  %3641 = vst.msk [vmem:[#allocation2 + $0x6c8] sm:$0xff] %vm309_vm0, %v3385_v63  ;;  %v3773_v24 = vld [vmem:[#allocation2 + $0x2d0] sm:$0xff]  ;;  %v3389_v48 = vadd.f32 %v3028_v42, %v787_v28 }
 0x1af   : > { %5313 = vst.msk [vmem:[%s7803_s27 + $0x158] sm:$0xf] %vm5226_vm1, %v6238_v58  ;;  %v4159_v8 = vadd.f32 %v8321_v23, %v3896_v4  ;;  %5441 = vst.msk [vmem:[%s7803_s27 + $0x358] sm:$0xf] %vm5226_vm1, %v6366_v0  ;;  %v6367_v11 = vpack.c.bf16 %v4161_v2, %v4161_v2  ;;  %v6237_v12 = vpack.c.bf16 %v4031_v3, %v4031_v3  ;;  %v792_v58 = vld [vmem:[#allocation2 + $0x710] sm:$0xff]  ;;  %v662_v59 = vld [vmem:[#allocation2 + $0x300] sm:$0xff] }
 0x1b0   : > { %5311 = vst.msk [vmem:[%s7803_s27 + $0x150] sm:$0xf] %vm5226_vm1, %v6236_v1  ;;  %5439 = vst.msk [vmem:[%s7803_s27 + $0x350] sm:$0xf] %vm5226_vm1, %v6364_v6  ;;  %v4036_v29 = vadd.f32 %v8321_v23, %v3773_v24  ;;  %v790_v63 = vld [vmem:[#allocation2 + $0x700] sm:$0xff]  ;;  %v665_v0 = vld [vmem:[#allocation2 + $0x318] sm:$0xff]  ;;  %v3266_v2 = vadd.f32 %v6637_v62, %v664_v54 }
 0x1b1   : > { %5314 = vst.msk [vmem:[%s7803_s27 + $0x15c] sm:$0xf] %vm5226_vm1, %v6239_v7  ;;  %v6365_v18 = vpack.c.bf16 %v4159_v8, %v4159_v8  ;;  %5442 = vst.msk [vmem:[%s7803_s27 + $0x35c] sm:$0xf] %vm5226_vm1, %v6367_v11  ;;  %v6765_v3 = vpop.f32.mrb[96].mxu1  ;;  %v2529_v4 = vpop.f32.mrb[97].mxu0 }
 0x1b2   : > { %5312 = vst.msk [vmem:[%s7803_s27 + $0x154] sm:$0xf] %vm5226_vm1, %v6237_v12  ;;  %v3901_v30 = vld [vmem:[#allocation2 + $0x6d0] sm:$0xff]  ;;  %v3771_v31 = vld [vmem:[#allocation2 + $0x2c0] sm:$0xff]  ;;  %v6242_v43 = vpack.c.bf16 %v4036_v29, %v4036_v29  ;;  %v663_v6 = vld [vmem:[#allocation2 + $0x308] sm:$0xff]  ;;  %v3394_v8 = vadd.f32 %v6765_v3, %v792_v58  ;;  %v3264_v9 = vadd.f32 %v2529_v4, %v662_v59  ;;  %v3041_v10 = vpop.f32.mrb[97].mxu1 }
 0x1b3   : > { %5440 = vst.msk [vmem:[%s7803_s27 + $0x354] sm:$0xf] %vm5226_vm1, %v6365_v18  ;;  %v4164_v36 = vadd.f32 %v8321_v23, %v3901_v30  ;;  %v4034_v37 = vadd.f32 %v8321_v23, %v3771_v31  ;;  %v3899_v38 = vld [vmem:[#allocation2 + $0x6c0] sm:$0xff]  ;;  %v3774_v39 = vld [vmem:[#allocation2 + $0x2d8] sm:$0xff]  ;;  %v6638_v11 = vpop.f32.mrb[98].mxu0  ;;  %v791_v12 = vld [vmem:[#allocation2 + $0x708] sm:$0xff]  ;;  %v3392_v18 = vadd.f32 %v3041_v10, %v790_v63 }
 0x1b4   : > { %3518 = vst.msk [vmem:[#allocation2 + $0x2f0] sm:$0xff] %vm309_vm0, %v3262_v13  ;;  %3646 = vst.msk [vmem:[#allocation2 + $0x6f0] sm:$0xff] %vm309_vm0, %v3390_v17  ;;  %v4162_v44 = vadd.f32 %v8321_v23, %v3899_v38  ;;  %v4037_v45 = vadd.f32 %v8321_v23, %v3774_v39  ;;  %v3902_v46 = vld [vmem:[#allocation2 + $0x6d8] sm:$0xff]  ;;  %v3267_v13 = vadd.f32 %v6638_v11, %v665_v0  ;;  %v6766_v19 = vpop.f32.mrb[98].mxu1  ;;  %v2532_v20 = vpop.f32.mrb[99].mxu0  ;;  %v668_v39 = vld [vmem:[#allocation2 + $0x330] sm:$0xff] }
 0x1b5   : > { %3516 = vst.msk [vmem:[#allocation2 + $0x2e0] sm:$0xff] %vm309_vm0, %v3260_v25  ;;  %v3772_v47 = vld [vmem:[#allocation2 + $0x2c8] sm:$0xff]  ;;  %3644 = vst.msk [vmem:[#allocation2 + $0x6e0] sm:$0xff] %vm309_vm0, %v3388_v32  ;;  %v6370_v49 = vpack.c.bf16 %v4164_v36, %v4164_v36  ;;  %v6240_v50 = vpack.c.bf16 %v4034_v37, %v4034_v37  ;;  %v4165_v51 = vadd.f32 %v8321_v23, %v3902_v46  ;;  %v3044_v27 = vpop.f32.mrb[99].mxu1  ;;  %v8582_v29 = vld [vmem:[%s8869_s2] ss:$0 sm:$0xff] }
 0x1b6   : > { %3519 = vst.msk [vmem:[#allocation2 + $0x2f8] sm:$0xff] %vm309_vm0, %v3263_v33  ;;  %v4035_v52 = vadd.f32 %v8321_v23, %v3772_v47  ;;  %v3900_v53 = vld [vmem:[#allocation2 + $0x6c8] sm:$0xff]  ;;  %3647 = vst.msk [vmem:[#allocation2 + $0x6f8] sm:$0xff] %vm309_vm0, %v3391_v40  ;;  %v6368_v55 = vpack.c.bf16 %v4162_v44, %v4162_v44  ;;  %v6243_v56 = vpack.c.bf16 %v4037_v45, %v4037_v45  ;;  %v666_v44 = vld [vmem:[#allocation2 + $0x320] sm:$0xff]  ;;  %v6641_v47 = vpop.f32.mrb[100].mxu0 }
 0x1b7   : > { %3517 = vst.msk [vmem:[#allocation2 + $0x2e8] sm:$0xff] %vm309_vm0, %v3261_v41  ;;  %v4163_v57 = vadd.f32 %v8321_v23, %v3900_v53  ;;  %3645 = vst.msk [vmem:[#allocation2 + $0x6e8] sm:$0xff] %vm309_vm0, %v3389_v48  ;;  %v6371_v60 = vpack.c.bf16 %v4165_v51, %v4165_v51  ;;  %v3395_v25 = vadd.f32 %v6766_v19, %v793_v5  ;;  %v794_v48 = vld [vmem:[#allocation2 + $0x720] sm:$0xff]  ;;  %v2545_v53 = vpop.f32.mrb[101].mxu0  ;;  %v797_v54 = vld [vmem:[#allocation2 + $0x738] sm:$0xff] }
 0x1b8   : > { %5317 = vst.msk [vmem:[%s7803_s27 + $0x168] sm:$0xf] %vm5226_vm1, %v6242_v43  ;;  %5445 = vst.msk [vmem:[%s7803_s27 + $0x368] sm:$0xf] %vm5226_vm1, %v6370_v49  ;;  %v6241_v61 = vpack.c.bf16 %v4035_v52, %v4035_v52  ;;  %v3265_v26 = vadd.f32 %v2532_v20, %v663_v6  ;;  %v3393_v33 = vadd.f32 %v3044_v27, %v791_v12  ;;  %v796_v43 = vld [vmem:[#allocation2 + $0x730] sm:$0xff]  ;;  %v669_v49 = vld [vmem:[#allocation2 + $0x338] sm:$0xff] }
 0x1b9   : > { %5315 = vst.msk [vmem:[%s7803_s27 + $0x160] sm:$0xf] %vm5226_vm1, %v6240_v50  ;;  %5443 = vst.msk [vmem:[%s7803_s27 + $0x360] sm:$0xf] %vm5226_vm1, %v6368_v55  ;;  %v6369_v1 = vpack.c.bf16 %v4163_v57, %v4163_v57  ;;  %v3270_v51 = vadd.f32 %v6641_v47, %v668_v39  ;;  %v6769_v52 = vpop.f32.mrb[100].mxu1  ;;  %v667_v55 = vld [vmem:[#allocation2 + $0x328] sm:$0xff]  ;;  %v3268_v58 = vadd.f32 %v2545_v53, %v666_v44 }
 0x1ba   : > { %5318 = vst.msk [vmem:[%s7803_s27 + $0x16c] sm:$0xf] %vm5226_vm1, %v6243_v56  ;;  %5446 = vst.msk [vmem:[%s7803_s27 + $0x36c] sm:$0xf] %vm5226_vm1, %v6371_v60  ;;  %v3398_v57 = vadd.f32 %v6769_v52, %v796_v43  ;;  %v3057_v59 = vpop.f32.mrb[101].mxu1  ;;  %v6642_v60 = vpop.f32.mrb[102].mxu0 }
 0x1bb   : > { %5316 = vst.msk [vmem:[%s7803_s27 + $0x164] sm:$0xf] %vm5226_vm1, %v6241_v61  ;;  %v3777_v7 = vld [vmem:[#allocation2 + $0x2f0] sm:$0xff]  ;;  %5444 = vst.msk [vmem:[%s7803_s27 + $0x364] sm:$0xf] %vm5226_vm1, %v6369_v1  ;;  %v795_v61 = vld [vmem:[#allocation2 + $0x728] sm:$0xff]  ;;  %v3396_v1 = vadd.f32 %v3057_v59, %v794_v48 }
 0x1bc   : > { %v4040_v14 = vadd.f32 %v8321_v23, %v3777_v7  ;;  %v3905_v15 = vld [vmem:[#allocation2 + $0x6f0] sm:$0xff]  ;;  %v3775_v16 = vld [vmem:[#allocation2 + $0x2e0] sm:$0xff]  ;;  %3522 = vst.msk [vmem:[#allocation2 + $0x310] sm:$0xff] %vm309_vm0, %v3266_v2  ;;  %3650 = vst.msk [vmem:[#allocation2 + $0x710] sm:$0xff] %vm309_vm0, %v3394_v8  ;;  %v3271_v2 = vadd.f32 %v6642_v60, %v669_v49  ;;  %v6770_v3 = vpop.f32.mrb[102].mxu1  ;;  %v2548_v4 = vpop.f32.mrb[103].mxu0 }
 0x1bd   : > { %v4168_v21 = vadd.f32 %v8321_v23, %v3905_v15  ;;  %v4038_v22 = vadd.f32 %v8321_v23, %v3775_v16  ;;  %v3903_v24 = vld [vmem:[#allocation2 + $0x6e0] sm:$0xff]  ;;  %v3778_v17 = vld [vmem:[#allocation2 + $0x2f8] sm:$0xff]  ;;  %3520 = vst.msk [vmem:[#allocation2 + $0x300] sm:$0xff] %vm309_vm0, %v3264_v9  ;;  %3648 = vst.msk [vmem:[#allocation2 + $0x700] sm:$0xff] %vm309_vm0, %v3392_v18  ;;  %v3399_v9 = vadd.f32 %v6770_v3, %v797_v54  ;;  %v3060_v11 = vpop.f32.mrb[103].mxu1 }
 0x1be   : > { %v6246_v28 = vpack.c.bf16 %v4040_v14, %v4040_v14  ;;  %v4166_v30 = vadd.f32 %v8582_v29, %v3903_v24  ;;  %v4041_v23 = vadd.f32 %v8582_v29, %v3778_v17  ;;  %v3906_v31 = vld [vmem:[#allocation2 + $0x6f8] sm:$0xff]  ;;  %v3776_v32 = vld [vmem:[#allocation2 + $0x2e8] sm:$0xff]  ;;  %3523 = vst.msk [vmem:[#allocation2 + $0x318] sm:$0xff] %vm309_vm0, %v3267_v13  ;;  %3651 = vst.msk [vmem:[#allocation2 + $0x718] sm:$0xff] %vm309_vm0, %v3395_v25 }
 0x1bf   : > { %v6374_v34 = vpack.c.bf16 %v4168_v21, %v4168_v21  ;;  %v6244_v35 = vpack.c.bf16 %v4038_v22, %v4038_v22  ;;  %v4169_v36 = vadd.f32 %v8582_v29, %v3906_v31  ;;  %v4039_v37 = vadd.f32 %v8582_v29, %v3776_v32  ;;  %v3904_v38 = vld [vmem:[#allocation2 + $0x6e8] sm:$0xff]  ;;  %3521 = vst.msk [vmem:[#allocation2 + $0x308] sm:$0xff] %vm309_vm0, %v3265_v26  ;;  %v672_v17 = vld [vmem:[#allocation2 + $0x350] sm:$0xff]  ;;  %v6645_v32 = vpop.f32.mrb[104].mxu0  ;;  %v801_v39 = vld [vmem:[#allocation2 + $0x758] sm:$0xff] }
 0x1c0   : > { %5321 = vst.msk [vmem:[%s7803_s27 + $0x178] sm:$0xf] %vm5226_vm1, %v6246_v28  ;;  %v6372_v40 = vpack.c.bf16 %v4166_v30, %v4166_v30  ;;  %v6247_v41 = vpack.c.bf16 %v4041_v23, %v4041_v23  ;;  %v4167_v42 = vadd.f32 %v8582_v29, %v3904_v38  ;;  %v3269_v10 = vadd.f32 %v2548_v4, %v667_v55  ;;  %v800_v28 = vld [vmem:[#allocation2 + $0x750] sm:$0xff]  ;;  %v670_v30 = vld [vmem:[#allocation2 + $0x340] sm:$0xff]  ;;  %v2561_v38 = vpop.f32.mrb[105].mxu0 }
 0x1c1   : > { %3649 = vst.msk [vmem:[#allocation2 + $0x708] sm:$0xff] %vm309_vm0, %v3393_v33  ;;  %v6375_v45 = vpack.c.bf16 %v4169_v36, %v4169_v36  ;;  %v6245_v46 = vpack.c.bf16 %v4039_v37, %v4039_v37  ;;  %3526 = vst.msk [vmem:[#allocation2 + $0x330] sm:$0xff] %vm309_vm0, %v3270_v51  ;;  %v3397_v13 = vadd.f32 %v3060_v11, %v795_v61  ;;  %v798_v33 = vld [vmem:[#allocation2 + $0x740] sm:$0xff]  ;;  %v6773_v37 = vpop.f32.mrb[104].mxu1 }
 0x1c2   : > { %5449 = vst.msk [vmem:[%s7803_s27 + $0x378] sm:$0xf] %vm5226_vm1, %v6374_v34  ;;  %5319 = vst.msk [vmem:[%s7803_s27 + $0x170] sm:$0xf] %vm5226_vm1, %v6244_v35  ;;  %v6373_v50 = vpack.c.bf16 %v4167_v42, %v4167_v42  ;;  %v673_v34 = vld [vmem:[#allocation2 + $0x358] sm:$0xff]  ;;  %v3274_v36 = vadd.f32 %v6645_v32, %v672_v17  ;;  %v3402_v42 = vadd.f32 %v6773_v37, %v800_v28  ;;  %v3073_v44 = vpop.f32.mrb[105].mxu1 }
 0x1c3   : > { %5447 = vst.msk [vmem:[%s7803_s27 + $0x370] sm:$0xf] %vm5226_vm1, %v6372_v40  ;;  %5322 = vst.msk [vmem:[%s7803_s27 + $0x17c] sm:$0xf] %vm5226_vm1, %v6247_v41  ;;  %v3781_v56 = vld [vmem:[#allocation2 + $0x310] sm:$0xff]  ;;  %v671_v40 = vld [vmem:[#allocation2 + $0x348] sm:$0xff]  ;;  %v3272_v43 = vadd.f32 %v2561_v38, %v670_v30 }
 0x1c4   : > { %5450 = vst.msk [vmem:[%s7803_s27 + $0x37c] sm:$0xf] %vm5226_vm1, %v6375_v45  ;;  %5320 = vst.msk [vmem:[%s7803_s27 + $0x174] sm:$0xf] %vm5226_vm1, %v6245_v46  ;;  %v4044_v62 = vadd.f32 %v8582_v29, %v3781_v56  ;;  %v3909_v63 = vld [vmem:[#allocation2 + $0x710] sm:$0xff]  ;;  %v3779_v0 = vld [vmem:[#allocation2 + $0x300] sm:$0xff] }
 0x1c5   : > { %5448 = vst.msk [vmem:[%s7803_s27 + $0x374] sm:$0xf] %vm5226_vm1, %v6373_v50  ;;  %v4172_v5 = vadd.f32 %v8582_v29, %v3909_v63  ;;  %v4042_v6 = vadd.f32 %v8582_v29, %v3779_v0  ;;  %v3907_v7 = vld [vmem:[#allocation2 + $0x700] sm:$0xff]  ;;  %v3782_v8 = vld [vmem:[#allocation2 + $0x318] sm:$0xff]  ;;  %v6646_v45 = vpop.f32.mrb[106].mxu0  ;;  %v799_v46 = vld [vmem:[#allocation2 + $0x748] sm:$0xff]  ;;  %v3400_v50 = vadd.f32 %v3073_v44, %v798_v33 }
 0x1c6   : > { %3654 = vst.msk [vmem:[#allocation2 + $0x730] sm:$0xff] %vm309_vm0, %v3398_v57  ;;  %3524 = vst.msk [vmem:[#allocation2 + $0x320] sm:$0xff] %vm309_vm0, %v3268_v58  ;;  %v6250_v12 = vpack.c.bf16 %v4044_v62, %v4044_v62  ;;  %v4170_v14 = vadd.f32 %v8582_v29, %v3907_v7  ;;  %v4045_v15 = vadd.f32 %v8582_v29, %v3782_v8  ;;  %v3910_v16 = vld [vmem:[#allocation2 + $0x718] sm:$0xff]  ;;  %v3780_v18 = vld [vmem:[#allocation2 + $0x308] sm:$0xff]  ;;  %v6774_v52 = vpop.f32.mrb[106].mxu1  ;;  %v2564_v53 = vpop.f32.mrb[107].mxu0 }
 0x1c7   : > { %3652 = vst.msk [vmem:[#allocation2 + $0x720] sm:$0xff] %vm309_vm0, %v3396_v1  ;;  %3527 = vst.msk [vmem:[#allocation2 + $0x338] sm:$0xff] %vm309_vm0, %v3271_v2  ;;  %v6378_v19 = vpack.c.bf16 %v4172_v5, %v4172_v5  ;;  %v6248_v20 = vpack.c.bf16 %v4042_v6, %v4042_v6  ;;  %v4173_v21 = vadd.f32 %v8582_v29, %v3910_v16  ;;  %v3076_v60 = vpop.f32.mrb[107].mxu1  ;;  %v676_v8 = vld [vmem:[#allocation2 + $0x370] sm:$0xff]  ;;  %v805_v17 = vld [vmem:[#allocation2 + $0x778] sm:$0xff] }
 0x1c8   : > { %v4043_v22 = vadd.f32 %v8582_v29, %v3780_v18  ;;  %v3908_v24 = vld [vmem:[#allocation2 + $0x708] sm:$0xff]  ;;  %3655 = vst.msk [vmem:[#allocation2 + $0x738] sm:$0xff] %vm309_vm0, %v3399_v9  ;;  %3525 = vst.msk [vmem:[#allocation2 + $0x328] sm:$0xff] %vm309_vm0, %v3269_v10  ;;  %v6376_v25 = vpack.c.bf16 %v4170_v14, %v4170_v14  ;;  %v6251_v26 = vpack.c.bf16 %v4045_v15, %v4045_v15  ;;  %v3785_v41 = vld [vmem:[#allocation2 + $0x330] sm:$0xff]  ;;  %v6649_v18 = vpop.f32.mrb[108].mxu0 }
 0x1c9   : > { %5325 = vst.msk [vmem:[%s7803_s27 + $0x188] sm:$0xf] %vm5226_vm1, %v6250_v12  ;;  %v4171_v27 = vadd.f32 %v8582_v29, %v3908_v24  ;;  %5453 = vst.msk [vmem:[%s7803_s27 + $0x388] sm:$0xf] %vm5226_vm1, %v6378_v19  ;;  %v6379_v23 = vpack.c.bf16 %v4173_v21, %v4173_v21  ;;  %v4048_v47 = vadd.f32 %v8582_v29, %v3785_v41  ;;  %v804_v12 = vld [vmem:[#allocation2 + $0x770] sm:$0xff]  ;;  %v674_v14 = vld [vmem:[#allocation2 + $0x360] sm:$0xff] }
 0x1ca   : > { %3653 = vst.msk [vmem:[#allocation2 + $0x728] sm:$0xff] %vm309_vm0, %v3397_v13  ;;  %v6249_v31 = vpack.c.bf16 %v4043_v22, %v4043_v22  ;;  %3530 = vst.msk [vmem:[#allocation2 + $0x350] sm:$0xff] %vm309_vm0, %v3274_v36  ;;  %v3275_v51 = vadd.f32 %v6646_v45, %v673_v34  ;;  %v3403_v58 = vadd.f32 %v6774_v52, %v801_v39  ;;  %v802_v13 = vld [vmem:[#allocation2 + $0x760] sm:$0xff]  ;;  %v677_v19 = vld [vmem:[#allocation2 + $0x378] sm:$0xff]  ;;  %v6777_v22 = vpop.f32.mrb[108].mxu1  ;;  %v2577_v24 = vpop.f32.mrb[109].mxu0 }
 0x1cb   : > { %5323 = vst.msk [vmem:[%s7803_s27 + $0x180] sm:$0xf] %vm5226_vm1, %v6248_v20  ;;  %5451 = vst.msk [vmem:[%s7803_s27 + $0x380] sm:$0xf] %vm5226_vm1, %v6376_v25  ;;  %v6377_v35 = vpack.c.bf16 %v4171_v27, %v4171_v27  ;;  %v3273_v59 = vadd.f32 %v2564_v53, %v671_v40  ;;  %v6254_v61 = vpack.c.bf16 %v4048_v47, %v4048_v47  ;;  %v675_v25 = vld [vmem:[#allocation2 + $0x368] sm:$0xff]  ;;  %v3089_v30 = vpop.f32.mrb[109].mxu1 }
 0x1cc   : > { %5326 = vst.msk [vmem:[%s7803_s27 + $0x18c] sm:$0xf] %vm5226_vm1, %v6251_v26  ;;  %5454 = vst.msk [vmem:[%s7803_s27 + $0x38c] sm:$0xf] %vm5226_vm1, %v6379_v23  ;;  %v3401_v2 = vadd.f32 %v3076_v60, %v799_v46  ;;  %v3278_v21 = vadd.f32 %v6649_v18, %v676_v8  ;;  %v3406_v27 = vadd.f32 %v6777_v22, %v804_v12  ;;  %v6650_v23 = vpop.f32.mrb[110].mxu0  ;;  %v6778_v37 = vpop.f32.mrb[110].mxu1 }
 0x1cd   : > { %5324 = vst.msk [vmem:[%s7803_s27 + $0x184] sm:$0xf] %vm5226_vm1, %v6249_v31  ;;  %5452 = vst.msk [vmem:[%s7803_s27 + $0x384] sm:$0xf] %vm5226_vm1, %v6377_v35  ;;  %v3913_v48 = vld [vmem:[#allocation2 + $0x730] sm:$0xff]  ;;  %v3783_v49 = vld [vmem:[#allocation2 + $0x320] sm:$0xff]  ;;  %v3276_v28 = vadd.f32 %v2577_v24, %v674_v14  ;;  %v3404_v35 = vadd.f32 %v3089_v30, %v802_v13  ;;  %v3279_v36 = vadd.f32 %v6650_v23, %v677_v19 }
 0x1ce   : > { %v4176_v54 = vadd.f32 %v8582_v29, %v3913_v48  ;;  %v4046_v55 = vadd.f32 %v8582_v29, %v3783_v49  ;;  %v3911_v56 = vld [vmem:[#allocation2 + $0x720] sm:$0xff]  ;;  %v3786_v57 = vld [vmem:[#allocation2 + $0x338] sm:$0xff]  ;;  %3658 = vst.msk [vmem:[#allocation2 + $0x750] sm:$0xff] %vm309_vm0, %v3402_v42  ;;  %3528 = vst.msk [vmem:[#allocation2 + $0x340] sm:$0xff] %vm309_vm0, %v3272_v43  ;;  %v2580_v38 = vpop.f32.mrb[111].mxu0  ;;  %v3407_v43 = vadd.f32 %v6778_v37, %v805_v17  ;;  %v3092_v45 = vpop.f32.mrb[111].mxu1 }
 0x1cf   : > { %v4174_v62 = vadd.f32 %v8582_v29, %v3911_v56  ;;  %v4049_v63 = vadd.f32 %v8582_v29, %v3786_v57  ;;  %v3914_v0 = vld [vmem:[#allocation2 + $0x738] sm:$0xff]  ;;  %v3784_v1 = vld [vmem:[#allocation2 + $0x328] sm:$0xff]  ;;  %3656 = vst.msk [vmem:[#allocation2 + $0x740] sm:$0xff] %vm309_vm0, %v3400_v50  ;;  %3531 = vst.msk [vmem:[#allocation2 + $0x358] sm:$0xff] %vm309_vm0, %v3275_v51  ;;  %v3277_v44 = vadd.f32 %v2580_v38, %v675_v25 }
 0x1d0   : > { %v6382_v3 = vpack.c.bf16 %v4176_v54, %v4176_v54  ;;  %v6252_v4 = vpack.c.bf16 %v4046_v55, %v4046_v55  ;;  %v4177_v5 = vadd.f32 %v8582_v29, %v3914_v0  ;;  %v4047_v6 = vadd.f32 %v8582_v29, %v3784_v1  ;;  %3659 = vst.msk [vmem:[#allocation2 + $0x758] sm:$0xff] %vm309_vm0, %v3403_v58  ;;  %v803_v31 = vld [vmem:[#allocation2 + $0x768] sm:$0xff]  ;;  %v680_v57 = vld [vmem:[#allocation2 + $0x390] sm:$0xff]  ;;  %v6653_v1 = vpop.f32.mrb[112].mxu0  ;;  %v809_v8 = vld [vmem:[#allocation2 + $0x798] sm:$0xff] }
 0x1d1   : > { %v3912_v7 = vld [vmem:[#allocation2 + $0x728] sm:$0xff]  ;;  %3529 = vst.msk [vmem:[#allocation2 + $0x348] sm:$0xff] %vm309_vm0, %v3273_v59  ;;  %v6380_v9 = vpack.c.bf16 %v4174_v62, %v4174_v62  ;;  %v6255_v10 = vpack.c.bf16 %v4049_v63, %v4049_v63  ;;  %3657 = vst.msk [vmem:[#allocation2 + $0x748] sm:$0xff] %vm309_vm0, %v3401_v2  ;;  %v3789_v26 = vld [vmem:[#allocation2 + $0x350] sm:$0xff]  ;;  %v3405_v51 = vadd.f32 %v3092_v45, %v803_v31 }
 0x1d2   : > { %5329 = vst.msk [vmem:[%s7803_s27 + $0x198] sm:$0xf] %vm5226_vm1, %v6254_v61  ;;  %v4175_v11 = vadd.f32 %v8582_v29, %v3912_v7  ;;  %5457 = vst.msk [vmem:[%s7803_s27 + $0x398] sm:$0xf] %vm5226_vm1, %v6382_v3  ;;  %v6383_v15 = vpack.c.bf16 %v4177_v5, %v4177_v5  ;;  %v6253_v16 = vpack.c.bf16 %v4047_v6, %v4047_v6  ;;  %v808_v61 = vld [vmem:[#allocation2 + $0x790] sm:$0xff]  ;;  %v678_v62 = vld [vmem:[#allocation2 + $0x380] sm:$0xff] }
 0x1d3   : > { %5327 = vst.msk [vmem:[%s7803_s27 + $0x190] sm:$0xf] %vm5226_vm1, %v6252_v4  ;;  %5455 = vst.msk [vmem:[%s7803_s27 + $0x390] sm:$0xf] %vm5226_vm1, %v6380_v9  ;;  %v4052_v32 = vadd.f32 %v8582_v29, %v3789_v26  ;;  %v806_v2 = vld [vmem:[#allocation2 + $0x780] sm:$0xff]  ;;  %v681_v3 = vld [vmem:[#allocation2 + $0x398] sm:$0xff]  ;;  %v3282_v5 = vadd.f32 %v6653_v1, %v680_v57 }
 0x1d4   : > { %5330 = vst.msk [vmem:[%s7803_s27 + $0x19c] sm:$0xf] %vm5226_vm1, %v6255_v10  ;;  %v6381_v20 = vpack.c.bf16 %v4175_v11, %v4175_v11  ;;  %5458 = vst.msk [vmem:[%s7803_s27 + $0x39c] sm:$0xf] %vm5226_vm1, %v6383_v15  ;;  %v6781_v6 = vpop.f32.mrb[112].mxu1  ;;  %v2593_v7 = vpop.f32.mrb[113].mxu0 }
 0x1d5   : > { %5328 = vst.msk [vmem:[%s7803_s27 + $0x194] sm:$0xf] %vm5226_vm1, %v6253_v16  ;;  %v3917_v33 = vld [vmem:[#allocation2 + $0x750] sm:$0xff]  ;;  %v3787_v34 = vld [vmem:[#allocation2 + $0x340] sm:$0xff]  ;;  %v6258_v46 = vpack.c.bf16 %v4052_v32, %v4052_v32  ;;  %v679_v9 = vld [vmem:[#allocation2 + $0x388] sm:$0xff]  ;;  %v3410_v11 = vadd.f32 %v6781_v6, %v808_v61  ;;  %v3280_v12 = vadd.f32 %v2593_v7, %v678_v62  ;;  %v3105_v14 = vpop.f32.mrb[113].mxu1 }
 0x1d6   : > { %5456 = vst.msk [vmem:[%s7803_s27 + $0x394] sm:$0xf] %vm5226_vm1, %v6381_v20  ;;  %v4180_v39 = vadd.f32 %v8582_v29, %v3917_v33  ;;  %v4050_v40 = vadd.f32 %v8582_v29, %v3787_v34  ;;  %v3915_v41 = vld [vmem:[#allocation2 + $0x740] sm:$0xff]  ;;  %v3790_v42 = vld [vmem:[#allocation2 + $0x358] sm:$0xff]  ;;  %v6654_v15 = vpop.f32.mrb[114].mxu0  ;;  %v807_v16 = vld [vmem:[#allocation2 + $0x788] sm:$0xff]  ;;  %v3408_v20 = vadd.f32 %v3105_v14, %v806_v2 }
 0x1d7   : > { %3534 = vst.msk [vmem:[#allocation2 + $0x370] sm:$0xff] %vm309_vm0, %v3278_v21  ;;  %3662 = vst.msk [vmem:[#allocation2 + $0x770] sm:$0xff] %vm309_vm0, %v3406_v27  ;;  %v4178_v47 = vadd.f32 %v8582_v29, %v3915_v41  ;;  %v4053_v48 = vadd.f32 %v8582_v29, %v3790_v42  ;;  %v3918_v49 = vld [vmem:[#allocation2 + $0x758] sm:$0xff]  ;;  %v3283_v21 = vadd.f32 %v6654_v15, %v681_v3  ;;  %v6782_v22 = vpop.f32.mrb[114].mxu1  ;;  %v2596_v24 = vpop.f32.mrb[115].mxu0  ;;  %v684_v42 = vld [vmem:[#allocation2 + $0x3b0] sm:$0xff] }
 0x1d8   : > { %3532 = vst.msk [vmem:[#allocation2 + $0x360] sm:$0xff] %vm309_vm0, %v3276_v28  ;;  %v3788_v50 = vld [vmem:[#allocation2 + $0x348] sm:$0xff]  ;;  %3660 = vst.msk [vmem:[#allocation2 + $0x760] sm:$0xff] %vm309_vm0, %v3404_v35  ;;  %v6386_v52 = vpack.c.bf16 %v4180_v39, %v4180_v39  ;;  %v6256_v53 = vpack.c.bf16 %v4050_v40, %v4050_v40  ;;  %v4181_v54 = vadd.f32 %v8582_v29, %v3918_v49  ;;  %v3108_v23 = vpop.f32.mrb[115].mxu1  ;;  %v813_v57 = vld [vmem:[#allocation2 + $0x7b8] sm:$0xff] }
 0x1d9   : > { %3535 = vst.msk [vmem:[#allocation2 + $0x378] sm:$0xff] %vm309_vm0, %v3279_v36  ;;  %v4051_v55 = vadd.f32 %v8582_v29, %v3788_v50  ;;  %v3916_v56 = vld [vmem:[#allocation2 + $0x748] sm:$0xff]  ;;  %3663 = vst.msk [vmem:[#allocation2 + $0x778] sm:$0xff] %vm309_vm0, %v3407_v43  ;;  %v6384_v58 = vpack.c.bf16 %v4178_v47, %v4178_v47  ;;  %v6259_v59 = vpack.c.bf16 %v4053_v48, %v4053_v48  ;;  %v682_v47 = vld [vmem:[#allocation2 + $0x3a0] sm:$0xff]  ;;  %v6657_v50 = vpop.f32.mrb[116].mxu0 }
 0x1da   : > { %3533 = vst.msk [vmem:[#allocation2 + $0x368] sm:$0xff] %vm309_vm0, %v3277_v44  ;;  %v4179_v60 = vadd.f32 %v8582_v29, %v3916_v56  ;;  %3661 = vst.msk [vmem:[#allocation2 + $0x768] sm:$0xff] %vm309_vm0, %v3405_v51  ;;  %v6387_v63 = vpack.c.bf16 %v4181_v54, %v4181_v54  ;;  %v3411_v28 = vadd.f32 %v6782_v22, %v809_v8  ;;  %v810_v51 = vld [vmem:[#allocation2 + $0x7a0] sm:$0xff]  ;;  %v2609_v56 = vpop.f32.mrb[117].mxu0 }
 0x1db   : > { %5333 = vst.msk [vmem:[%s7803_s27 + $0x1a8] sm:$0xf] %vm5226_vm1, %v6258_v46  ;;  %5461 = vst.msk [vmem:[%s7803_s27 + $0x3a8] sm:$0xf] %vm5226_vm1, %v6386_v52  ;;  %v6257_v0 = vpack.c.bf16 %v4051_v55, %v4051_v55  ;;  %v3281_v30 = vadd.f32 %v2596_v24, %v679_v9  ;;  %v3409_v36 = vadd.f32 %v3108_v23, %v807_v16  ;;  %v812_v46 = vld [vmem:[#allocation2 + $0x7b0] sm:$0xff]  ;;  %v685_v52 = vld [vmem:[#allocation2 + $0x3b8] sm:$0xff] }
 0x1dc   : > { %5331 = vst.msk [vmem:[%s7803_s27 + $0x1a0] sm:$0xf] %vm5226_vm1, %v6256_v53  ;;  %5459 = vst.msk [vmem:[%s7803_s27 + $0x3a0] sm:$0xf] %vm5226_vm1, %v6384_v58  ;;  %v6385_v4 = vpack.c.bf16 %v4179_v60, %v4179_v60  ;;  %v3286_v54 = vadd.f32 %v6657_v50, %v684_v42  ;;  %v6785_v55 = vpop.f32.mrb[116].mxu1  ;;  %v683_v58 = vld [vmem:[#allocation2 + $0x3a8] sm:$0xff]  ;;  %v3284_v61 = vadd.f32 %v2609_v56, %v682_v47 }
 0x1dd   : > { %5334 = vst.msk [vmem:[%s7803_s27 + $0x1ac] sm:$0xf] %vm5226_vm1, %v6259_v59  ;;  %5462 = vst.msk [vmem:[%s7803_s27 + $0x3ac] sm:$0xf] %vm5226_vm1, %v6387_v63  ;;  %v3414_v60 = vadd.f32 %v6785_v55, %v812_v46  ;;  %v3121_v62 = vpop.f32.mrb[117].mxu1  ;;  %v6658_v63 = vpop.f32.mrb[118].mxu0 }
 0x1de   : > { %5332 = vst.msk [vmem:[%s7803_s27 + $0x1a4] sm:$0xf] %vm5226_vm1, %v6257_v0  ;;  %v3793_v10 = vld [vmem:[#allocation2 + $0x370] sm:$0xff]  ;;  %5460 = vst.msk [vmem:[%s7803_s27 + $0x3a4] sm:$0xf] %vm5226_vm1, %v6385_v4  ;;  %v811_v0 = vld [vmem:[#allocation2 + $0x7a8] sm:$0xff]  ;;  %v3412_v4 = vadd.f32 %v3121_v62, %v810_v51 }
 0x1df   : > { %v4056_v18 = vadd.f32 %v8582_v29, %v3793_v10  ;;  %v3921_v13 = vld [vmem:[#allocation2 + $0x770] sm:$0xff]  ;;  %v3791_v19 = vld [vmem:[#allocation2 + $0x360] sm:$0xff]  ;;  %3538 = vst.msk [vmem:[#allocation2 + $0x390] sm:$0xff] %vm309_vm0, %v3282_v5  ;;  %3666 = vst.msk [vmem:[#allocation2 + $0x790] sm:$0xff] %vm309_vm0, %v3410_v11  ;;  %v3287_v5 = vadd.f32 %v6658_v63, %v685_v52  ;;  %v6786_v6 = vpop.f32.mrb[118].mxu1  ;;  %v2612_v7 = vpop.f32.mrb[119].mxu0 }
 0x1e0   : > { %v4184_v17 = vadd.f32 %v8582_v29, %v3921_v13  ;;  %v4054_v25 = vadd.f32 %v8582_v29, %v3791_v19  ;;  %v3919_v26 = vld [vmem:[#allocation2 + $0x760] sm:$0xff]  ;;  %v3794_v27 = vld [vmem:[#allocation2 + $0x378] sm:$0xff]  ;;  %3536 = vst.msk [vmem:[#allocation2 + $0x380] sm:$0xff] %vm309_vm0, %v3280_v12  ;;  %3664 = vst.msk [vmem:[#allocation2 + $0x780] sm:$0xff] %vm309_vm0, %v3408_v20  ;;  %v3415_v12 = vadd.f32 %v6786_v6, %v813_v57  ;;  %v3124_v15 = vpop.f32.mrb[119].mxu1 }
 0x1e1   : > { %v6262_v31 = vpack.c.bf16 %v4056_v18, %v4056_v18  ;;  %v4182_v32 = vadd.f32 %v8582_v29, %v3919_v26  ;;  %v4057_v33 = vadd.f32 %v8582_v29, %v3794_v27  ;;  %v3922_v34 = vld [vmem:[#allocation2 + $0x778] sm:$0xff]  ;;  %v3792_v35 = vld [vmem:[#allocation2 + $0x368] sm:$0xff]  ;;  %3539 = vst.msk [vmem:[#allocation2 + $0x398] sm:$0xff] %vm309_vm0, %v3283_v21  ;;  %3667 = vst.msk [vmem:[#allocation2 + $0x798] sm:$0xff] %vm309_vm0, %v3411_v28 }
 0x1e2   : > { %v6390_v37 = vpack.c.bf16 %v4184_v17, %v4184_v17  ;;  %v6260_v38 = vpack.c.bf16 %v4054_v25, %v4054_v25  ;;  %v4185_v39 = vadd.f32 %v8582_v29, %v3922_v34  ;;  %v4055_v40 = vadd.f32 %v8582_v29, %v3792_v35  ;;  %v3920_v41 = vld [vmem:[#allocation2 + $0x768] sm:$0xff]  ;;  %3537 = vst.msk [vmem:[#allocation2 + $0x388] sm:$0xff] %vm309_vm0, %v3281_v30  ;;  %v688_v27 = vld [vmem:[#allocation2 + $0x3d0] sm:$0xff]  ;;  %v6661_v35 = vpop.f32.mrb[120].mxu0  ;;  %v817_v42 = vld [vmem:[#allocation2 + $0x7d8] sm:$0xff] }
 0x1e3   : > { %5337 = vst.msk [vmem:[%s7803_s27 + $0x1b8] sm:$0xf] %vm5226_vm1, %v6262_v31  ;;  %v6388_v43 = vpack.c.bf16 %v4182_v32, %v4182_v32  ;;  %v6263_v44 = vpack.c.bf16 %v4057_v33, %v4057_v33  ;;  %v4183_v45 = vadd.f32 %v8582_v29, %v3920_v41  ;;  %v3285_v14 = vadd.f32 %v2612_v7, %v683_v58  ;;  %v816_v31 = vld [vmem:[#allocation2 + $0x7d0] sm:$0xff]  ;;  %v686_v32 = vld [vmem:[#allocation2 + $0x3c0] sm:$0xff]  ;;  %v2625_v41 = vpop.f32.mrb[121].mxu0 }
 0x1e4   : > { %3665 = vst.msk [vmem:[#allocation2 + $0x788] sm:$0xff] %vm309_vm0, %v3409_v36  ;;  %v6391_v48 = vpack.c.bf16 %v4185_v39, %v4185_v39  ;;  %v6261_v49 = vpack.c.bf16 %v4055_v40, %v4055_v40  ;;  %3542 = vst.msk [vmem:[#allocation2 + $0x3b0] sm:$0xff] %vm309_vm0, %v3286_v54  ;;  %v3413_v21 = vadd.f32 %v3124_v15, %v811_v0  ;;  %v814_v36 = vld [vmem:[#allocation2 + $0x7c0] sm:$0xff]  ;;  %v6789_v40 = vpop.f32.mrb[120].mxu1 }
 0x1e5   : > { %5465 = vst.msk [vmem:[%s7803_s27 + $0x3b8] sm:$0xf] %vm5226_vm1, %v6390_v37  ;;  %5335 = vst.msk [vmem:[%s7803_s27 + $0x1b0] sm:$0xf] %vm5226_vm1, %v6260_v38  ;;  %v6389_v53 = vpack.c.bf16 %v4183_v45, %v4183_v45  ;;  %v689_v37 = vld [vmem:[#allocation2 + $0x3d8] sm:$0xff]  ;;  %v3290_v39 = vadd.f32 %v6661_v35, %v688_v27  ;;  %v3418_v45 = vadd.f32 %v6789_v40, %v816_v31  ;;  %v3137_v47 = vpop.f32.mrb[121].mxu1 }
 0x1e6   : > { %5463 = vst.msk [vmem:[%s7803_s27 + $0x3b0] sm:$0xf] %vm5226_vm1, %v6388_v43  ;;  %5338 = vst.msk [vmem:[%s7803_s27 + $0x1bc] sm:$0xf] %vm5226_vm1, %v6263_v44  ;;  %v3797_v59 = vld [vmem:[#allocation2 + $0x390] sm:$0xff]  ;;  %v687_v43 = vld [vmem:[#allocation2 + $0x3c8] sm:$0xff]  ;;  %v3288_v46 = vadd.f32 %v2625_v41, %v686_v32 }
 0x1e7   : > { %5466 = vst.msk [vmem:[%s7803_s27 + $0x3bc] sm:$0xf] %vm5226_vm1, %v6391_v48  ;;  %5336 = vst.msk [vmem:[%s7803_s27 + $0x1b4] sm:$0xf] %vm5226_vm1, %v6261_v49  ;;  %v4060_v1 = vadd.f32 %v8582_v29, %v3797_v59  ;;  %v3925_v2 = vld [vmem:[#allocation2 + $0x790] sm:$0xff]  ;;  %v3795_v3 = vld [vmem:[#allocation2 + $0x380] sm:$0xff] }
 0x1e8   : > { %5464 = vst.msk [vmem:[%s7803_s27 + $0x3b4] sm:$0xf] %vm5226_vm1, %v6389_v53  ;;  %v4188_v8 = vadd.f32 %v8582_v29, %v3925_v2  ;;  %v4058_v9 = vadd.f32 %v8582_v29, %v3795_v3  ;;  %v3923_v10 = vld [vmem:[#allocation2 + $0x780] sm:$0xff]  ;;  %v3798_v11 = vld [vmem:[#allocation2 + $0x398] sm:$0xff]  ;;  %v6662_v48 = vpop.f32.mrb[122].mxu0  ;;  %v815_v49 = vld [vmem:[#allocation2 + $0x7c8] sm:$0xff]  ;;  %v3416_v53 = vadd.f32 %v3137_v47, %v814_v36 }
 0x1e9   : > { %3670 = vst.msk [vmem:[#allocation2 + $0x7b0] sm:$0xff] %vm309_vm0, %v3414_v60  ;;  %3540 = vst.msk [vmem:[#allocation2 + $0x3a0] sm:$0xff] %vm309_vm0, %v3284_v61  ;;  %v6266_v16 = vpack.c.bf16 %v4060_v1, %v4060_v1  ;;  %v4186_v18 = vadd.f32 %v8582_v29, %v3923_v10  ;;  %v4061_v13 = vadd.f32 %v8582_v29, %v3798_v11  ;;  %v3926_v19 = vld [vmem:[#allocation2 + $0x798] sm:$0xff]  ;;  %v3796_v20 = vld [vmem:[#allocation2 + $0x388] sm:$0xff]  ;;  %v6790_v55 = vpop.f32.mrb[122].mxu1  ;;  %v2628_v56 = vpop.f32.mrb[123].mxu0 }
 0x1ea   : > { %3668 = vst.msk [vmem:[#allocation2 + $0x7a0] sm:$0xff] %vm309_vm0, %v3412_v4  ;;  %3543 = vst.msk [vmem:[#allocation2 + $0x3b8] sm:$0xff] %vm309_vm0, %v3287_v5  ;;  %v6394_v22 = vpack.c.bf16 %v4188_v8, %v4188_v8  ;;  %v6264_v24 = vpack.c.bf16 %v4058_v9, %v4058_v9  ;;  %v4189_v17 = vadd.f32 %v8582_v29, %v3926_v19  ;;  %v3140_v63 = vpop.f32.mrb[123].mxu1  ;;  %v692_v11 = vld [vmem:[#allocation2 + $0x3f0] sm:$0xff]  ;;  %v821_v27 = vld [vmem:[#allocation2 + $0x7f8] sm:$0xff] }
 0x1eb   : > { %v4059_v25 = vadd.f32 %v8582_v29, %v3796_v20  ;;  %v3924_v26 = vld [vmem:[#allocation2 + $0x788] sm:$0xff]  ;;  %3671 = vst.msk [vmem:[#allocation2 + $0x7b8] sm:$0xff] %vm309_vm0, %v3415_v12  ;;  %3541 = vst.msk [vmem:[#allocation2 + $0x3a8] sm:$0xff] %vm309_vm0, %v3285_v14  ;;  %v6392_v28 = vpack.c.bf16 %v4186_v18, %v4186_v18  ;;  %v6267_v30 = vpack.c.bf16 %v4061_v13, %v4061_v13  ;;  %v3801_v44 = vld [vmem:[#allocation2 + $0x3b0] sm:$0xff]  ;;  %v6665_v20 = vpop.f32.mrb[124].mxu0 }
 0x1ec   : > { %5341 = vst.msk [vmem:[%s7803_s27 + $0x1c8] sm:$0xf] %vm5226_vm1, %v6266_v16  ;;  %v4187_v23 = vadd.f32 %v8582_v29, %v3924_v26  ;;  %5469 = vst.msk [vmem:[%s7803_s27 + $0x3c8] sm:$0xf] %vm5226_vm1, %v6394_v22  ;;  %v6395_v33 = vpack.c.bf16 %v4189_v17, %v4189_v17  ;;  %v4064_v50 = vadd.f32 %v8582_v29, %v3801_v44  ;;  %v820_v16 = vld [vmem:[#allocation2 + $0x7f0] sm:$0xff]  ;;  %v690_v18 = vld [vmem:[#allocation2 + $0x3e0] sm:$0xff] }
 0x1ed   : > { %3669 = vst.msk [vmem:[#allocation2 + $0x7a8] sm:$0xff] %vm309_vm0, %v3413_v21  ;;  %v6265_v34 = vpack.c.bf16 %v4059_v25, %v4059_v25  ;;  %3546 = vst.msk [vmem:[#allocation2 + $0x3d0] sm:$0xff] %vm309_vm0, %v3290_v39  ;;  %v3291_v54 = vadd.f32 %v6662_v48, %v689_v37  ;;  %v3419_v61 = vadd.f32 %v6790_v55, %v817_v42  ;;  %v818_v21 = vld [vmem:[#allocation2 + $0x7e0] sm:$0xff]  ;;  %v693_v22 = vld [vmem:[#allocation2 + $0x3f8] sm:$0xff]  ;;  %v6793_v25 = vpop.f32.mrb[124].mxu1  ;;  %v2641_v26 = vpop.f32.mrb[125].mxu0 }
 0x1ee   : > { %5339 = vst.msk [vmem:[%s7803_s27 + $0x1c0] sm:$0xf] %vm5226_vm1, %v6264_v24  ;;  %5467 = vst.msk [vmem:[%s7803_s27 + $0x3c0] sm:$0xf] %vm5226_vm1, %v6392_v28  ;;  %v6393_v38 = vpack.c.bf16 %v4187_v23, %v4187_v23  ;;  %v3289_v62 = vadd.f32 %v2628_v56, %v687_v43  ;;  %v6270_v0 = vpack.c.bf16 %v4064_v50, %v4064_v50  ;;  %v691_v28 = vld [vmem:[#allocation2 + $0x3e8] sm:$0xff]  ;;  %v3153_v32 = vpop.f32.mrb[125].mxu1 }
 0x1ef   : > { %5342 = vst.msk [vmem:[%s7803_s27 + $0x1cc] sm:$0xf] %vm5226_vm1, %v6267_v30  ;;  %5470 = vst.msk [vmem:[%s7803_s27 + $0x3cc] sm:$0xf] %vm5226_vm1, %v6395_v33  ;;  %v3417_v5 = vadd.f32 %v3140_v63, %v815_v49  ;;  %v3294_v17 = vadd.f32 %v6665_v20, %v692_v11  ;;  %v3422_v23 = vadd.f32 %v6793_v25, %v820_v16  ;;  %v6666_v33 = vpop.f32.mrb[126].mxu0  ;;  %v6794_v40 = vpop.f32.mrb[126].mxu1 }
 0x1f0   : > { %5340 = vst.msk [vmem:[%s7803_s27 + $0x1c4] sm:$0xf] %vm5226_vm1, %v6265_v34  ;;  %5468 = vst.msk [vmem:[%s7803_s27 + $0x3c4] sm:$0xf] %vm5226_vm1, %v6393_v38  ;;  %v3929_v51 = vld [vmem:[#allocation2 + $0x7b0] sm:$0xff]  ;;  %v3799_v52 = vld [vmem:[#allocation2 + $0x3a0] sm:$0xff]  ;;  %v3292_v31 = vadd.f32 %v2641_v26, %v690_v18  ;;  %v3420_v38 = vadd.f32 %v3153_v32, %v818_v21  ;;  %v3295_v39 = vadd.f32 %v6666_v33, %v693_v22 }
 0x1f1   : > { %v4192_v57 = vadd.f32 %v8582_v29, %v3929_v51  ;;  %v4062_v58 = vadd.f32 %v8582_v29, %v3799_v52  ;;  %v3927_v59 = vld [vmem:[#allocation2 + $0x7a0] sm:$0xff]  ;;  %v3802_v60 = vld [vmem:[#allocation2 + $0x3b8] sm:$0xff]  ;;  %3674 = vst.msk [vmem:[#allocation2 + $0x7d0] sm:$0xff] %vm309_vm0, %v3418_v45  ;;  %3544 = vst.msk [vmem:[#allocation2 + $0x3c0] sm:$0xff] %vm309_vm0, %v3288_v46  ;;  %v2644_v41 = vpop.f32.mrb[127].mxu0  ;;  %v3423_v46 = vadd.f32 %v6794_v40, %v821_v27  ;;  %v3156_v48 = vpop.f32.mrb[127].mxu1 }
 0x1f2   : > { %v4190_v1 = vadd.f32 %v8582_v29, %v3927_v59  ;;  %v4065_v2 = vadd.f32 %v8582_v29, %v3802_v60  ;;  %v3930_v3 = vld [vmem:[#allocation2 + $0x7b8] sm:$0xff]  ;;  %v3800_v4 = vld [vmem:[#allocation2 + $0x3a8] sm:$0xff]  ;;  %3672 = vst.msk [vmem:[#allocation2 + $0x7c0] sm:$0xff] %vm309_vm0, %v3416_v53  ;;  %3547 = vst.msk [vmem:[#allocation2 + $0x3d8] sm:$0xff] %vm309_vm0, %v3291_v54  ;;  %v3293_v47 = vadd.f32 %v2644_v41, %v691_v28 }
 0x1f3   : > { %v6398_v6 = vpack.c.bf16 %v4192_v57, %v4192_v57  ;;  %v6268_v7 = vpack.c.bf16 %v4062_v58, %v4062_v58  ;;  %v4193_v8 = vadd.f32 %v8582_v29, %v3930_v3  ;;  %v4063_v9 = vadd.f32 %v8582_v29, %v3800_v4  ;;  %3675 = vst.msk [vmem:[#allocation2 + $0x7d8] sm:$0xff] %vm309_vm0, %v3419_v61  ;;  %v819_v34 = vld [vmem:[#allocation2 + $0x7e8] sm:$0xff] }
 0x1f4   : > { %v3928_v10 = vld [vmem:[#allocation2 + $0x7a8] sm:$0xff]  ;;  %3545 = vst.msk [vmem:[#allocation2 + $0x3c8] sm:$0xff] %vm309_vm0, %v3289_v62  ;;  %v6396_v12 = vpack.c.bf16 %v4190_v1, %v4190_v1  ;;  %v6271_v14 = vpack.c.bf16 %v4065_v2, %v4065_v2  ;;  %3673 = vst.msk [vmem:[#allocation2 + $0x7c8] sm:$0xff] %vm309_vm0, %v3417_v5  ;;  %v3805_v30 = vld [vmem:[#allocation2 + $0x3d0] sm:$0xff]  ;;  %v3421_v54 = vadd.f32 %v3156_v48, %v819_v34 }
 0x1f5   : > { %5345 = vst.msk [vmem:[%s7803_s27 + $0x1d8] sm:$0xf] %vm5226_vm1, %v6270_v0  ;;  %v4191_v15 = vadd.f32 %v8582_v29, %v3928_v10  ;;  %5473 = vst.msk [vmem:[%s7803_s27 + $0x3d8] sm:$0xf] %vm5226_vm1, %v6398_v6  ;;  %v6399_v13 = vpack.c.bf16 %v4193_v8, %v4193_v8  ;;  %v6269_v19 = vpack.c.bf16 %v4063_v9, %v4063_v9 }
 0x1f6   : > { %5343 = vst.msk [vmem:[%s7803_s27 + $0x1d0] sm:$0xf] %vm5226_vm1, %v6268_v7  ;;  %5471 = vst.msk [vmem:[%s7803_s27 + $0x3d0] sm:$0xf] %vm5226_vm1, %v6396_v12  ;;  %v4068_v35 = vadd.f32 %v8582_v29, %v3805_v30 }
 0x1f7   : > { %5346 = vst.msk [vmem:[%s7803_s27 + $0x1dc] sm:$0xf] %vm5226_vm1, %v6271_v14  ;;  %v6397_v24 = vpack.c.bf16 %v4191_v15, %v4191_v15  ;;  %5474 = vst.msk [vmem:[%s7803_s27 + $0x3dc] sm:$0xf] %vm5226_vm1, %v6399_v13 }
 0x1f8   : > { %5344 = vst.msk [vmem:[%s7803_s27 + $0x1d4] sm:$0xf] %vm5226_vm1, %v6269_v19  ;;  %v3933_v36 = vld [vmem:[#allocation2 + $0x7d0] sm:$0xff]  ;;  %v3803_v37 = vld [vmem:[#allocation2 + $0x3c0] sm:$0xff]  ;;  %v6274_v49 = vpack.c.bf16 %v4068_v35, %v4068_v35 }
 0x1f9   : > { %5472 = vst.msk [vmem:[%s7803_s27 + $0x3d4] sm:$0xf] %vm5226_vm1, %v6397_v24  ;;  %v4196_v42 = vadd.f32 %v8582_v29, %v3933_v36  ;;  %v4066_v43 = vadd.f32 %v8582_v29, %v3803_v37  ;;  %v3931_v44 = vld [vmem:[#allocation2 + $0x7c0] sm:$0xff]  ;;  %v3806_v45 = vld [vmem:[#allocation2 + $0x3d8] sm:$0xff] }
 0x1fa   : > { %3550 = vst.msk [vmem:[#allocation2 + $0x3f0] sm:$0xff] %vm309_vm0, %v3294_v17  ;;  %3678 = vst.msk [vmem:[#allocation2 + $0x7f0] sm:$0xff] %vm309_vm0, %v3422_v23  ;;  %v4194_v50 = vadd.f32 %v8582_v29, %v3931_v44  ;;  %v4069_v51 = vadd.f32 %v8582_v29, %v3806_v45  ;;  %v3934_v52 = vld [vmem:[#allocation2 + $0x7d8] sm:$0xff] }
 0x1fb   : > { %3548 = vst.msk [vmem:[#allocation2 + $0x3e0] sm:$0xff] %vm309_vm0, %v3292_v31  ;;  %v3804_v53 = vld [vmem:[#allocation2 + $0x3c8] sm:$0xff]  ;;  %3676 = vst.msk [vmem:[#allocation2 + $0x7e0] sm:$0xff] %vm309_vm0, %v3420_v38  ;;  %v6402_v55 = vpack.c.bf16 %v4196_v42, %v4196_v42  ;;  %v6272_v56 = vpack.c.bf16 %v4066_v43, %v4066_v43  ;;  %v4197_v57 = vadd.f32 %v8582_v29, %v3934_v52 }
 0x1fc   : > { %3551 = vst.msk [vmem:[#allocation2 + $0x3f8] sm:$0xff] %vm309_vm0, %v3295_v39  ;;  %v4067_v58 = vadd.f32 %v8582_v29, %v3804_v53  ;;  %v3932_v59 = vld [vmem:[#allocation2 + $0x7c8] sm:$0xff]  ;;  %3679 = vst.msk [vmem:[#allocation2 + $0x7f8] sm:$0xff] %vm309_vm0, %v3423_v46  ;;  %v6400_v60 = vpack.c.bf16 %v4194_v50, %v4194_v50  ;;  %v6275_v61 = vpack.c.bf16 %v4069_v51, %v4069_v51 }
 0x1fd   : > { %3549 = vst.msk [vmem:[#allocation2 + $0x3e8] sm:$0xff] %vm309_vm0, %v3293_v47  ;;  %v4195_v62 = vadd.f32 %v8582_v29, %v3932_v59  ;;  %3677 = vst.msk [vmem:[#allocation2 + $0x7e8] sm:$0xff] %vm309_vm0, %v3421_v54  ;;  %v6403_v63 = vpack.c.bf16 %v4197_v57, %v4197_v57 }
 0x1fe   : > { %5349 = vst.msk [vmem:[%s7803_s27 + $0x1e8] sm:$0xf] %vm5226_vm1, %v6274_v49  ;;  %5477 = vst.msk [vmem:[%s7803_s27 + $0x3e8] sm:$0xf] %vm5226_vm1, %v6402_v55  ;;  %v6273_v0 = vpack.c.bf16 %v4067_v58, %v4067_v58 }
 0x1ff   : > { %5347 = vst.msk [vmem:[%s7803_s27 + $0x1e0] sm:$0xf] %vm5226_vm1, %v6272_v56  ;;  %5475 = vst.msk [vmem:[%s7803_s27 + $0x3e0] sm:$0xf] %vm5226_vm1, %v6400_v60  ;;  %v6401_v1 = vpack.c.bf16 %v4195_v62, %v4195_v62 }
 0x200   : > { %5350 = vst.msk [vmem:[%s7803_s27 + $0x1ec] sm:$0xf] %vm5226_vm1, %v6275_v61  ;;  %5478 = vst.msk [vmem:[%s7803_s27 + $0x3ec] sm:$0xf] %vm5226_vm1, %v6403_v63 }
 0x201   : > { %5348 = vst.msk [vmem:[%s7803_s27 + $0x1e4] sm:$0xf] %vm5226_vm1, %v6273_v0  ;;  %v3809_v2 = vld [vmem:[#allocation2 + $0x3f0] sm:$0xff]  ;;  %5476 = vst.msk [vmem:[%s7803_s27 + $0x3e4] sm:$0xf] %vm5226_vm1, %v6401_v1 }
 0x202   : > { %v4072_v3 = vadd.f32 %v8582_v29, %v3809_v2  ;;  %v3937_v4 = vld [vmem:[#allocation2 + $0x7f0] sm:$0xff]  ;;  %v3807_v5 = vld [vmem:[#allocation2 + $0x3e0] sm:$0xff] }
 0x203   : > { %v4200_v6 = vadd.f32 %v8582_v29, %v3937_v4  ;;  %v4070_v7 = vadd.f32 %v8582_v29, %v3807_v5  ;;  %v3935_v8 = vld [vmem:[#allocation2 + $0x7e0] sm:$0xff]  ;;  %v3810_v9 = vld [vmem:[#allocation2 + $0x3f8] sm:$0xff] }
 0x204   : > { %v6278_v10 = vpack.c.bf16 %v4072_v3, %v4072_v3  ;;  %v4198_v11 = vadd.f32 %v8582_v29, %v3935_v8  ;;  %v4073_v12 = vadd.f32 %v8582_v29, %v3810_v9  ;;  %v3938_v14 = vld [vmem:[#allocation2 + $0x7f8] sm:$0xff]  ;;  %v3808_v15 = vld [vmem:[#allocation2 + $0x3e8] sm:$0xff] }
 0x205   : > { %v6406_v16 = vpack.c.bf16 %v4200_v6, %v4200_v6  ;;  %v6276_v18 = vpack.c.bf16 %v4070_v7, %v4070_v7  ;;  %v4201_v13 = vadd.f32 %v8582_v29, %v3938_v14  ;;  %v4071_v19 = vadd.f32 %v8582_v29, %v3808_v15  ;;  %v3936_v20 = vld [vmem:[#allocation2 + $0x7e8] sm:$0xff] }
 0x206   : > { %5353 = vst.msk [vmem:[%s7803_s27 + $0x1f8] sm:$0xf] %vm5226_vm1, %v6278_v10  ;;  %v6404_v21 = vpack.c.bf16 %v4198_v11, %v4198_v11  ;;  %v6279_v22 = vpack.c.bf16 %v4073_v12, %v4073_v12  ;;  %v4199_v24 = vadd.f32 %v8582_v29, %v3936_v20 }
 0x207   : > { %5481 = vst.msk [vmem:[%s7803_s27 + $0x3f8] sm:$0xf] %vm5226_vm1, %v6406_v16  ;;  %5351 = vst.msk [vmem:[%s7803_s27 + $0x1f0] sm:$0xf] %vm5226_vm1, %v6276_v18  ;;  %v6407_v17 = vpack.c.bf16 %v4201_v13, %v4201_v13  ;;  %v6277_v25 = vpack.c.bf16 %v4071_v19, %v4071_v19 }
 0x208   : > { %5479 = vst.msk [vmem:[%s7803_s27 + $0x3f0] sm:$0xf] %vm5226_vm1, %v6404_v21  ;;  %5354 = vst.msk [vmem:[%s7803_s27 + $0x1fc] sm:$0xf] %vm5226_vm1, %v6279_v22  ;;  %v6405_v26 = vpack.c.bf16 %v4199_v24, %v4199_v24 }
 0x209   : > { %5482 = vst.msk [vmem:[%s7803_s27 + $0x3fc] sm:$0xf] %vm5226_vm1, %v6407_v17  ;;  %5352 = vst.msk [vmem:[%s7803_s27 + $0x1f4] sm:$0xf] %vm5226_vm1, %v6277_v25 }
 0x20a   : > { %5480 = vst.msk [vmem:[%s7803_s27 + $0x3f4] sm:$0xf] %vm5226_vm1, %v6405_v26 }
 0x20b PF: > { %s13_s14 = sadd.s32 1, %s6976_s14   ;;  %s8871_s12 = smov %s6972_s13 }
 0x20c   : > { %p10_p5 = scmp.ge.s32.totalorder %s13_s14, 10   ;;  %s8872_s13 = smov %s8874_s15 }
 0x20e   :  { %12 = sbr.rel (!%p10_p5) target bundleno = 2 (0x2), region = 76 }

</bundles_post_ra>
